<compile_context>
chip_gen: v7x
topology: tpu7x:2x2x1
jax: 0.10.0
libtpu: 0.0.40
codegen_flags: <defaults>
</compile_context>

<pallas_src>
import functools

import jax
import jax.numpy as jnp
from jax.experimental import pallas as pl
from jax.experimental.pallas import tpu as pltpu


_VMEM_LIMIT_BYTES = 48 * 1024 * 1024   # above 32 MiB default, below v7x 64 MiB


# --------------------------------------------------------------------------
# Tile-size selection
# --------------------------------------------------------------------------

def _conv_row_tile(h, target=64):
    """Even divisor of h, <= target (review: ~64 rows; halve again for v7x)."""
    if h <= target:
        return h
    best = 2
    for t in range(2, target + 1, 2):
        if h % t == 0:
            best = t
    return best


def _loss_row_tile(h, target=128):
    """Divisor of h up to ~128 rows for the loss-reduction grids."""
    if h <= target:
        return h
    for t in range(target, 0, -1):
        if h % t == 0:
            return t
    return h


# --------------------------------------------------------------------------
# In-kernel helpers
# --------------------------------------------------------------------------

def _conv3x3_rows(x, w_ref, b_ref, out_rows, width):
    """3x3, stride-1 conv over `out_rows` output rows.

    x: (out_rows + 2, W, Cin) value that already contains the 1-row halo on
    top/bottom (real neighbor rows or zeros at the image boundary).  W padding
    is handled here with zero columns.  The W-shifted 3*Cin concat is built
    once; three MXU matmuls (one per kh) slice contiguous rows of it.
    Returns (out_rows, W, Cout) float32 with bias added, no activation.
    """
    cin = x.shape[-1]
    cout = w_ref.shape[-1]
    xb = x.astype(jnp.bfloat16)
    zero_col = jnp.zeros((xb.shape[0], 1, cin), jnp.bfloat16)
    xp = jnp.concatenate([zero_col, xb, zero_col], axis=1)          # (R, W+2, Cin)
    wcat = jnp.concatenate([xp[:, k:k + width, :] for k in range(3)],
                           axis=-1)                                 # (R, W, 3*Cin)
    acc = jnp.zeros((out_rows * width, cout), jnp.float32)
    for kh in range(3):
        acc = acc + jnp.dot(
            wcat[kh:kh + out_rows].reshape(out_rows * width, 3 * cin),
            w_ref[kh], preferred_element_type=jnp.float32)
    return (acc + b_ref[...]).reshape(out_rows, width, cout)


# --------------------------------------------------------------------------
# Kernels
# --------------------------------------------------------------------------

def _block1_kernel(x_ref, mean_ref, w1_ref, b1_ref, w2_ref, b2_ref,
                   c11_ref, p1_ref):
    """Fused ImageNetNormalize + conv1_1 (+style tap) + relu + conv1_2 + relu + pool.

    Row-tiled: x_ref holds a (TH + 4)-row window (2-row halo per side, zero
    rows at the image boundary supplied by the wrapper).  1/std of the
    normalization is pre-folded into w1; the mean is subtracted here.
    """
    t = pl.program_id(1)
    last_t = pl.num_programs(1) - 1
    th4, width, _ = x_ref.shape[2], x_ref.shape[3], x_ref.shape[4]
    th = th4 - 4
    c1 = w1_ref.shape[-1]
    c2 = w2_ref.shape[-1]

    # Normalize (f32 elementwise, v5e-friendly).
    xt = x_ref[0, 0].astype(jnp.float32) - mean_ref[...]            # (TH+4, W, 3)

    # conv1_1 over TH+2 rows (the extra top/bottom row is conv1_2's halo).
    a1 = _conv3x3_rows(xt, w1_ref, b1_ref, th + 2, width)           # (TH+2, W, C1)
    c11_ref[...] = a1[1:th + 1].reshape(1, th, width, c1).astype(c11_ref.dtype)

    # relu1_1; zero the phantom halo rows at the image top/bottom so conv1_2
    # sees its own zero padding there (interior tile halos are real rows).
    a1r = jnp.maximum(a1, 0.0)
    rid = jax.lax.broadcasted_iota(jnp.int32, (th + 2, 1, 1), 0)
    keep = jnp.logical_and(jnp.logical_or(rid > 0, t > 0),
                           jnp.logical_or(rid < th + 1, t < last_t))
    a1r = jnp.where(keep, a1r, 0.0)

    # conv1_2 + relu1_2.
    a2 = _conv3x3_rows(a1r, w2_ref, b2_ref, th, width)               # (TH, W, C2)
    a2 = jnp.maximum(a2, 0.0)

    # pool_1 (2x2 max, stride 2) fused epilogue; TH is even so windows never
    # straddle row tiles.
    a2 = jnp.max(a2.reshape(th // 2, 2, width, c2), axis=1)
    p1 = jnp.max(a2.reshape(th // 2, width // 2, 2, c2), axis=2)
    p1_ref[...] = p1.reshape(1, th // 2, width // 2, c2).astype(p1_ref.dtype)


def _conv2_kernel(p_ref, w_ref, b_ref, o_ref):
    """conv2_1 on the pooled activation, row-tiled with a 1-row halo."""
    tp2, width, _ = p_ref.shape[2], p_ref.shape[3], p_ref.shape[4]
    tp = tp2 - 2
    c2 = w_ref.shape[-1]
    out = _conv3x3_rows(p_ref[0, 0], w_ref, b_ref, tp, width)        # (TP, W, C2)
    o_ref[...] = out.reshape(1, tp, width, c2).astype(o_ref.dtype)


def _feature_loss_kernel(*refs, gram_denom, content_denom,
                         with_style, with_content):
    """Gram (PyTorch (N*C, N*C) layout) + optional style MSE + content MSE.

    Grid is a reduction over row tiles of the NHWC feature map.  The gram is a
    single F^T F matmul on the lane-concatenated (rows, N*C) feature, so its
    output is full-lane-width and there is exactly one MXU call per tile.
    """
    it = iter(refs)
    f_ref = next(it)
    gtgt_ref = next(it) if with_style else None
    ctgt_ref = next(it) if with_content else None
    g_ref = next(it)
    sl_ref = next(it) if with_style else None
    cl_ref = next(it) if with_content else None

    k = pl.program_id(0)

    @pl.when(k == 0)
    def _init():
        g_ref[...] = jnp.zeros_like(g_ref)
        if with_content:
            cl_ref[...] = jnp.zeros_like(cl_ref)

    n, th, width, c = f_ref.shape
    f = f_ref[...]
    fb = f.astype(jnp.bfloat16).reshape(n, th * width, c)
    cat = jnp.concatenate([fb[i] for i in range(n)], axis=-1)        # (rows, N*C)
    g_ref[...] += jax.lax.dot_general(
        cat, cat, (((0,), (0,)), ((), ())), preferred_element_type=jnp.float32)

    if with_content:
        d = f.astype(jnp.float32) - ctgt_ref[...].astype(jnp.float32)
        cl_ref[...] += jnp.reshape(jnp.sum(d * d), (1, 1))

    @pl.when(k == pl.num_programs(0) - 1)
    def _finalize():
        g = g_ref[...] / gram_denom
        g_ref[...] = g
        if with_style:
            dg = g - gtgt_ref[...]
            sl_ref[...] = jnp.reshape(jnp.sum(dg * dg) / float(dg.size), (1, 1))
        if with_content:
            cl_ref[...] = cl_ref[...] / content_denom


# --------------------------------------------------------------------------
# pallas_call wrappers
# --------------------------------------------------------------------------

def _row_halo(x, tile, halo):
    """(N, H, ...) -> (N, H // tile, tile + 2*halo, ...) overlapping row
    windows with zero rows at the image boundary (wrapper-side layout
    plumbing so Pallas blocks never need to overlap)."""
    h = x.shape[1]
    assert h % tile == 0
    t = h // tile
    pad_cfg = [(0, 0), (halo, halo)] + [(0, 0)] * (x.ndim - 2)
    xp = jnp.pad(x, pad_cfg)
    win = tile + 2 * halo
    return jnp.stack([xp[:, i * tile:i * tile + win] for i in range(t)], axis=1)


def fused_block1(x, mean, w1, b1, w2, b2, *, tile_rows):
    """Normalize + conv1_1 (style tap) + relu + conv1_2 + relu + pool_1."""
    n, h, w, cin = x.shape
    c1, c2 = w1.shape[-1], w2.shape[-1]
    assert h % 2 == 0 and w % 2 == 0, "pool_1 needs even spatial dims"
    assert h % tile_rows == 0 and tile_rows % 2 == 0
    t = h // tile_rows
    xh = _row_halo(x, tile_rows, 2)                  # (N, T, TH+4, W, Cin)
    return pl.pallas_call(
        _block1_kernel,
        out_shape=(jax.ShapeDtypeStruct((n, h, w, c1), jnp.bfloat16),
                   jax.ShapeDtypeStruct((n, h // 2, w // 2, c2), jnp.bfloat16)),
        grid=(n, t),
        in_specs=[
            pl.BlockSpec((1, 1, tile_rows + 4, w, cin),
                         lambda i, j: (i, j, 0, 0, 0)),
            pl.BlockSpec((1, cin), lambda i, j: (0, 0)),
            pl.BlockSpec((3, 3 * cin, c1), lambda i, j: (0, 0, 0)),
            pl.BlockSpec((1, c1), lambda i, j: (0, 0)),
            pl.BlockSpec((3, 3 * c1, c2), lambda i, j: (0, 0, 0)),
            pl.BlockSpec((1, c2), lambda i, j: (0, 0)),
        ],
        out_specs=(
            pl.BlockSpec((1, tile_rows, w, c1), lambda i, j: (i, j, 0, 0)),
            pl.BlockSpec((1, tile_rows // 2, w // 2, c2),
                         lambda i, j: (i, j, 0, 0)),
        ),
        compiler_params=pltpu.CompilerParams(
            dimension_semantics=("parallel", "parallel"),
            vmem_limit_bytes=_VMEM_LIMIT_BYTES),
    )(xh, mean, w1, b1, w2, b2)


def conv2_1_call(p1, w, b, *, tile_rows):
    n, hp, wp, c1 = p1.shape
    c2 = w.shape[-1]
    assert hp % tile_rows == 0
    t = hp // tile_rows
    ph = _row_halo(p1, tile_rows, 1)                 # (N, T, TP+2, Wp, C1)
    return pl.pallas_call(
        _conv2_kernel,
        out_shape=jax.ShapeDtypeStruct((n, hp, wp, c2), jnp.bfloat16),
        grid=(n, t),
        in_specs=[
            pl.BlockSpec((1, 1, tile_rows + 2, wp, c1),
                         lambda i, j: (i, j, 0, 0, 0)),
            pl.BlockSpec((3, 3 * c1, c2), lambda i, j: (0, 0, 0)),
            pl.BlockSpec((1, c2), lambda i, j: (0, 0)),
        ],
        out_specs=pl.BlockSpec((1, tile_rows, wp, c2),
                               lambda i, j: (i, j, 0, 0)),
        compiler_params=pltpu.CompilerParams(
            dimension_semantics=("parallel", "parallel"),
            vmem_limit_bytes=_VMEM_LIMIT_BYTES),
    )(ph, w, b)


def feature_losses(feat, gram_target=None, content_target=None):
    """Returns (gram (N*C, N*C), style_loss | None, content_loss | None).

    One pallas_call streams the feature map once and produces the gram and
    (optionally) the style MSE against a target gram plus the content MSE
    against a target feature map.
    """
    n, h, w, c = feat.shape
    nc = n * c
    with_style = gram_target is not None
    with_content = content_target is not None
    th = _loss_row_tile(h)
    kernel = functools.partial(
        _feature_loss_kernel,
        gram_denom=float(n * c * h * w),
        content_denom=float(feat.size),
        with_style=with_style, with_content=with_content)

    feat_spec = pl.BlockSpec((n, th, w, c), lambda k: (0, k, 0, 0))
    scalar_spec = pl.BlockSpec((1, 1), lambda k: (0, 0))
    gram_spec = pl.BlockSpec((nc, nc), lambda k: (0, 0))

    in_specs, args = [feat_spec], [feat]
    if with_style:
        in_specs.append(gram_spec)
        args.append(gram_target)
    if with_content:
        in_specs.append(feat_spec)
        args.append(content_target)

    out_shapes = [jax.ShapeDtypeStruct((nc, nc), jnp.float32)]
    out_specs = [gram_spec]
    if with_style:
        out_shapes.append(jax.ShapeDtypeStruct((1, 1), jnp.float32))
        out_specs.append(scalar_spec)
    if with_content:
        out_shapes.append(jax.ShapeDtypeStruct((1, 1), jnp.float32))
        out_specs.append(scalar_spec)

    outs = pl.pallas_call(
        kernel,
        out_shape=tuple(out_shapes),
        grid=(h // th,),
        in_specs=in_specs,
        out_specs=tuple(out_specs),
        compiler_params=pltpu.CompilerParams(
            dimension_semantics=("arbitrary",)),
    )(*args)

    gram = outs[0]
    idx = 1
    style_loss = outs[idx][0, 0] if with_style else None
    idx += int(with_style)
    content_loss = outs[idx][0, 0] if with_content else None
    return gram, style_loss, content_loss


# --------------------------------------------------------------------------
# Model wrapper
# --------------------------------------------------------------------------

def _he_conv(key, cin, cout):
    kw, kb = jax.random.split(key)
    w = jax.random.normal(kw, (3, 3, cin, cout), jnp.float32) * jnp.sqrt(2.0 / (9 * cin))
    b = jax.random.normal(kb, (1, cout), jnp.float32) * 0.01
    return w, b


def _fold_and_pack(w, scale=None):
    """Optionally fold a per-input-channel scale into w, then pack to
    (3, 3*Cin, Cout) bf16 (kw-major, matching the in-kernel W concat)."""
    kh, kw_, cin, cout = w.shape
    if scale is not None:
        w = w * scale.reshape(1, 1, cin, 1)
    return w.reshape(kh, kw_ * cin, cout).astype(jnp.bfloat16)


class NSTVGG19Pallas:
    """Pallas TPU implementation of NST_VGG19 for content_layers=('conv2_1',),
    style_layers=('conv1_1', 'conv2_1'), one style image.

    forward(x) returns the conv2_1 feature map (NCHW, float32); the content /
    style losses are stored on the module, mirroring PyTorch's side effects.
    """

    def __init__(self, style_imgs, content_layers=('conv2_1',),
                 style_layers=('conv1_1', 'conv2_1'), *, seed=0):
        assert tuple(content_layers) == ('conv2_1',)
        assert tuple(style_layers) == ('conv1_1', 'conv2_1')
        assert len(style_imgs) == 1
        keys = jax.random.split(jax.random.PRNGKey(seed), 3)
        # TODO(synk): real VGG-19 uses ImageNet-pretrained weights; synthetic He init here.
        w11, b11 = _he_conv(keys[0], 3, 64)
        w12, b12 = _he_conv(keys[1], 64, 64)
        w21, b21 = _he_conv(keys[2], 64, 128)

        mean = jnp.array([0.485, 0.456, 0.406], jnp.float32)
        std = jnp.array([0.229, 0.224, 0.225], jnp.float32)
        # ImageNetNormalize folded into conv1_1: 1/std scales the weights, the
        # mean is subtracted inside the fused kernel.
        self._w11 = _fold_and_pack(w11, scale=1.0 / std)
        self._w12 = _fold_and_pack(w12)
        self._w21 = _fold_and_pack(w21)
        self._b11, self._b12, self._b21 = b11, b12, b21
        self._mean = mean.reshape(1, 3)

        # Targets from the style image (as init_nst_model_and_losses does:
        # the ContentLoss target is nst_model(style_imgs[0]) at conv2_1).
        s_nhwc = jnp.transpose(style_imgs[0], (0, 2, 3, 1)).astype(jnp.float32)
        c11_s, c21_s = self._features(s_nhwc)
        g11, _, _ = feature_losses(c11_s)
        g21, _, _ = feature_losses(c21_s)
        self._style_targets = (g11, g21)
        self._content_target = c21_s            # bf16 NHWC
        self.content_losses = [None]
        self.style_losses = [None, None]

    def _features(self, x_nhwc):
        t1 = _conv_row_tile(x_nhwc.shape[1])
        c11, p1 = fused_block1(x_nhwc, self._mean, self._w11, self._b11,
                               self._w12, self._b12, tile_rows=t1)
        t2 = _conv_row_tile(p1.shape[1])
        c21 = conv2_1_call(p1, self._w21, self._b21, tile_rows=t2)
        return c11, c21

    def forward(self, x_nchw):
        x = jnp.transpose(x_nchw, (0, 2, 3, 1)).astype(jnp.float32)   # NCHW -> NHWC
        assert x.shape[0] == self._content_target.shape[0], \
            "batch must match the style/content targets"
        c11, c21 = self._features(x)
        # StyleLoss / ContentLoss side effects (pass-through modules in PyTorch).
        _, sl11, _ = feature_losses(c11, gram_target=self._style_targets[0])
        _, sl21, cl21 = feature_losses(c21, gram_target=self._style_targets[1],
                                       content_target=self._content_target)
        self.style_losses = [sl11, sl21]
        self.content_losses = [cl21]
        return jnp.transpose(c21.astype(jnp.float32), (0, 3, 1, 2))   # NHWC -> NCHW

    __call__ = forward


# --------------------------------------------------------------------------
# main
# --------------------------------------------------------------------------

if __name__ == "__main__":
    key = jax.random.PRNGKey(0)
    k_content, k_style = jax.random.split(key)
    # Small shapes: batch=2, RGB, 16x16 spatial (NCHW, like PyTorch).
    x = jax.random.uniform(k_content, (2, 3, 16, 16), jnp.float32)
    style_img = jax.random.uniform(k_style, (2, 3, 16, 16), jnp.float32)

    model = NSTVGG19Pallas([style_img], ('conv2_1',), ('conv1_1', 'conv2_1'))
    out = model(x)
    out = jax.block_until_ready(out)
    jax.block_until_ready(model.style_losses)
    jax.block_until_ready(model.content_losses)

    assert out.shape == (2, 128, 8, 8) and out.dtype == jnp.float32
    assert all(l is not None for l in model.style_losses)
    assert model.content_losses[0] is not None
    print("KERNEL_OK")
</pallas_src>

<mosaic_0001>
module attributes {stable_mosaic.version = 11 : i64} {
  func.func @_block1_kernel(%arg0: i32, %arg1: i32, %arg2: memref<1x1x20x16x3xf32, #tpu.memory_space<vmem>>, %arg3: memref<1x3xf32, #tpu.memory_space<vmem>>, %arg4: memref<3x9x64xbf16, #tpu.memory_space<vmem>>, %arg5: memref<1x64xf32, #tpu.memory_space<vmem>>, %arg6: memref<3x192x64xbf16, #tpu.memory_space<vmem>>, %arg7: memref<1x64xf32, #tpu.memory_space<vmem>>, %arg8: memref<1x16x16x64xbf16, #tpu.memory_space<vmem>>, %arg9: memref<1x8x8x64xbf16, #tpu.memory_space<vmem>>) attributes {dimension_semantics = [#tpu.dimension_semantics<parallel>, #tpu.dimension_semantics<parallel>], iteration_bounds = array<i64: 2, 1>, scalar_prefetch = 0 : i64, scratch_operands = 0 : i64, tpu.core_type = #tpu.core_type<tc>, window_params = [{transform_indices = @transform_0, window_bounds = array<i64: 1, 1, 20, 16, 3>}, {pipeline_mode = #tpu.pipeline_mode<synchronous>, transform_indices = @transform_1, window_bounds = array<i64: 1, 3>}, {pipeline_mode = #tpu.pipeline_mode<synchronous>, transform_indices = @transform_2, window_bounds = array<i64: 3, 9, 64>}, {pipeline_mode = #tpu.pipeline_mode<synchronous>, transform_indices = @transform_3, window_bounds = array<i64: 1, 64>}, {pipeline_mode = #tpu.pipeline_mode<synchronous>, transform_indices = @transform_4, window_bounds = array<i64: 3, 192, 64>}, {pipeline_mode = #tpu.pipeline_mode<synchronous>, transform_indices = @transform_5, window_bounds = array<i64: 1, 64>}, {transform_indices = @transform_6, window_bounds = array<i64: 1, 16, 16, 64>}, {transform_indices = @transform_7, window_bounds = array<i64: 1, 8, 8, 64>}]} {
    %c0 = arith.constant 0 : index
    %c0_0 = arith.constant 0 : index
    %c0_1 = arith.constant 0 : index
    %c0_2 = arith.constant 0 : index
    %c0_3 = arith.constant 0 : index
    %0 = vector.load %arg2[%c0, %c0_0, %c0_1, %c0_2, %c0_3] : memref<1x1x20x16x3xf32, #tpu.memory_space<vmem>>, vector<1x1x20x16x3xf32>
    %1 = vector.shape_cast %0 : vector<1x1x20x16x3xf32> to vector<20x16x3xf32>
    %c0_4 = arith.constant 0 : index
    %c0_5 = arith.constant 0 : index
    %2 = vector.load %arg3[%c0_4, %c0_5] : memref<1x3xf32, #tpu.memory_space<vmem>>, vector<1x3xf32>
    %3 = vector.shape_cast %2 : vector<1x3xf32> to vector<1x1x3xf32>
    %4 = vector.broadcast %3 : vector<1x1x3xf32> to vector<20x16x3xf32>
    %5 = arith.subf %1, %4 : vector<20x16x3xf32>
    %6 = arith.truncf %5 : vector<20x16x3xf32> to vector<20x16x3xbf16>
    %cst = arith.constant 0.000000e+00 : bf16
    %7 = vector.broadcast %cst : bf16 to vector<20x1x3xbf16>
    %8 = tpu.concatenate %7, %6, %7 in 1 : vector<20x1x3xbf16>, vector<20x16x3xbf16>, vector<20x1x3xbf16> -> vector<20x18x3xbf16>
    %9 = vector.extract_strided_slice %8 {offsets = [0, 0, 0], sizes = [20, 16, 3], strides = [1, 1, 1]} : vector<20x18x3xbf16> to vector<20x16x3xbf16>
    %10 = vector.extract_strided_slice %8 {offsets = [0, 1, 0], sizes = [20, 16, 3], strides = [1, 1, 1]} : vector<20x18x3xbf16> to vector<20x16x3xbf16>
    %11 = vector.extract_strided_slice %8 {offsets = [0, 2, 0], sizes = [20, 16, 3], strides = [1, 1, 1]} : vector<20x18x3xbf16> to vector<20x16x3xbf16>
    %12 = tpu.concatenate %9, %10, %11 in 2 : vector<20x16x3xbf16>, vector<20x16x3xbf16>, vector<20x16x3xbf16> -> vector<20x16x9xbf16>
    %cst_6 = arith.constant 0.000000e+00 : f32
    %13 = vector.broadcast %cst_6 : f32 to vector<288x64xf32>
    %14 = vector.extract_strided_slice %12 {offsets = [0, 0, 0], sizes = [18, 16, 9], strides = [1, 1, 1]} : vector<20x16x9xbf16> to vector<18x16x9xbf16>
    %15 = vector.shape_cast %14 : vector<18x16x9xbf16> to vector<288x9xbf16>
    %c0_7 = arith.constant 0 : index
    %c0_8 = arith.constant 0 : index
    %c0_9 = arith.constant 0 : index
    %16 = vector.load %arg4[%c0_7, %c0_8, %c0_9] : memref<3x9x64xbf16, #tpu.memory_space<vmem>>, vector<1x9x64xbf16>
    %17 = vector.shape_cast %16 : vector<1x9x64xbf16> to vector<9x64xbf16>
    %cst_10 = arith.constant dense<0.000000e+00> : vector<288x64xf32>
    %18 = tpu.matmul %15, %17, %cst_10 {dimension_numbers = #tpu.dot_dimension_numbers<[1], [0], [0], [1], [0, 0, 1, 1], [], []>} : vector<288x9xbf16>, vector<9x64xbf16>, vector<288x64xf32> -> vector<288x64xf32>
    %19 = arith.addf %13, %18 : vector<288x64xf32>
    %20 = vector.extract_strided_slice %12 {offsets = [1, 0, 0], sizes = [18, 16, 9], strides = [1, 1, 1]} : vector<20x16x9xbf16> to vector<18x16x9xbf16>
    %21 = vector.shape_cast %20 : vector<18x16x9xbf16> to vector<288x9xbf16>
    %c1 = arith.constant 1 : index
    %c0_11 = arith.constant 0 : index
    %c0_12 = arith.constant 0 : index
    %22 = vector.load %arg4[%c1, %c0_11, %c0_12] : memref<3x9x64xbf16, #tpu.memory_space<vmem>>, vector<1x9x64xbf16>
    %23 = vector.shape_cast %22 : vector<1x9x64xbf16> to vector<9x64xbf16>
    %cst_13 = arith.constant dense<0.000000e+00> : vector<288x64xf32>
    %24 = tpu.matmul %21, %23, %cst_13 {dimension_numbers = #tpu.dot_dimension_numbers<[1], [0], [0], [1], [0, 0, 1, 1], [], []>} : vector<288x9xbf16>, vector<9x64xbf16>, vector<288x64xf32> -> vector<288x64xf32>
    %25 = arith.addf %19, %24 : vector<288x64xf32>
    %26 = vector.extract_strided_slice %12 {offsets = [2, 0, 0], sizes = [18, 16, 9], strides = [1, 1, 1]} : vector<20x16x9xbf16> to vector<18x16x9xbf16>
    %27 = vector.shape_cast %26 : vector<18x16x9xbf16> to vector<288x9xbf16>
    %c2 = arith.constant 2 : index
    %c0_14 = arith.constant 0 : index
    %c0_15 = arith.constant 0 : index
    %28 = vector.load %arg4[%c2, %c0_14, %c0_15] : memref<3x9x64xbf16, #tpu.memory_space<vmem>>, vector<1x9x64xbf16>
    %29 = vector.shape_cast %28 : vector<1x9x64xbf16> to vector<9x64xbf16>
    %cst_16 = arith.constant dense<0.000000e+00> : vector<288x64xf32>
    %30 = tpu.matmul %27, %29, %cst_16 {dimension_numbers = #tpu.dot_dimension_numbers<[1], [0], [0], [1], [0, 0, 1, 1], [], []>} : vector<288x9xbf16>, vector<9x64xbf16>, vector<288x64xf32> -> vector<288x64xf32>
    %31 = arith.addf %25, %30 : vector<288x64xf32>
    %c0_17 = arith.constant 0 : index
    %c0_18 = arith.constant 0 : index
    %32 = vector.load %arg5[%c0_17, %c0_18] : memref<1x64xf32, #tpu.memory_space<vmem>>, vector<1x64xf32>
    %33 = vector.broadcast %32 : vector<1x64xf32> to vector<288x64xf32>
    %34 = arith.addf %31, %33 : vector<288x64xf32>
    %35 = vector.shape_cast %34 : vector<288x64xf32> to vector<18x16x64xf32>
    %36 = vector.extract_strided_slice %35 {offsets = [1, 0, 0], sizes = [16, 16, 64], strides = [1, 1, 1]} : vector<18x16x64xf32> to vector<16x16x64xf32>
    %37 = vector.shape_cast %36 : vector<16x16x64xf32> to vector<1x16x16x64xf32>
    %38 = arith.truncf %37 : vector<1x16x16x64xf32> to vector<1x16x16x64xbf16>
    %c0_19 = arith.constant 0 : index
    %c0_20 = arith.constant 0 : index
    %c0_21 = arith.constant 0 : index
    %c0_22 = arith.constant 0 : index
    %39 = vector.load %arg8[%c0_19, %c0_20, %c0_21, %c0_22] : memref<1x16x16x64xbf16, #tpu.memory_space<vmem>>, vector<1x16x16x64xbf16>
    tpu.vector_store %arg8[%c0_19, %c0_20, %c0_21, %c0_22], %38 {strides = array<i32>} : memref<1x16x16x64xbf16, #tpu.memory_space<vmem>>, vector<1x16x16x64xbf16>,
    %cst_23 = arith.constant 0.000000e+00 : f32
    %40 = vector.broadcast %cst_23 : f32 to vector<18x16x64xf32>
    %41 = arith.maximumf %35, %40 : vector<18x16x64xf32>
    %42 = tpu.iota {dimensions = array<i32: 0>} : vector<18x1x1xi32>
    %c0_i32 = arith.constant 0 : i32
    %43 = vector.broadcast %c0_i32 : i32 to vector<18x1x1xi32>
    %44 = arith.cmpi sgt, %42, %43 : vector<18x1x1xi32>
    %c0_i32_24 = arith.constant 0 : i32
    %45 = arith.cmpi sgt, %arg1, %c0_i32_24 : i32
    %46 = vector.broadcast %45 : i1 to vector<18x1x1xi1>
    %47 = arith.ori %44, %46 : vector<18x1x1xi1>
    %c17_i32 = arith.constant 17 : i32
    %48 = vector.broadcast %c17_i32 : i32 to vector<18x1x1xi32>
    %49 = arith.cmpi slt, %42, %48 : vector<18x1x1xi32>
    %c0_i32_25 = arith.constant 0 : i32
    %50 = arith.cmpi slt, %arg1, %c0_i32_25 : i32
    %51 = vector.broadcast %50 : i1 to vector<18x1x1xi1>
    %52 = arith.ori %49, %51 : vector<18x1x1xi1>
    %53 = arith.andi %47, %52 : vector<18x1x1xi1>
    %cst_26 = arith.constant 0.000000e+00 : f32
    %54 = vector.shape_cast %53 : vector<18x1x1xi1> to vector<18x1x1xi1>
    %55 = vector.broadcast %54 : vector<18x1x1xi1> to vector<18x16x64xi1>
    %56 = vector.broadcast %cst_26 : f32 to vector<18x16x64xf32>
    %57 = arith.select %55, %41, %56 : vector<18x16x64xi1>, vector<18x16x64xf32>
    %58 = arith.truncf %57 : vector<18x16x64xf32> to vector<18x16x64xbf16>
    %cst_27 = arith.constant 0.000000e+00 : bf16
    %59 = vector.broadcast %cst_27 : bf16 to vector<18x1x64xbf16>
    %60 = tpu.concatenate %59, %58, %59 in 1 : vector<18x1x64xbf16>, vector<18x16x64xbf16>, vector<18x1x64xbf16> -> vector<18x18x64xbf16>
    %61 = vector.extract_strided_slice %60 {offsets = [0, 0, 0], sizes = [18, 16, 64], strides = [1, 1, 1]} : vector<18x18x64xbf16> to vector<18x16x64xbf16>
    %62 = vector.extract_strided_slice %60 {offsets = [0, 1, 0], sizes = [18, 16, 64], strides = [1, 1, 1]} : vector<18x18x64xbf16> to vector<18x16x64xbf16>
    %63 = vector.extract_strided_slice %60 {offsets = [0, 2, 0], sizes = [18, 16, 64], strides = [1, 1, 1]} : vector<18x18x64xbf16> to vector<18x16x64xbf16>
    %64 = tpu.concatenate %61, %62, %63 in 2 : vector<18x16x64xbf16>, vector<18x16x64xbf16>, vector<18x16x64xbf16> -> vector<18x16x192xbf16>
    %cst_28 = arith.constant 0.000000e+00 : f32
    %65 = vector.broadcast %cst_28 : f32 to vector<256x64xf32>
    %66 = vector.extract_strided_slice %64 {offsets = [0, 0, 0], sizes = [16, 16, 192], strides = [1, 1, 1]} : vector<18x16x192xbf16> to vector<16x16x192xbf16>
    %67 = vector.shape_cast %66 : vector<16x16x192xbf16> to vector<256x192xbf16>
    %c0_29 = arith.constant 0 : index
    %c0_30 = arith.constant 0 : index
    %c0_31 = arith.constant 0 : index
    %68 = vector.load %arg6[%c0_29, %c0_30, %c0_31] : memref<3x192x64xbf16, #tpu.memory_space<vmem>>, vector<1x192x64xbf16>
    %69 = vector.shape_cast %68 : vector<1x192x64xbf16> to vector<192x64xbf16>
    %cst_32 = arith.constant dense<0.000000e+00> : vector<256x64xf32>
    %70 = tpu.matmul %67, %69, %cst_32 {dimension_numbers = #tpu.dot_dimension_numbers<[1], [0], [0], [1], [0, 0, 1, 1], [], []>} : vector<256x192xbf16>, vector<192x64xbf16>, vector<256x64xf32> -> vector<256x64xf32>
    %71 = arith.addf %65, %70 : vector<256x64xf32>
    %72 = vector.extract_strided_slice %64 {offsets = [1, 0, 0], sizes = [16, 16, 192], strides = [1, 1, 1]} : vector<18x16x192xbf16> to vector<16x16x192xbf16>
    %73 = vector.shape_cast %72 : vector<16x16x192xbf16> to vector<256x192xbf16>
    %c1_33 = arith.constant 1 : index
    %c0_34 = arith.constant 0 : index
    %c0_35 = arith.constant 0 : index
    %74 = vector.load %arg6[%c1_33, %c0_34, %c0_35] : memref<3x192x64xbf16, #tpu.memory_space<vmem>>, vector<1x192x64xbf16>
    %75 = vector.shape_cast %74 : vector<1x192x64xbf16> to vector<192x64xbf16>
    %cst_36 = arith.constant dense<0.000000e+00> : vector<256x64xf32>
    %76 = tpu.matmul %73, %75, %cst_36 {dimension_numbers = #tpu.dot_dimension_numbers<[1], [0], [0], [1], [0, 0, 1, 1], [], []>} : vector<256x192xbf16>, vector<192x64xbf16>, vector<256x64xf32> -> vector<256x64xf32>
    %77 = arith.addf %71, %76 : vector<256x64xf32>
    %78 = vector.extract_strided_slice %64 {offsets = [2, 0, 0], sizes = [16, 16, 192], strides = [1, 1, 1]} : vector<18x16x192xbf16> to vector<16x16x192xbf16>
    %79 = vector.shape_cast %78 : vector<16x16x192xbf16> to vector<256x192xbf16>
    %c2_37 = arith.constant 2 : index
    %c0_38 = arith.constant 0 : index
    %c0_39 = arith.constant 0 : index
    %80 = vector.load %arg6[%c2_37, %c0_38, %c0_39] : memref<3x192x64xbf16, #tpu.memory_space<vmem>>, vector<1x192x64xbf16>
    %81 = vector.shape_cast %80 : vector<1x192x64xbf16> to vector<192x64xbf16>
    %cst_40 = arith.constant dense<0.000000e+00> : vector<256x64xf32>
    %82 = tpu.matmul %79, %81, %cst_40 {dimension_numbers = #tpu.dot_dimension_numbers<[1], [0], [0], [1], [0, 0, 1, 1], [], []>} : vector<256x192xbf16>, vector<192x64xbf16>, vector<256x64xf32> -> vector<256x64xf32>
    %83 = arith.addf %77, %82 : vector<256x64xf32>
    %c0_41 = arith.constant 0 : index
    %c0_42 = arith.constant 0 : index
    %84 = vector.load %arg7[%c0_41, %c0_42] : memref<1x64xf32, #tpu.memory_space<vmem>>, vector<1x64xf32>
    %85 = vector.broadcast %84 : vector<1x64xf32> to vector<256x64xf32>
    %86 = arith.addf %83, %85 : vector<256x64xf32>
    %87 = vector.shape_cast %86 : vector<256x64xf32> to vector<16x16x64xf32>
    %cst_43 = arith.constant 0.000000e+00 : f32
    %88 = vector.broadcast %cst_43 : f32 to vector<16x16x64xf32>
    %89 = arith.maximumf %87, %88 : vector<16x16x64xf32>
    %90 = vector.shape_cast %89 : vector<16x16x64xf32> to vector<8x2x16x64xf32>
    %cst_44 = arith.constant dense<0xFF800000> : vector<8x16x64xf32>
    %91 = vector.multi_reduction <maximumf>, %90, %cst_44 [1] : vector<8x2x16x64xf32> to vector<8x16x64xf32>
    %92 = vector.shape_cast %91 : vector<8x16x64xf32> to vector<8x8x2x64xf32>
    %cst_45 = arith.constant dense<0xFF800000> : vector<8x8x64xf32>
    %93 = vector.multi_reduction <maximumf>, %92, %cst_45 [2] : vector<8x8x2x64xf32> to vector<8x8x64xf32>
    %94 = vector.shape_cast %93 : vector<8x8x64xf32> to vector<1x8x8x64xf32>
    %95 = arith.truncf %94 : vector<1x8x8x64xf32> to vector<1x8x8x64xbf16>
    %c0_46 = arith.constant 0 : index
    %c0_47 = arith.constant 0 : index
    %c0_48 = arith.constant 0 : index
    %c0_49 = arith.constant 0 : index
    %96 = vector.load %arg9[%c0_46, %c0_47, %c0_48, %c0_49] : memref<1x8x8x64xbf16, #tpu.memory_space<vmem>>, vector<1x8x8x64xbf16>
    tpu.vector_store %arg9[%c0_46, %c0_47, %c0_48, %c0_49], %95 {strides = array<i32>} : memref<1x8x8x64xbf16, #tpu.memory_space<vmem>>, vector<1x8x8x64xbf16>,
    return
  }
  func.func @transform_0(%arg0: i32, %arg1: i32) -> (i32, i32, i32, i32, i32) {
    %c0_i32 = arith.constant 0 : i32
    %c0_i32_0 = arith.constant 0 : i32
    %c0_i32_1 = arith.constant 0 : i32
    %c0_i32_2 = arith.constant 0 : i32
    return %arg0, %arg1, %c0_i32, %c0_i32_0, %c0_i32_1 : i32, i32, i32, i32, i32
  }
  func.func @transform_1(%arg0: i32, %arg1: i32) -> (i32, i32) {
    %c0_i32 = arith.constant 0 : i32
    %c0_i32_0 = arith.constant 0 : i32
    %c0_i32_1 = arith.constant 0 : i32
    return %c0_i32, %c0_i32_0 : i32, i32
  }
  func.func @transform_2(%arg0: i32, %arg1: i32) -> (i32, i32, i32) {
    %c0_i32 = arith.constant 0 : i32
    %c0_i32_0 = arith.constant 0 : i32
    %c0_i32_1 = arith.constant 0 : i32
    %c0_i32_2 = arith.constant 0 : i32
    return %c0_i32, %c0_i32_0, %c0_i32_1 : i32, i32, i32
  }
  func.func @transform_3(%arg0: i32, %arg1: i32) -> (i32, i32) {
    %c0_i32 = arith.constant 0 : i32
    %c0_i32_0 = arith.constant 0 : i32
    %c0_i32_1 = arith.constant 0 : i32
    return %c0_i32, %c0_i32_0 : i32, i32
  }
  func.func @transform_4(%arg0: i32, %arg1: i32) -> (i32, i32, i32) {
    %c0_i32 = arith.constant 0 : i32
    %c0_i32_0 = arith.constant 0 : i32
    %c0_i32_1 = arith.constant 0 : i32
    %c0_i32_2 = arith.constant 0 : i32
    return %c0_i32, %c0_i32_0, %c0_i32_1 : i32, i32, i32
  }
  func.func @transform_5(%arg0: i32, %arg1: i32) -> (i32, i32) {
    %c0_i32 = arith.constant 0 : i32
    %c0_i32_0 = arith.constant 0 : i32
    %c0_i32_1 = arith.constant 0 : i32
    return %c0_i32, %c0_i32_0 : i32, i32
  }
  func.func @transform_6(%arg0: i32, %arg1: i32) -> (i32, i32, i32, i32) {
    %c0_i32 = arith.constant 0 : i32
    %c0_i32_0 = arith.constant 0 : i32
    %c0_i32_1 = arith.constant 0 : i32
    return %arg0, %arg1, %c0_i32, %c0_i32_0 : i32, i32, i32, i32
  }
  func.func @transform_7(%arg0: i32, %arg1: i32) -> (i32, i32, i32, i32) {
    %c0_i32 = arith.constant 0 : i32
    %c0_i32_0 = arith.constant 0 : i32
    %c0_i32_1 = arith.constant 0 : i32
    return %arg0, %arg1, %c0_i32, %c0_i32_0 : i32, i32, i32, i32
  }
}

</mosaic_0001>

<bundles_post_ra>
// kernel: tpu_custom_call.1
= control target key start
LH: loop header
LB: loop body
LE: loop exit
PB: predicated region body
PF: predicated region fallthrough
CT: control target
= control target key end

     0   :  { %13 = vsyncpa [#allocation3], 0  ;;  %s8086_s0 = inlined_call_operand.vmem [shape: f32[2,1,20,16,3], index: 0, kind: input, shape index: {}]   ;;  %s8087_s1 = inlined_call_operand.vmem [shape: f32[1,3], index: 1, kind: input, shape index: {}]   ;;  %s8088_s2 = inlined_call_operand.vmem [shape: bf16[3,9,64], index: 2, kind: input, shape index: {}]   ;;  %s8089_s3 = inlined_call_operand.vmem [shape: f32[1,64], index: 3, kind: input, shape index: {}]   ;;  %s8090_s4 = inlined_call_operand.vmem [shape: bf16[3,192,64], index: 4, kind: input, shape index: {}]   ;;  %s8091_s5 = inlined_call_operand.vmem [shape: f32[1,64], index: 5, kind: input, shape index: {}]   ;;  %s8092_s6 = inlined_call_operand.hbm [shape: bf16[2,16,16,64], index: 6, kind: output, shape index: {0}]   ;;  %s8093_s7 = inlined_call_operand.hbm [shape: bf16[2,8,8,64], index: 7, kind: output, shape index: {1}]  }
   0x1   :  { %15 = vsyncpa [#allocation3 + $0x1], 0 }
   0x2   :  { %16 = vsyncpa [#allocation5], 0 }
   0x3   :  { %18 = vsyncpa [#allocation5 + $0x1], 0  ;;  %s5948_s24 = smov 0   ;;  %s5950_s25 = smov 0  }
   0x4   :  { %s5952_s26 = smov 0   ;;  %s5954_s27 = smov 0  }
   0x5   :  { %s5956_s28 = smov 0   ;;  %s5958_s29 = smov 0  }
   0x6 LB: > { %s5043_s30 = sadd.s32 4294967295, %s5897_s29   ;;  %s5044_s8 = sadd.s32 4294967294, %s5897_s29   ;;  %s5897_s29 = sphi %s5958_s29, %s24_s29   ;;  %s5893_s28 = sphi %s5956_s28, %s8150_s28   ;;  %s5889_s27 = sphi %s5954_s27, %s8149_s27   ;;  %s5885_s26 = sphi %s5952_s26, %s8148_s26   ;;  %s5881_s25 = sphi %s5950_s25, %s8147_s25   ;;  %s5877_s24 = sphi %s5948_s24, %s8146_s24  }
   0x7   : > { %s36_s9 = sadd.s32 1, %s5893_s28  ;;  %s178_s10 = sadd.s32 1, %s5885_s26 }
   0x8   : > { %p38_p0 = scmp.ge.s32.totalorder %s36_s9, 2  ;;  %p188_p1 = scmp.ne.s32.totalorder %s5885_s26, %s5881_s25 }
   0x9   : > { %p189_p2 = scmp.eq.s32.totalorder %s5043_s30, 1  ;;  %p194_p3 = scmp.ne.s32.totalorder %s5881_s25, %s5877_s24 }
   0xa   : > { %s8152_s9 = smov (%p38_p0, %s36_s9), 0  ;;  %p195_p5 = scmp.eq.s32.totalorder %s5044_s8, 1 }
   0xb   : > { %p5988_p4 = por %p189_p2, %p188_p1  ;;  %s173_s12 = ssub.s32 %s5893_s28, %s8152_s9 }
   0xc   : > { %p5047_p6 = scmp.ge.s32.totalorder %s5897_s29, 1  ;;  %p176_p7 = scmp.eq.s32.totalorder %s173_s12, 0 }
   0xd   : > { %p5995_p8 = por %p195_p5, %p194_p3  ;;  %p268_p9 = scmp.lt.s32.totalorder %s5897_s29, 3 }
   0xe   : > { %s6001_s14 = scalar_select %p176_p7, %s5885_s26, %s178_s10  }
   0xf   : > { %p269_p10 = pnand %p5047_p6, %p268_p9 }
  0x11   : > { %272 = sbr.rel (%p269_p10) target bundleno = 1240 (0x4d8), region = 44 }
  0x18   : > { %p309_p11 = scmp.lt.s32.totalorder %s5889_s27, 1  ;;  %v6008_v0 = vld [vmem:[%s8087_s1] ss:$0 sm:$0xff]  ;;  %vm608_vm0 = vcmask 1040384   ;;  %vm609_vm1 = vsmask.f32 256 }
  0x19   : > { %vm972_vm2 = vcmask 1046528   ;;  %vm651_vm3 = vsmask.f32 7424  ;;  %vm6046_vm4 = vmand %vm608_vm0, %vm609_vm1  ;;  %s5899_s22 = smov 6   ;;  %s5900_s23 = smov 3   ;;  %vm1202_vm5 = vcmask 1043456  }
  0x1a   : > { %s310_s15 = scalar_select %p309_p11, %s5889_s27, 1  ;;  %vm1203_vm6 = vcmask 1044480   ;;  %vm1073_vm7 = vcmask 23552   ;;  %vm1114_vm8 = vcmask 48128   ;;  %vm1165_vm9 = vcmask 72704  }
  0x1b   : > { %s6649_s17 = sand.u32 1, %s5881_s25   ;;  %vm1970_vm10 = vcmask 519168   ;;  %vm2645_vm11 = vcmask 523264   ;;  %vm4030_vm12 = vcmask 517120   ;;  %vm4799_vm13 = vcmask 1041409  }
  0x1c   : > { %s5678_s18 = smul.u32 320, %s310_s15  ;;  %s5048_s30 = sshll.u32 %s6649_s17, 7  ;;  %vm4801_vm14 = vcmask 1042434   ;;  %vm4803_vm15 = vcmask 1043459   ;;  %vm4805_vm0 = vcmask 1044484   ;;  %vm4807_vm1 = vcmask 1045509  }
  0x1d   : > { %s6680_s19 = scalar_lea.vmem [#allocation2], %s5048_s30  ;;  %s5905_s15 = smov [#allocation2]  }
  0x1e   : > { %s6013_s21 = scalar_lea.vmem %s8086_s0, %s5678_s18  ;;  %s5049_s18 = sshll.u32 %s6649_s17, 5 }
  0x1f   : > { %v323_v1 = vld [vmem:[%s6013_s21 + $0x10] sm:$0xff]  ;;  %v324_v2 = vld [vmem:[%s6013_s21 + $0x18] sm:$0xff]  ;;  %v325_v3 = vld [vmem:[%s6013_s21 + $0x20] sm:$0xff]  ;;  %s7643_s20 = scalar_lea.vmem [#allocation4], %s5049_s18  ;;  %s5791_s16 = sshll.u32 %s5905_s15, 4  ;;  %s5792_s16 = int_to_ptr.vmem [resolvable:$false] %s5791_s16 }
  0x20   : > { %v370_v4 = vsub.f32 %v323_v1, %v6008_v0  ;;  %v371_v5 = vsub.f32 %v324_v2, %v6008_v0  ;;  %v326_v6 = vld [vmem:[%s6013_s21 + $0x28] sm:$0xff]  ;;  %v372_v7 = vsub.f32 %v325_v3, %v6008_v0  ;;  %v329_v8 = vld [vmem:[%s6013_s21 + $0x40] sm:$0xff]  ;;  %v327_v13 = vld [vmem:[%s6013_s21 + $0x30] sm:$0xff]  ;;  %s5793_s18 = scalar_lea.vmem %s5792_s16, 4096 }
  0x21   : > { %v330_v9 = vld [vmem:[%s6013_s21 + $0x48] sm:$0xff]  ;;  %v373_v10 = vsub.f32 %v326_v6, %v6008_v0  ;;  %v376_v11 = vsub.f32 %v329_v8, %v6008_v0  ;;  %v328_v14 = vld [vmem:[%s6013_s21 + $0x38] sm:$0xff]  ;;  %v333_v15 = vld [vmem:[%s6013_s21 + $0x60] sm:$0xff]  ;;  %v374_v17 = vsub.f32 %v327_v13, %v6008_v0 }
  0x22   : > { %v377_v12 = vsub.f32 %v330_v9, %v6008_v0  ;;  %v409_v16 = vpack.c.bf16 %v371_v5, %v370_v4  ;;  %v375_v18 = vsub.f32 %v328_v14, %v6008_v0  ;;  %v334_v19 = vld [vmem:[%s6013_s21 + $0x68] sm:$0xff]  ;;  %v380_v20 = vsub.f32 %v333_v15, %v6008_v0  ;;  %v331_v21 = vld [vmem:[%s6013_s21 + $0x50] sm:$0xff]  ;;  %v332_v22 = vld [vmem:[%s6013_s21 + $0x58] sm:$0xff] }
  0x23   : > { %v410_v23 = vpack.c.bf16 %v373_v10, %v372_v7  ;;  %v381_v25 = vsub.f32 %v334_v19, %v6008_v0  ;;  %v378_v26 = vsub.f32 %v331_v21, %v6008_v0  ;;  %v379_v30 = vsub.f32 %v332_v22, %v6008_v0  ;;  %v6040_v31 = vld [vmem:[%s6013_s21] sm:$0xff]  ;;  %v322_v22 = vld [vmem:[%s6013_s21 + $0x8] sm:$0xff] }
  0x24   : > { %v412_v24 = vpack.c.bf16 %v377_v12, %v376_v11  ;;  %v436_v27 = vshrl.u32 %v409_v16, 16  ;;  %v439_v28 = vshll.u32 %v409_v16, 16  ;;  %v411_v29 = vpack.c.bf16 %v375_v18, %v374_v17 }
  0x25   : > { %v443_v32 = vshrl.u32 %v410_v23, 16  ;;  %v446_v33 = vshll.u32 %v410_v23, 16  ;;  %v6042_v39 = vpack.c.bf16 %v381_v25, %v380_v20  ;;  %v6050_v43 = vpack.c.bf16 %v379_v30, %v378_v26  ;;  %v335_v23 = vld [vmem:[%s6013_s21 + $0x70] sm:$0xff] }
  0x26   : > { %v457_v34 = vshrl.u32 %v412_v24, 16  ;;  %v460_v35 = vshll.u32 %v412_v24, 16  ;;  %v438_v36 = vrot.slane %v436_v27, 7  ;;  %v450_v37 = vshrl.u32 %v411_v29, 16 }
  0x27   : > { %v453_v38 = vshll.u32 %v411_v29, 16  ;;  %v445_v41 = vrot.slane %v443_v32, 7  ;;  %v368_v44 = vsub.f32 %v6040_v31, %v6008_v0  ;;  %v471_v48 = vshrl.u32 %v6042_v39, 16 }
  0x28   : > { %v459_v42 = vrot.slane %v457_v34, 7  ;;  %v441_v45 = vor.u32 %v439_v28, %v438_v36  ;;  %v632_v46 = vsel %vm6046_vm4, %v438_v36, 0  ;;  %v452_v47 = vrot.slane %v450_v37, 7 }
  0x29   : > { %v977_v49 = vrot.slane %v632_v46, 1  ;;  %v672_v50 = vshll.u32 %v632_v46, 16  ;;  %v448_v51 = vor.u32 %v446_v33, %v445_v41  ;;  %v633_v52 = vsel %vm6046_vm4, %v445_v41, 0  ;;  %v336_v33 = vld [vmem:[%s6013_s21 + $0x78] sm:$0xff]  ;;  %v337_v46 = vld [vmem:[%s6013_s21 + $0x80] sm:$0xff] }
  0x2a   : > { %v6061_v53 = vsel %vm6046_vm4, 0, %v441_v45  ;;  %v980_v54 = vrot.slane %v633_v52, 1  ;;  %v684_v55 = vshll.u32 %v633_v52, 16  ;;  %v462_v56 = vor.u32 %v460_v35, %v459_v42 }
  0x2b   : > { %v976_v57 = vrot.slane %v6061_v53, 1  ;;  %v665_v58 = vshrl.u32 %v6061_v53, 16  ;;  %v667_v59 = vshll.u32 %v6061_v53, 16  ;;  %v674_v60 = vrot.slane %v672_v50, 1 }
  0x2c   : > { %v6068_v61 = vsel %vm6046_vm4, 0, %v448_v51  ;;  %v686_v62 = vrot.slane %v684_v55, 1  ;;  %v6072_v63 = vsel %vm6046_vm4, 0, %v462_v56  ;;  %v635_v1 = vsel %vm6046_vm4, %v459_v42, 0 }
  0x2d   : > { %v978_v2 = vsel %vm972_vm2, %v976_v57, %v977_v49  ;;  %v669_v3 = vrot.slane %v667_v59, 1  ;;  %v979_v4 = vrot.slane %v6068_v61, 1  ;;  %v677_v5 = vshrl.u32 %v6068_v61, 16 }
  0x2e   : > { %1035 = vrot.lane.b32.xlu1 %v978_v2, %s5899_s22  ;;  %v679_v6 = vshll.u32 %v6068_v61, 16  ;;  %v701_v7 = vshrl.u32 %v6072_v63, 16  ;;  %v703_v8 = vshll.u32 %v6072_v63, 16  ;;  %v708_v9 = vshll.u32 %v635_v1, 16  ;;  %v6128_v2 = vld [vmem:[%s6013_s21 + $0x90] sm:$0xff] }
  0x2f   : > { %v670_v10 = vor.u32 %v669_v3, %v665_v58  ;;  %v981_v11 = vsel %vm972_vm2, %v979_v4, %v980_v54  ;;  %v455_v12 = vor.u32 %v453_v38, %v452_v47  ;;  %v634_v13 = vsel %vm6046_vm4, %v452_v47, 0 }
  0x30   : > { %v681_v14 = vrot.slane %v679_v6, 1  ;;  %v705_v15 = vrot.slane %v703_v8, 1  ;;  %v710_v16 = vrot.slane %v708_v9, 1  ;;  %v696_v17 = vshll.u32 %v634_v13, 16 }
  0x31   : > { %v675_v18 = vsel %vm651_vm3, %v670_v10, %v674_v60  ;;  %v6089_v19 = vsel %vm6046_vm4, 0, %v455_v12  ;;  %v985_v20 = vrot.slane %v6072_v63, 1  ;;  %v986_v21 = vrot.slane %v635_v1, 1  ;;  %v338_v1 = vld [vmem:[%s6013_s21 + $0x88] sm:$0xff] }
  0x32   : > { %894 = vrot.lane.b32.xlu0 %v675_v18, %s5900_s23  ;;  %1037 = vrot.lane.b32.xlu1 %v981_v11, %s5899_s22  ;;  %v682_v24 = vor.u32 %v681_v14, %v677_v5  ;;  %v706_v25 = vor.u32 %v705_v15, %v701_v7  ;;  %v689_v26 = vshrl.u32 %v6089_v19, 16  ;;  %v691_v27 = vshll.u32 %v6089_v19, 16 }
  0x33   : > { %v698_v28 = vrot.slane %v696_v17, 1  ;;  %v987_v29 = vsel %vm972_vm2, %v985_v20, %v986_v21  ;;  %v982_v30 = vrot.slane %v6089_v19, 1  ;;  %v983_v32 = vrot.slane %v634_v13, 1 }
  0x34   : > { %v687_v34 = vsel %vm651_vm3, %v682_v24, %v686_v62  ;;  %v711_v35 = vsel %vm651_vm3, %v706_v25, %v710_v16  ;;  %v693_v36 = vrot.slane %v691_v27, 1  ;;  %v473_v37 = vrot.slane %v471_v48, 7 }
  0x35   : > { %v984_v38 = vsel %vm972_vm2, %v982_v30, %v983_v32  ;;  %v474_v41 = vshll.u32 %v6042_v39, 16  ;;  %v464_v42 = vshrl.u32 %v6050_v43, 16  ;;  %v467_v45 = vshll.u32 %v6050_v43, 16 }
  0x36   : > { %896 = vrot.lane.b32.xlu0 %v687_v34, %s5900_s23  ;;  %900 = vrot.lane.b32.xlu1 %v711_v35, %s5900_s23  ;;  %v694_v47 = vor.u32 %v693_v36, %v689_v26  ;;  %v637_v49 = vsel %vm6046_vm4, %v473_v37, 0  ;;  %v369_v48 = vsub.f32 %v322_v22, %v6008_v0  ;;  %v382_v50 = vsub.f32 %v335_v23, %v6008_v0 }
  0x37   : > { %v476_v39 = vor.u32 %v474_v41, %v473_v37  ;;  %v732_v51 = vshll.u32 %v637_v49, 16  ;;  %v466_v52 = vrot.slane %v464_v42, 7  ;;  %v992_v54 = vrot.slane %v637_v49, 1  ;;  %v340_v41 = vld [vmem:[%s6013_s21 + $0x98] sm:$0xff] }
  0x38   : > { %v699_v43 = vsel %vm651_vm3, %v694_v47, %v698_v28  ;;  %v408_v55 = vpack.c.bf16 %v369_v48, %v368_v44  ;;  %v383_v56 = vsub.f32 %v336_v33, %v6008_v0  ;;  %v384_v57 = vsub.f32 %v337_v46, %v6008_v0 }
  0x39   : > { %v6122_v58 = vsel %vm6046_vm4, 0, %v476_v39  ;;  %v734_v59 = vrot.slane %v732_v51, 1  ;;  %v469_v60 = vor.u32 %v467_v45, %v466_v52  ;;  %v636_v62 = vsel %vm6046_vm4, %v466_v52, 0 }
  0x3a   : > { %898 = vrot.lane.b32.xlu0 %v699_v43, %s5900_s23  ;;  %1041 = vrot.lane.b32.xlu1 %v987_v29, %s5899_s22  ;;  %v725_v31 = vshrl.u32 %v6122_v58, 16  ;;  %v727_v44 = vshll.u32 %v6122_v58, 16  ;;  %v720_v3 = vshll.u32 %v636_v62, 16  ;;  %v991_v4 = vrot.slane %v6122_v58, 1 }
  0x3b   : > { %v6137_v5 = vsel %vm6046_vm4, 0, %v469_v60  ;;  %v989_v6 = vrot.slane %v636_v62, 1  ;;  %v429_v7 = vshrl.u32 %v408_v55, 16  ;;  %v432_v8 = vshll.u32 %v408_v55, 16  ;;  %v341_v60 = vld [vmem:[%s6013_s21 + $0xa0] sm:$0xff]  ;;  %v342_v62 = vld [vmem:[%s6013_s21 + $0xa8] sm:$0xff] }
  0x3c   : > { %v729_v9 = vrot.slane %v727_v44, 1  ;;  %v713_v10 = vshrl.u32 %v6137_v5, 16  ;;  %v715_v11 = vshll.u32 %v6137_v5, 16  ;;  %v722_v12 = vrot.slane %v720_v3, 1 }
  0x3d   : > { %v993_v13 = vsel %vm972_vm2, %v991_v4, %v992_v54  ;;  %v988_v14 = vrot.slane %v6137_v5, 1  ;;  %v431_v15 = vrot.slane %v429_v7, 7  ;;  %v415_v16 = vpack.c.bf16 %v383_v56, %v382_v50 }
  0x3e   : > { %1039 = vrot.lane.b32.xlu0 %v984_v38, %s5899_s22  ;;  %v730_v17 = vor.u32 %v729_v9, %v725_v31  ;;  %v717_v18 = vrot.slane %v715_v11, 1  ;;  %v385_v20 = vsub.f32 %v338_v1, %v6008_v0  ;;  %v386_v21 = vsub.f32 %v6128_v2, %v6008_v0 }
  0x3f   : > { %v990_v22 = vsel %vm972_vm2, %v988_v14, %v989_v6  ;;  %v434_v23 = vor.u32 %v432_v8, %v431_v15  ;;  %v631_v24 = vsel %vm6046_vm4, %v431_v15, 0  ;;  %v478_v25 = vshrl.u32 %v415_v16, 16  ;;  %v343_v8 = vld [vmem:[%s6013_s21 + $0xb0] sm:$0xff] }
  0x40   : > { %v735_v26 = vsel %vm651_vm3, %v730_v17, %v734_v59  ;;  %v718_v27 = vor.u32 %v717_v18, %v713_v10  ;;  %v660_v28 = vshll.u32 %v631_v24, 16  ;;  %v974_v29 = vrot.slane %v631_v24, 1 }
  0x41   : > { %904 = vrot.lane.b32.xlu1 %v735_v26, %s5900_s23  ;;  %v6154_v30 = vsel %vm6046_vm4, 0, %v434_v23  ;;  %v480_v32 = vrot.slane %v478_v25, 7  ;;  %v481_v33 = vshll.u32 %v415_v16, 16  ;;  %v416_v34 = vpack.c.bf16 %v385_v20, %v384_v57 }
  0x42   : > { %v723_v35 = vsel %vm651_vm3, %v718_v27, %v722_v12  ;;  %v653_v36 = vshrl.u32 %v6154_v30, 16  ;;  %v655_v37 = vshll.u32 %v6154_v30, 16  ;;  %v662_v38 = vrot.slane %v660_v28, 1  ;;  %v345_v27 = vld [vmem:[%s6013_s21 + $0xc0] sm:$0xff] }
  0x43   : > { %902 = vrot.lane.b32.xlu0 %v723_v35, %s5900_s23  ;;  %v973_v42 = vrot.slane %v6154_v30, 1  ;;  %v483_v45 = vor.u32 %v481_v33, %v480_v32  ;;  %v638_v46 = vsel %vm6046_vm4, %v480_v32, 0  ;;  %v485_v47 = vshrl.u32 %v416_v34, 16  ;;  %v347_v35 = vld [vmem:[%s6013_s21 + $0xd0] sm:$0xff] }
  0x44   : > { %v657_v49 = vrot.slane %v655_v37, 1  ;;  %v744_v48 = vshll.u32 %v638_v46, 16  ;;  %v995_v50 = vrot.slane %v638_v46, 1  ;;  %v488_v39 = vshll.u32 %v416_v34, 16  ;;  %v346_v34 = vld [vmem:[%s6013_s21 + $0xc8] sm:$0xff] }
  0x45   : > { %1045 = vrot.lane.b32.xlu1 %v993_v13, %s5899_s22  ;;  %v975_v51 = vsel %vm972_vm2, %v973_v42, %v974_v29  ;;  %v6168_v52 = vsel %vm6046_vm4, 0, %v483_v45  ;;  %v487_v54 = vrot.slane %v485_v47, 7  ;;  %v387_v43 = vsub.f32 %v340_v41, %v6008_v0  ;;  %v344_v13 = vld [vmem:[%s6013_s21 + $0xb8] sm:$0xff] }
  0x46   : > { %v658_v55 = vor.u32 %v657_v49, %v653_v36  ;;  %v737_v56 = vshrl.u32 %v6168_v52, 16  ;;  %v739_v57 = vshll.u32 %v6168_v52, 16  ;;  %v746_v59 = vrot.slane %v744_v48, 1  ;;  %v348_v49 = vld [vmem:[%s6013_s21 + $0xd8] sm:$0xff] }
  0x47   : > { %1043 = vrot.lane.b32.xlu0 %v990_v22, %s5899_s22  ;;  %v994_v1 = vrot.slane %v6168_v52, 1  ;;  %v490_v2 = vor.u32 %v488_v39, %v487_v54  ;;  %v639_v31 = vsel %vm6046_vm4, %v487_v54, 0  ;;  %v417_v44 = vpack.c.bf16 %v387_v43, %v386_v21 }
  0x48   : > { %v663_v3 = vsel %vm651_vm3, %v658_v55, %v662_v38  ;;  %v741_v4 = vrot.slane %v739_v57, 1  ;;  %v756_v6 = vshll.u32 %v639_v31, 16  ;;  %v998_v7 = vrot.slane %v639_v31, 1 }
  0x49   : > { %1033 = vrot.lane.b32.xlu1 %v975_v51, %s5899_s22  ;;  %v996_v9 = vsel %vm972_vm2, %v994_v1, %v995_v50  ;;  %v6185_v10 = vsel %vm6046_vm4, 0, %v490_v2  ;;  %v492_v11 = vshrl.u32 %v417_v44, 16  ;;  %v495_v12 = vshll.u32 %v417_v44, 16 }
  0x4a   : > { %v742_v14 = vor.u32 %v741_v4, %v737_v56  ;;  %v749_v15 = vshrl.u32 %v6185_v10, 16  ;;  %v751_v16 = vshll.u32 %v6185_v10, 16  ;;  %v758_v17 = vrot.slane %v756_v6, 1 }
  0x4b   : > { %892 = vrot.lane.b32.xlu0 %v663_v3, %s5900_s23  ;;  %v494_v18 = vrot.slane %v492_v11, 7  ;;  %v997_v20 = vrot.slane %v6185_v10, 1  ;;  %v388_v21 = vsub.f32 %v341_v60, %v6008_v0  ;;  %v389_v22 = vsub.f32 %v342_v62, %v6008_v0 }
  0x4c   : > { %v747_v23 = vsel %vm651_vm3, %v742_v14, %v746_v59  ;;  %v753_v24 = vrot.slane %v751_v16, 1  ;;  %v390_v25 = vsub.f32 %v343_v8, %v6008_v0  ;;  %v391_v26 = vsub.f32 %v344_v13, %v6008_v0 }
  0x4d   : > { %1047 = vrot.lane.b32.xlu1 %v996_v9, %s5899_s22  ;;  %v497_v28 = vor.u32 %v495_v12, %v494_v18  ;;  %v640_v29 = vsel %vm6046_vm4, %v494_v18, 0  ;;  %v999_v32 = vsel %vm972_vm2, %v997_v20, %v998_v7  ;;  %v418_v33 = vpack.c.bf16 %v389_v22, %v388_v21  ;;  %v350_v18 = vld [vmem:[%s6013_s21 + $0xe8] sm:$0xff] }
  0x4e   : > { %v754_v36 = vor.u32 %v753_v24, %v749_v15  ;;  %v768_v37 = vshll.u32 %v640_v29, 16  ;;  %v1001_v38 = vrot.slane %v640_v29, 1  ;;  %v419_v41 = vpack.c.bf16 %v391_v26, %v390_v25 }
  0x4f   : > { %906 = vrot.lane.b32.xlu0 %v747_v23, %s5900_s23  ;;  %v6207_v42 = vsel %vm6046_vm4, 0, %v497_v28  ;;  %v499_v45 = vshrl.u32 %v418_v33, 16  ;;  %v502_v46 = vshll.u32 %v418_v33, 16  ;;  %v392_v47 = vsub.f32 %v345_v27, %v6008_v0 }
  0x50   : > { %v759_v48 = vsel %vm651_vm3, %v754_v36, %v758_v17  ;;  %v761_v50 = vshrl.u32 %v6207_v42, 16  ;;  %v763_v39 = vshll.u32 %v6207_v42, 16  ;;  %v770_v51 = vrot.slane %v768_v37, 1  ;;  %v349_v17 = vld [vmem:[%s6013_s21 + $0xe0] sm:$0xff] }
  0x51   : > { %v1000_v54 = vrot.slane %v6207_v42, 1  ;;  %v501_v43 = vrot.slane %v499_v45, 7  ;;  %v506_v55 = vshrl.u32 %v419_v41, 16  ;;  %v509_v56 = vshll.u32 %v419_v41, 16 }
  0x52   : > { %v765_v57 = vrot.slane %v763_v39, 1  ;;  %v393_v59 = vsub.f32 %v346_v34, %v6008_v0  ;;  %v394_v60 = vsub.f32 %v347_v35, %v6008_v0  ;;  %v395_v62 = vsub.f32 %v348_v49, %v6008_v0  ;;  %v352_v39 = vld [vmem:[%s6013_s21 + $0xf8] sm:$0xff] }
  0x53   : > { %908 = vrot.lane.b32.xlu0 %v759_v48, %s5900_s23  ;;  %v1002_v1 = vsel %vm972_vm2, %v1000_v54, %v1001_v38  ;;  %v504_v2 = vor.u32 %v502_v46, %v501_v43  ;;  %v641_v31 = vsel %vm6046_vm4, %v501_v43, 0  ;;  %v508_v44 = vrot.slane %v506_v55, 7 }
  0x54   : > { %v766_v3 = vor.u32 %v765_v57, %v761_v50  ;;  %v780_v4 = vshll.u32 %v641_v31, 16  ;;  %v1004_v6 = vrot.slane %v641_v31, 1  ;;  %v420_v7 = vpack.c.bf16 %v393_v59, %v392_v47 }
  0x55   : > { %v6224_v8 = vsel %vm6046_vm4, 0, %v504_v2  ;;  %v511_v9 = vor.u32 %v509_v56, %v508_v44  ;;  %v642_v11 = vsel %vm6046_vm4, %v508_v44, 0  ;;  %v421_v12 = vpack.c.bf16 %v395_v62, %v394_v60 }
  0x56   : > { %v771_v13 = vsel %vm651_vm3, %v766_v3, %v770_v51  ;;  %v773_v14 = vshrl.u32 %v6224_v8, 16  ;;  %v775_v15 = vshll.u32 %v6224_v8, 16  ;;  %v782_v16 = vrot.slane %v780_v4, 1 }
  0x57   : > { %910 = vrot.lane.b32.xlu1 %v771_v13, %s5900_s23  ;;  %1049 = vrot.lane.b32.xlu0 %v999_v32, %s5899_s22  ;;  %v6237_v20 = vsel %vm6046_vm4, 0, %v511_v9  ;;  %v792_v21 = vshll.u32 %v642_v11, 16  ;;  %v1003_v22 = vrot.slane %v6224_v8, 1  ;;  %v1007_v23 = vrot.slane %v642_v11, 1  ;;  %v351_v32 = vld [vmem:[%s6013_s21 + $0xf0] sm:$0xff] }
  0x58   : > { %v777_v24 = vrot.slane %v775_v15, 1  ;;  %v785_v25 = vshrl.u32 %v6237_v20, 16  ;;  %v787_v26 = vshll.u32 %v6237_v20, 16  ;;  %v1006_v27 = vrot.slane %v6237_v20, 1 }
  0x59   : > { %v794_v28 = vrot.slane %v792_v21, 1  ;;  %v513_v29 = vshrl.u32 %v420_v7, 16  ;;  %v516_v33 = vshll.u32 %v420_v7, 16  ;;  %v1005_v36 = vsel %vm972_vm2, %v1003_v22, %v1004_v6  ;;  %v353_v7 = vld [vmem:[%s6013_s21 + $0x100] sm:$0xff]  ;;  %v355_v21 = vld [vmem:[%s6013_s21 + $0x110] sm:$0xff] }
  0x5a   : > { %v778_v34 = vor.u32 %v777_v24, %v773_v14  ;;  %v789_v35 = vrot.slane %v787_v26, 1  ;;  %v520_v37 = vshrl.u32 %v421_v12, 16  ;;  %v523_v41 = vshll.u32 %v421_v12, 16  ;;  %v354_v14 = vld [vmem:[%s6013_s21 + $0x108] sm:$0xff] }
  0x5b   : > { %1051 = vrot.lane.b32.xlu1 %v1002_v1, %s5899_s22  ;;  %v515_v38 = vrot.slane %v513_v29, 7  ;;  %v396_v45 = vsub.f32 %v349_v17, %v6008_v0  ;;  %v397_v46 = vsub.f32 %v350_v18, %v6008_v0  ;;  %v1008_v48 = vsel %vm972_vm2, %v1006_v27, %v1007_v23 }
  0x5c   : > { %v783_v47 = vsel %vm651_vm3, %v778_v34, %v782_v16  ;;  %v790_v49 = vor.u32 %v789_v35, %v785_v25  ;;  %v522_v50 = vrot.slane %v520_v37, 7  ;;  %v398_v55 = vsub.f32 %v351_v32, %v6008_v0  ;;  %v356_v35 = vld [vmem:[%s6013_s21 + $0x118] sm:$0xff] }
  0x5d   : > { %912 = vrot.lane.b32.xlu0 %v783_v47, %s5900_s23  ;;  %v518_v51 = vor.u32 %v516_v33, %v515_v38  ;;  %v643_v54 = vsel %vm6046_vm4, %v515_v38, 0  ;;  %v422_v43 = vpack.c.bf16 %v397_v46, %v396_v45  ;;  %v399_v31 = vsub.f32 %v352_v39, %v6008_v0 }
  0x5e   : > { %v795_v56 = vsel %vm651_vm3, %v790_v49, %v794_v28  ;;  %v804_v57 = vshll.u32 %v643_v54, 16  ;;  %v525_v59 = vor.u32 %v523_v41, %v522_v50  ;;  %v644_v60 = vsel %vm6046_vm4, %v522_v50, 0 }
  0x5f   : > { %914 = vrot.lane.b32.xlu1 %v795_v56, %s5900_s23  ;;  %v6261_v62 = vsel %vm6046_vm4, 0, %v518_v51  ;;  %v816_v1 = vshll.u32 %v644_v60, 16  ;;  %v1010_v2 = vrot.slane %v643_v54, 1  ;;  %v1013_v6 = vrot.slane %v644_v60, 1 }
  0x60   : > { %v797_v44 = vshrl.u32 %v6261_v62, 16  ;;  %v799_v3 = vshll.u32 %v6261_v62, 16  ;;  %v6268_v4 = vsel %vm6046_vm4, 0, %v525_v59  ;;  %v806_v9 = vrot.slane %v804_v57, 1 }
  0x61   : > { %1053 = vrot.lane.b32.xlu0 %v1005_v36, %s5899_s22  ;;  %v809_v11 = vshrl.u32 %v6268_v4, 16  ;;  %v811_v12 = vshll.u32 %v6268_v4, 16  ;;  %v1009_v13 = vrot.slane %v6261_v62, 1  ;;  %v818_v16 = vrot.slane %v816_v1, 1 }
  0x62   : > { %v801_v15 = vrot.slane %v799_v3, 1  ;;  %v527_v17 = vshrl.u32 %v422_v43, 16  ;;  %v530_v18 = vshll.u32 %v422_v43, 16  ;;  %v1012_v23 = vrot.slane %v6268_v4, 1 }
  0x63   : > { %1055 = vrot.lane.b32.xlu1 %v1008_v48, %s5899_s22  ;;  %v813_v22 = vrot.slane %v811_v12, 1  ;;  %v423_v24 = vpack.c.bf16 %v399_v31, %v398_v55  ;;  %v400_v25 = vsub.f32 %v353_v7, %v6008_v0  ;;  %v1011_v27 = vsel %vm972_vm2, %v1009_v13, %v1010_v2 }
  0x64   : > { %v802_v26 = vor.u32 %v801_v15, %v797_v44  ;;  %v529_v28 = vrot.slane %v527_v17, 7  ;;  %v401_v29 = vsub.f32 %v354_v14, %v6008_v0  ;;  %v402_v36 = vsub.f32 %v355_v21, %v6008_v0 }
  0x65   : > { %v814_v33 = vor.u32 %v813_v22, %v809_v11  ;;  %v534_v32 = vshrl.u32 %v423_v24, 16  ;;  %v537_v34 = vshll.u32 %v423_v24, 16  ;;  %v1014_v47 = vsel %vm972_vm2, %v1012_v23, %v1013_v6  ;;  %v357_v22 = vld [vmem:[%s6013_s21 + $0x120] sm:$0xff]  ;;  %v358_v23 = vld [vmem:[%s6013_s21 + $0x128] sm:$0xff] }
  0x66   : > { %v807_v37 = vsel %vm651_vm3, %v802_v26, %v806_v9  ;;  %v532_v38 = vor.u32 %v530_v18, %v529_v28  ;;  %v645_v41 = vsel %vm6046_vm4, %v529_v28, 0  ;;  %v424_v45 = vpack.c.bf16 %v401_v29, %v400_v25 }
  0x67   : > { %916 = vrot.lane.b32.xlu0 %v807_v37, %s5900_s23  ;;  %v819_v46 = vsel %vm651_vm3, %v814_v33, %v818_v16  ;;  %v828_v49 = vshll.u32 %v645_v41, 16  ;;  %v536_v48 = vrot.slane %v534_v32, 7  ;;  %v1016_v39 = vrot.slane %v645_v41, 1 }
  0x68   : > { %918 = vrot.lane.b32.xlu1 %v819_v46, %s5900_s23  ;;  %v6293_v50 = vsel %vm6046_vm4, 0, %v532_v38  ;;  %v541_v51 = vshrl.u32 %v424_v45, 16  ;;  %v403_v54 = vsub.f32 %v356_v35, %v6008_v0  ;;  %v544_v57 = vshll.u32 %v424_v45, 16 }
  0x69   : > { %v821_v43 = vshrl.u32 %v6293_v50, 16  ;;  %v823_v55 = vshll.u32 %v6293_v50, 16  ;;  %v539_v56 = vor.u32 %v537_v34, %v536_v48  ;;  %v830_v59 = vrot.slane %v828_v49, 1 }
  0x6a   : > { %v646_v60 = vsel %vm6046_vm4, %v536_v48, 0  ;;  %v543_v1 = vrot.slane %v541_v51, 7  ;;  %v425_v2 = vpack.c.bf16 %v403_v54, %v402_v36  ;;  %v1015_v6 = vrot.slane %v6293_v50, 1  ;;  %v5747_v54 = vld [vmem:[%s8088_s2] sm:$0x1f]  }
  0x6b   : > { %1057 = vrot.lane.b32.xlu0 %v1011_v27, %s5899_s22  ;;  %v825_v31 = vrot.slane %v823_v55, 1  ;;  %v6303_v44 = vsel %vm6046_vm4, 0, %v539_v56  ;;  %v840_v3 = vshll.u32 %v646_v60, 16  ;;  %v1019_v12 = vrot.slane %v646_v60, 1 }
  0x6c   : > { %1059 = vrot.lane.b32.xlu1 %v1014_v47, %s5899_s22  ;;  %v833_v7 = vshrl.u32 %v6303_v44, 16  ;;  %v835_v9 = vshll.u32 %v6303_v44, 16  ;;  %v1018_v11 = vrot.slane %v6303_v44, 1  ;;  %v546_v14 = vor.u32 %v544_v57, %v543_v1 }
  0x6d   : > { %v826_v13 = vor.u32 %v825_v31, %v821_v43  ;;  %v647_v15 = vsel %vm6046_vm4, %v543_v1, 0  ;;  %v842_v17 = vrot.slane %v840_v3, 1  ;;  %v548_v21 = vshrl.u32 %v425_v2, 16 }
  0x6e   : > { %v837_v16 = vrot.slane %v835_v9, 1  ;;  %v852_v18 = vshll.u32 %v647_v15, 16  ;;  %v1017_v25 = vsel %vm972_vm2, %v1015_v6, %v1016_v39  ;;  %v6318_v26 = vsel %vm6046_vm4, 0, %v546_v14  ;;  %v5746_v39 = vld [vmem:[%s8088_s2 + $0x8] sm:$0x1f]   ;;  %v360_v14 = vld [vmem:[%s6013_s21 + $0x138] sm:$0xff] }
  0x6f   : > { %v831_v24 = vsel %vm651_vm3, %v826_v13, %v830_v59  ;;  %v551_v27 = vshll.u32 %v425_v2, 16  ;;  %v1020_v29 = vsel %vm972_vm2, %v1018_v11, %v1019_v12  ;;  %v845_v33 = vshrl.u32 %v6318_v26, 16 }
  0x70   : > { %920 = vrot.lane.b32.xlu0 %v831_v24, %s5900_s23  ;;  %v838_v28 = vor.u32 %v837_v16, %v833_v7  ;;  %v847_v32 = vshll.u32 %v6318_v26, 16  ;;  %v550_v34 = vrot.slane %v548_v21, 7  ;;  %v1022_v35 = vrot.slane %v647_v15, 1  ;;  %v359_v7 = vld [vmem:[%s6013_s21 + $0x130] sm:$0xff]  ;;  %s5447_s21 = sshll.u32 %s5889_s27, 11 }
  0x71   : > { %v404_v36 = vsub.f32 %v357_v22, %v6008_v0  ;;  %v405_v37 = vsub.f32 %v358_v23, %v6008_v0  ;;  %v854_v45 = vrot.slane %v852_v18, 1  ;;  %v1021_v49 = vrot.slane %v6318_v26, 1  ;;  %v5785_v23 = vld [vmem:[%s8087_s1] ss:$0 sm:$0xff]  ;;  %s7812_s10 = scalar_lea.hbm %s8092_s6, %s5447_s21 }
  0x72   : > { %v843_v38 = vsel %vm651_vm3, %v838_v28, %v842_v17  ;;  %v849_v41 = vrot.slane %v847_v32, 1  ;;  %v553_v46 = vor.u32 %v551_v27, %v550_v34  ;;  %v648_v47 = vsel %vm6046_vm4, %v550_v34, 0 }
  0x73   : > { %922 = vrot.lane.b32.xlu1 %v843_v38, %s5900_s23  ;;  %v426_v48 = vpack.c.bf16 %v405_v37, %v404_v36  ;;  %v864_v51 = vshll.u32 %v648_v47, 16  ;;  %v5901_v57 = vmov 65535   ;;  %v1023_v31 = vsel %vm972_vm2, %v1021_v49, %v1022_v35 }
  0x74   : > { %1061 = vrot.lane.b32.xlu0 %v1017_v25, %s5899_s22  ;;  %v850_v0 = vor.u32 %v849_v41, %v845_v33  ;;  %v6340_v43 = vsel %vm6046_vm4, 0, %v553_v46  ;;  %v1204_v59 = vsel %vm1202_vm5, 4294967295, %v5901_v57  ;;  %v1025_v16 = vrot.slane %v648_v47, 1 }
  0x75   : > { %v555_v55 = vshrl.u32 %v426_v48, 16  ;;  %v558_v56 = vshll.u32 %v426_v48, 16  ;;  %v857_v1 = vshrl.u32 %v6340_v43, 16  ;;  %v859_v2 = vshll.u32 %v6340_v43, 16 }
  0x76   : > { %v855_v60 = vsel %vm651_vm3, %v850_v0, %v854_v45  ;;  %v6348_v6 = vsel %vm1203_vm6, %v1204_v59, 0  ;;  %v866_v11 = vrot.slane %v864_v51, 1  ;;  %v1024_v15 = vrot.slane %v6340_v43, 1 }
  0x77   : > { %1063 = vrot.lane.b32.xlu1 %v1020_v29, %s5899_s22  ;;  %v557_v3 = vrot.slane %v555_v55, 7  ;;  %v861_v9 = vrot.slane %v859_v2, 1  ;;  %v1207_v12 = vand.u32 %v5746_v39, %v6348_v6  ;;  %v6354_v13 = vand.u32 %v5747_v54, %v6348_v6 }
  0x78   : > { %924 = vrot.lane.b32.xlu0 %v855_v60, %s5900_s23  ;;  %v406_v24 = vsub.f32 %v359_v7, %v5785_v23  ;;  %v407_v27 = vsub.f32 %v360_v14, %v5785_v23  ;;  %v1026_v32 = vsel %vm972_vm2, %v1024_v15, %v1025_v16  ;;  %v5748_v14 = vld [vmem:[%s8088_s2 + $0x10] sm:$0x1f]  }
  0x79   : > { %v560_v17 = vor.u32 %v558_v56, %v557_v3  ;;  %v649_v18 = vsel %vm6046_vm4, %v557_v3, 0  ;;  %v862_v21 = vor.u32 %v861_v9, %v857_v1  ;;  %5506 = vmatprep.subr.bf16.mxu0 %v1207_v12  ;;  %5620 = vmatprep.subr.bf16.mxu1 %v1207_v12 }
  0x7a   : > { %v876_v22 = vshll.u32 %v649_v18, 16  ;;  %5507 = vmatpush3.bf16.msra.mxu0 %v1207_v12  ;;  %5621 = vmatpush3.bf16.msra.mxu1 %v1207_v12  ;;  %v427_v34 = vpack.c.bf16 %v407_v27, %v406_v24  ;;  %v1028_v38 = vrot.slane %v649_v18, 1 }
  0x7b   : > { %v6365_v25 = vsel %vm6046_vm4, 0, %v560_v17  ;;  %v867_v28 = vsel %vm651_vm3, %v862_v21, %v866_v11  ;;  %5544 = vmatprep.subr.bf16.mxu0 %v6354_v13  ;;  %v1584_v21 = vand.u32 %v5748_v14, %v6348_v6 }
  0x7c   : > { %1065 = vrot.lane.b32.xlu0 %v1023_v31, %s5899_s22  ;;  %v869_v29 = vshrl.u32 %v6365_v25, 16  ;;  %v871_v33 = vshll.u32 %v6365_v25, 16  ;;  %926 = vrot.lane.b32.xlu1 %v867_v28, %s5900_s23  ;;  %v878_v36 = vrot.slane %v876_v22, 1  ;;  %v1027_v37 = vrot.slane %v6365_v25, 1 }
  0x7d   : > { %v562_v41 = vshrl.u32 %v427_v34, 16  ;;  %v565_v45 = vshll.u32 %v427_v34, 16 }
  0x7e   : > { %v873_v35 = vrot.slane %v871_v33, 1  ;;  %v1029_v48 = vsel %vm972_vm2, %v1027_v37, %v1028_v38 }
  0x7f   : > { %v564_v47 = vrot.slane %v562_v41, 7 }
  0x80   : > { %v874_v46 = vor.u32 %v873_v35, %v869_v29  ;;  %1067 = vrot.lane.b32.xlu1 %v1026_v32, %s5899_s22 }
  0x81   : > { %v567_v39 = vor.u32 %v565_v45, %v564_v47  ;;  %v650_v0 = vsel %vm6046_vm4, %v564_v47, 0 }
  0x82   : > { %v879_v49 = vsel %vm651_vm3, %v874_v46, %v878_v36  ;;  %v888_v51 = vshll.u32 %v650_v0, 16  ;;  %v1031_v54 = vrot.slane %v650_v0, 1 }
  0x83   : > { %928 = vrot.lane.b32.xlu0 %v879_v49, %s5900_s23  ;;  %v6384_v55 = vsel %vm6046_vm4, 0, %v567_v39 }
  0x84   : > { %1069 = vrot.lane.b32.xlu1 %v1029_v48, %s5899_s22  ;;  %v881_v56 = vshrl.u32 %v6384_v55, 16  ;;  %v883_v57 = vshll.u32 %v6384_v55, 16  ;;  %v1030_v59 = vrot.slane %v6384_v55, 1  ;;  %v890_v1 = vrot.slane %v888_v51, 1 }
  0x86   : > { %v885_v60 = vrot.slane %v883_v57, 1  ;;  %v1032_v2 = vsel %vm972_vm2, %v1030_v59, %v1031_v54 }
  0x88   : > { %1071 = vrot.lane.b32.xlu1 %v1032_v2, %s5899_s22  ;;  %v886_v31 = vor.u32 %v885_v60, %v881_v56  ;;  %s4908_s22 = sshll.u32 %s6680_s19, 4  ;;  %s7814_s22 = int_to_ptr.vmem [resolvable:$true] %s4908_s22 }
  0x89   : > { %s5787_s12 = scalar_lea.vmem %s7814_s22, 2048  ;;  %p5794_p1 = scmp.lt.s32.totalorder %s7814_s22, %s5792_s16 }
  0x8a   : > { %v891_v3 = vsel %vm651_vm3, %v886_v31, %v890_v1  ;;  %p5788_p12 = scmp.ne.s32.totalorder %s7814_s22, %s5787_s12  ;;  %p5795_p2 = scmp.lt.s32.totalorder %s5793_s18, %s5787_s12 }
  0x8b   : > { %930 = vrot.lane.b32.xlu0 %v891_v3, %s5900_s23  ;;  %s5903_s23 = smov 64  }
  0x8c   : > { %p5789_p13 = pnand %p5788_p12, %p5988_p4  ;;  %p5796_p3 = por %p5795_p2, %p5794_p1 }
  0x8e   : > { %p5790_p0 = pneg %p5789_p13 }
  0x90   : > { %p5797_p5 = pnand %p5796_p3, %p5790_p0 }
  0xa0   : > { %v1036_v7 = vpop.permute.xlu1 %1035 }
  0xa4   : > { %v895_v9 = vpop.permute.xlu0 %894  ;;  %v1038_v11 = vpop.permute.xlu1 %1037 }
  0xa5   : > { %v1077_v12 = vsel %vm1073_vm7, %v6061_v53, %v895_v9 }
  0xa6   : > { %v1118_v15 = vsel %vm1114_vm8, %v1077_v12, %v1036_v7 }
  0xa7   : > { %5508 = vmatprep.mubr.msk.bf16.mxu0 %vm1165_vm9, %v1118_v15 }
  0xa8   : > { %v897_v16 = vpop.permute.xlu0 %896  ;;  %v901_v17 = vpop.permute.xlu1 %900 }
  0xa9   : > { %v1079_v18 = vsel %vm1073_vm7, %v6068_v61, %v897_v16  ;;  %v1083_v24 = vsel %vm1073_vm7, %v6072_v63, %v901_v17 }
  0xaa   : > { %v6404_v22 = vsel %vm1114_vm8, %v1079_v18, %v1038_v11 }
  0xab   : > { %5509 = vmatmul.mubr.msk.bf16.vlgmr.msra.gmra.mrb[0].mxu0 %vm1165_vm9, %v6404_v22 }
  0xac   : > { %5545 = vmatpush3.bf16.msra.mxu0 %v6354_v13  ;;  %v899_v53 = vpop.permute.xlu0 %898  ;;  %v1042_v23 = vpop.permute.xlu1 %1041 }
  0xad   : > { %5582 = vmatprep.subr.bf16.mxu0 %v1584_v21  ;;  %v1081_v27 = vsel %vm1073_vm7, %v6089_v19, %v899_v53  ;;  %v6417_v28 = vsel %vm1114_vm8, %v1083_v24, %v1042_v23 }
  0xb0   : > { %v1040_v61 = vpop.permute.xlu0 %1039 }
  0xb1   : > { %v6414_v6 = vsel %vm1114_vm8, %v1081_v27, %v1040_v61 }
  0xb2   : > { %5512 = vmatprep.mubr.msk.bf16.mxu0 %vm1165_vm9, %v6414_v6 }
  0xb3   : > { %v905_v13 = vpop.permute.xlu1 %904  ;;  %5513 = vmatmul.mubr.msk.bf16.gmra.mrb[4].mxu0 %vm1165_vm9, %v6417_v28 }
  0xb4   : > { %v1087_v63 = vsel %vm1073_vm7, %v6122_v58, %v905_v13 }
  0xb5   : > { %v903_v29 = vpop.permute.xlu0 %902 }
  0xb6   : > { %v1085_v19 = vsel %vm1073_vm7, %v6137_v5, %v903_v29 }
  0xb7   : > { %v1046_v33 = vpop.permute.xlu1 %1045 }
  0xb8   : > { %v6431_v35 = vsel %vm1114_vm8, %v1087_v63, %v1046_v33 }
  0xb9   : > { %v1044_v32 = vpop.permute.xlu0 %1043 }
  0xba   : > { %v6428_v34 = vsel %vm1114_vm8, %v1085_v19, %v1044_v32 }
  0xbb   : > { %5516 = vmatprep.mubr.msk.bf16.mxu0 %vm1165_vm9, %v6428_v34  ;;  %v1034_v36 = vpop.permute.xlu1 %1033 }
  0xbc   : > { %5517 = vmatmul.mubr.msk.bf16.gmra.mrb[8].mxu0 %vm1165_vm9, %v6431_v35 }
  0xbd   : > { %v893_v37 = vpop.permute.xlu0 %892 }
  0xbe   : > { %v1075_v58 = vsel %vm1073_vm7, %v6154_v30, %v893_v37 }
  0xbf   : > { %v1116_v5 = vsel %vm1114_vm8, %v1075_v58, %v1034_v36  ;;  %v1048_v45 = vpop.permute.xlu1 %1047 }
  0xc0   : > { %5546 = vmatprep.mubr.msk.bf16.mxu0 %vm1165_vm9, %v1116_v5 }
  0xc1   : > { %v907_v38 = vpop.permute.xlu0 %906 }
  0xc2   : > { %v1089_v41 = vsel %vm1073_vm7, %v6168_v52, %v907_v38 }
  0xc3   : > { %v6444_v46 = vsel %vm1114_vm8, %v1089_v41, %v1048_v45 }
  0xc4   : > { %5547 = vmatmul.mubr.msk.bf16.vlgmr.msra.gmra.mrb[12].mxu0 %vm1165_vm9, %v1118_v15  ;;  %5520 = vmatprep.mubr.msk.bf16.mxu1 %vm1165_vm9, %v6444_v46 }
  0xc5   : > { %5583 = vmatpush3.bf16.msra.mxu0 %v1584_v21  ;;  %5550 = vmatprep.mubr.msk.bf16.mxu0 %vm1165_vm9, %v6404_v22  ;;  %v909_v30 = vpop.permute.xlu0 %908 }
  0xc6   : > { %v1091_v47 = vsel %vm1073_vm7, %v6185_v10, %v909_v30 }
  0xc9   : > { %v911_v49 = vpop.permute.xlu1 %910  ;;  %v1050_v48 = vpop.permute.xlu0 %1049 }
  0xca   : > { %v6454_v52 = vsel %vm1114_vm8, %v1091_v47, %v1050_v48  ;;  %v1093_v39 = vsel %vm1073_vm7, %v6207_v42, %v911_v49 }
  0xcb   : > { %5521 = vmatmul.mubr.msk.bf16.vlgmr.msra.gmra.mrb[0].mxu1 %vm1165_vm9, %v6454_v52 }
  0xcc   : > { %5551 = vmatmul.mubr.msk.bf16.gmra.mrb[4].mxu0 %vm1165_vm9, %v6414_v6 }
  0xcd   : > { %5554 = vmatprep.mubr.msk.bf16.mxu0 %vm1165_vm9, %v6417_v28  ;;  %v1052_v0 = vpop.permute.xlu1 %1051 }
  0xce   : > { %v6465_v10 = vsel %vm1114_vm8, %v1093_v39, %v1052_v0 }
  0xcf   : > { %v913_v51 = vpop.permute.xlu0 %912  ;;  %5524 = vmatprep.mubr.msk.bf16.mxu1 %vm1165_vm9, %v6465_v10 }
  0xd0   : > { %v1095_v42 = vsel %vm1073_vm7, %v6224_v8, %v913_v51 }
  0xd1   : > { %v915_v54 = vpop.permute.xlu1 %914 }
  0xd2   : > { %v1097_v56 = vsel %vm1073_vm7, %v6237_v20, %v915_v54 }
  0xd3   : > { %v1054_v57 = vpop.permute.xlu0 %1053 }
  0xd4   : > { %5555 = vmatmul.mubr.msk.bf16.gmra.mrb[8].mxu0 %vm1165_vm9, %v6428_v34  ;;  %v1136_v59 = vsel %vm1114_vm8, %v1095_v42, %v1054_v57 }
  0xd5   : > { %5558 = vmatprep.mubr.msk.bf16.mxu0 %vm1165_vm9, %v6431_v35  ;;  %5525 = vmatmul.mubr.msk.bf16.gmra.mrb[4].mxu1 %vm1165_vm9, %v1136_v59  ;;  %v1056_v60 = vpop.permute.xlu1 %1055 }
  0xd6   : > { %v1138_v1 = vsel %vm1114_vm8, %v1097_v56, %v1056_v60 }
  0xd7   : > { %5528 = vmatprep.mubr.msk.bf16.mxu1 %vm1165_vm9, %v1138_v1 }
  0xd9   : > { %v917_v8 = vpop.permute.xlu0 %916 }
  0xda   : > { %v919_v2 = vpop.permute.xlu1 %918  ;;  %v1099_v20 = vsel %vm1073_vm7, %v6261_v62, %v917_v8  ;;  %v5902_v8 = vmov 0  }
  0xdb   : > { %v1101_v31 = vsel %vm1073_vm7, %v6268_v4, %v919_v2  ;;  %2869 = vmatprep.subr.bf16.mxu1 %v5902_v8  ;;  %3366 = vmatprep.subr.bf16.mxu0 %v5902_v8  ;;  %v5752_v2 = vld [vmem:[%s8090_s4 + $0xc0] sm:$0xff]  }
  0xdc   : > { %5559 = vmatmul.mubr.msk.bf16.gmra.mrb[16].mxu0 %vm1165_vm9, %v6444_v46 }
  0xdd   : > { %5562 = vmatprep.mubr.msk.bf16.mxu0 %vm1165_vm9, %v6454_v52  ;;  %v1058_v3 = vpop.permute.xlu0 %1057 }
  0xde   : > { %v1140_v7 = vsel %vm1114_vm8, %v1099_v20, %v1058_v3  ;;  %v1060_v9 = vpop.permute.xlu1 %1059  ;;  %v5750_v20 = vld [vmem:[%s8090_s4 + $0x68] sm:$0xff]  }
  0xdf   : > { %5529 = vmatmul.mubr.msk.bf16.gmra.mrb[8].mxu1 %vm1165_vm9, %v1140_v7  ;;  %v1142_v11 = vsel %vm1114_vm8, %v1101_v31, %v1060_v9  ;;  %v5754_v31 = vld [vmem:[%s8090_s4 + $0xc8] sm:$0xff]   ;;  %v5751_v9 = vld [vmem:[%s8090_s4 + $0x70] sm:$0xff]  }
  0xe0   : > { %5532 = vmatprep.mubr.msk.bf16.mxu1 %vm1165_vm9, %v1142_v11 }
  0xe2   : > { %v921_v62 = vpop.permute.xlu0 %920 }
  0xe3   : > { %v1103_v4 = vsel %vm1073_vm7, %v6293_v50, %v921_v62  ;;  %v5756_v62 = vld [vmem:[%s8090_s4 + $0xd0] sm:$0xff]  }
  0xe4   : > { %5563 = vmatmul.mubr.msk.bf16.gmra.mrb[20].mxu0 %vm1165_vm9, %v6465_v10 }
  0xe5   : > { %5566 = vmatprep.mubr.msk.bf16.mxu0 %vm1165_vm9, %v1136_v59  ;;  %v923_v12 = vpop.permute.xlu1 %922 }
  0xe6   : > { %v1062_v14 = vpop.permute.xlu0 %1061  ;;  %v1105_v15 = vsel %vm1073_vm7, %v6303_v44, %v923_v12  ;;  %v5753_v12 = vld [vmem:[%s8090_s4 + $0x78] sm:$0xff]  }
  0xe7   : > { %v1144_v16 = vsel %vm1114_vm8, %v1103_v4, %v1062_v14  ;;  %v5758_v14 = vld [vmem:[%s8090_s4 + $0xd8] sm:$0xff]  }
  0xe8   : > { %5533 = vmatmul.mubr.msk.bf16.gmra.mrb[12].mxu1 %vm1165_vm9, %v1144_v16 }
  0xe9   : > { %v1064_v17 = vpop.permute.xlu1 %1063 }
  0xea   : > { %v1146_v18 = vsel %vm1114_vm8, %v1105_v15, %v1064_v17  ;;  %v925_v21 = vpop.permute.xlu0 %924  ;;  %v5755_v15 = vld [vmem:[%s8090_s4 + $0x80] sm:$0xff]  }
  0xeb   : > { %5536 = vmatprep.mubr.msk.bf16.mxu1 %vm1165_vm9, %v1146_v18  ;;  %v1107_v50 = vsel %vm1073_vm7, %v6318_v26, %v925_v21 }
  0xec   : > { %5567 = vmatmul.mubr.msk.bf16.gmra.mrb[24].mxu0 %vm1165_vm9, %v1138_v1 }
  0xed   : > { %5570 = vmatprep.mubr.msk.bf16.mxu0 %vm1165_vm9, %v1140_v7 }
  0xee   : > { %v1066_v53 = vpop.permute.xlu0 %1065  ;;  %v927_v23 = vpop.permute.xlu1 %926 }
  0xef   : > { %v1148_v44 = vsel %vm1114_vm8, %v1107_v50, %v1066_v53  ;;  %v1109_v24 = vsel %vm1073_vm7, %v6340_v43, %v927_v23  ;;  %v5757_v53 = vld [vmem:[%s8090_s4 + $0x88] sm:$0xff]  }
  0xf0   : > { %5537 = vmatmul.mubr.msk.bf16.gmra.mrb[16].mxu1 %vm1165_vm9, %v1148_v44 }
  0xf2   : > { %v1068_v27 = vpop.permute.xlu1 %1067 }
  0xf3   : > { %v1150_v61 = vsel %vm1114_vm8, %v1109_v24, %v1068_v27  ;;  %v5759_v27 = vld [vmem:[%s8090_s4 + $0x90] sm:$0xff]  }
  0xf4   : > { %5571 = vmatmul.mubr.msk.bf16.gmra.mrb[28].mxu0 %vm1165_vm9, %v1142_v11  ;;  %5540 = vmatprep.mubr.msk.bf16.mxu1 %vm1165_vm9, %v1150_v61 }
  0xf5   : > { %5574 = vmatprep.mubr.msk.bf16.mxu0 %vm1165_vm9, %v1144_v16  ;;  %v929_v26 = vpop.permute.xlu0 %928 }
  0xf6   : > { %v1111_v13 = vsel %vm1073_vm7, %v6365_v25, %v929_v26  ;;  %v1070_v29 = vpop.permute.xlu1 %1069 }
  0xf7   : > { %v1152_v63 = vsel %vm1114_vm8, %v1111_v13, %v1070_v29  ;;  %v6661_v13 = vld [vmem:[%s8089_s3] ss:$0 sm:$0xff] }
  0xf8   : > { %5541 = vmatmul.mubr.msk.bf16.gmra.mrb[20].mxu1 %vm1165_vm9, %v1152_v63 }
  0xfc   : > { %5575 = vmatmul.mubr.msk.bf16.gmra.mrb[32].mxu0 %vm1165_vm9, %v1146_v18 }
  0xfd   : > { %5578 = vmatprep.mubr.msk.bf16.mxu0 %vm1165_vm9, %v1148_v44  ;;  %v931_v43 = vpop.permute.xlu0 %930 }
  0xfe   : > { %v1113_v25 = vsel %vm1073_vm7, %v6384_v55, %v931_v43 }
 0x104   : > { %5579 = vmatmul.mubr.msk.bf16.gmra.mrb[36].mxu0 %vm1165_vm9, %v1150_v61 }
 0x105   : > { %5584 = vmatprep.mubr.msk.bf16.mxu0 %vm1165_vm9, %v6404_v22  ;;  %v1072_v22 = vpop.permute.xlu1 %1071 }
 0x10c   : > { %5585 = vmatmul.mubr.msk.bf16.vlgmr.msra.gmra.mrb[40].mxu0 %vm1165_vm9, %v6414_v6  ;;  %v1154_v6 = vsel %vm1114_vm8, %v1113_v25, %v1072_v22  ;;  %v5761_v25 = vld [vmem:[%s8090_s4 + $0x98] sm:$0xff]  }
 0x10d   : > { %5588 = vmatprep.mubr.msk.bf16.mxu0 %vm1165_vm9, %v6417_v28  ;;  %3367 = vmatpush1.bf16.msra.mxu0 %v5752_v2 }
 0x10e   : > { %3368 = vmatprep.subr.bf16.mxu0 %v5902_v8 }
 0x111   : > { %3369 = vmatpush1.bf16.msra.mxu0 %v5754_v31 }
 0x112   : > { %3370 = vmatprep.subr.bf16.mxu0 %v5902_v8 }
 0x114   : > { %5589 = vmatmul.mubr.msk.bf16.gmra.mrb[4].mxu0 %vm1165_vm9, %v6428_v34 }
 0x115   : > { %5592 = vmatprep.mubr.msk.bf16.mxu0 %vm1165_vm9, %v6431_v35  ;;  %3371 = vmatpush1.bf16.msra.mxu0 %v5756_v62 }
 0x116   : > { %3372 = vmatprep.subr.bf16.mxu0 %v5902_v8 }
 0x119   : > { %3373 = vmatpush1.bf16.msra.mxu0 %v5758_v14 }
 0x11a   : > { %3374 = vmatprep.subr.bf16.mxu0 %v5902_v8 }
 0x11c   : > { %5593 = vmatmul.mubr.msk.bf16.gmra.mrb[8].mxu0 %vm1165_vm9, %v6444_v46 }
 0x11d   : > { %5596 = vmatprep.mubr.msk.bf16.mxu0 %vm1165_vm9, %v6454_v52 }
 0x124   : > { %5597 = vmatmul.mubr.msk.bf16.gmra.mrb[16].mxu0 %vm1165_vm9, %v6465_v10 }
 0x125   : > { %5600 = vmatprep.mubr.msk.bf16.mxu0 %vm1165_vm9, %v1136_v59 }
 0x12c   : > { %5601 = vmatmul.mubr.msk.bf16.gmra.mrb[20].mxu0 %vm1165_vm9, %v1138_v1  ;;  %v5749_v1 = vld [vmem:[%s8090_s4 + $0x60] sm:$0xff]  }
 0x12d   : > { %5604 = vmatprep.mubr.msk.bf16.mxu0 %vm1165_vm9, %v1140_v7  ;;  %2870 = vmatpush1.bf16.msra.mxu1 %v5749_v1 }
 0x12e   : > { %2871 = vmatprep.subr.bf16.mxu1 %v5902_v8 }
 0x131   : > { %2872 = vmatpush1.bf16.msra.mxu1 %v5750_v20 }
 0x132   : > { %2873 = vmatprep.subr.bf16.mxu1 %v5902_v8 }
 0x134   : > { %5605 = vmatmul.mubr.msk.bf16.gmra.mrb[24].mxu0 %vm1165_vm9, %v1142_v11 }
 0x135   : > { %5608 = vmatprep.mubr.msk.bf16.mxu0 %vm1165_vm9, %v1144_v16  ;;  %2874 = vmatpush1.bf16.msra.mxu1 %v5751_v9  ;;  %v5760_v16 = vld [vmem:[%s8090_s4 + $0xe0] sm:$0xff]  }
 0x136   : > { %2875 = vmatprep.subr.bf16.mxu1 %v5902_v8  ;;  %3375 = vmatpush1.bf16.msra.mxu0 %v5760_v16 }
 0x137   : > { %3376 = vmatprep.subr.bf16.mxu0 %v5902_v8 }
 0x139   : > { %2876 = vmatpush1.bf16.msra.mxu1 %v5753_v12 }
 0x13a   : > { %2877 = vmatprep.subr.bf16.mxu1 %v5902_v8 }
 0x13c   : > { %5609 = vmatmul.mubr.msk.bf16.gmra.mrb[28].mxu0 %vm1165_vm9, %v1146_v18 }
 0x13d   : > { %5612 = vmatprep.mubr.msk.bf16.mxu0 %vm1165_vm9, %v1148_v44  ;;  %2878 = vmatpush1.bf16.msra.mxu1 %v5755_v15  ;;  %v5762_v44 = vld [vmem:[%s8090_s4 + $0xe8] sm:$0xff]  }
 0x13e   : > { %2879 = vmatprep.subr.bf16.mxu1 %v5902_v8  ;;  %3377 = vmatpush1.bf16.msra.mxu0 %v5762_v44 }
 0x13f   : > { %3378 = vmatprep.subr.bf16.mxu0 %v5902_v8 }
 0x141   : > { %2880 = vmatpush1.bf16.msra.mxu1 %v5757_v53 }
 0x142   : > { %2881 = vmatprep.subr.bf16.mxu1 %v5902_v8 }
 0x144   : > { %5613 = vmatmul.mubr.msk.bf16.gmra.mrb[32].mxu0 %vm1165_vm9, %v1150_v61  ;;  %v5764_v61 = vld [vmem:[%s8090_s4 + $0xf0] sm:$0xff]  }
 0x145   : > { %5616 = vmatprep.mubr.msk.bf16.mxu0 %vm1165_vm9, %v1152_v63  ;;  %2882 = vmatpush1.bf16.msra.mxu1 %v5759_v27 }
 0x146   : > { %2883 = vmatprep.subr.bf16.mxu1 %v5902_v8  ;;  %3379 = vmatpush1.bf16.msra.mxu0 %v5764_v61  ;;  %v5767_v61 = vld [vmem:[%s8090_s4 + $0xb0] sm:$0xff]  }
 0x147   : > { %3380 = vmatprep.subr.bf16.mxu0 %v5902_v8 }
 0x149   : > { %2884 = vmatpush1.bf16.msra.mxu1 %v5761_v25 }
 0x14a   : > { %2885 = vmatprep.subr.bf16.mxu1 %v5902_v8 }
 0x14c   : > { %5617 = vmatmul.mubr.msk.bf16.gmra.mrb[44].mxu0 %vm1165_vm9, %v1154_v6 }
 0x17e   : > { %v5510_v28 = vpop.f32.mrb[0].mxu0 }
 0x17f   : > { %v1243_v33 = vpop.f32.mrb[1].mxu0 }
 0x180   : > { %v5511_v19 = vpop.f32.mrb[2].mxu0  ;;  %v5766_v33 = vld [vmem:[%s8090_s4 + $0xf8] sm:$0xff]  }
 0x181   : > { %v1246_v32 = vpop.f32.mrb[3].mxu0  ;;  %3381 = vmatpush1.bf16.msra.mxu0 %v5766_v33 }
 0x182   : > { %3382 = vmatprep.subr.bf16.mxu0 %v5902_v8 }
 0x197   : > { %v5548_v34 = vpop.f32.mrb[12].mxu0 }
 0x198   : > { %v6552_v35 = vadd.f32 %v5548_v34, %v5510_v28  ;;  %v1430_v36 = vpop.f32.mrb[13].mxu0  ;;  %v5763_v34 = vld [vmem:[%s8090_s4 + $0xa0] sm:$0xff]  }
 0x199   : > { %v5549_v37 = vpop.f32.mrb[14].mxu0  ;;  %2886 = vmatpush1.bf16.msra.mxu1 %v5763_v34 }
 0x19a   : > { %v6554_v58 = vadd.f32 %v5549_v37, %v5511_v19  ;;  %v1433_v5 = vpop.f32.mrb[15].mxu0  ;;  %2887 = vmatprep.subr.bf16.mxu1 %v5902_v8 }
 0x19e   : > { %v6556_v38 = vpop.f32.mrb[0].mxu1 }
 0x19f   : > { %v6558_v55 = vpop.f32.mrb[1].mxu1 }
 0x1a0   : > { %v6560_v41 = vpop.f32.mrb[2].mxu1 }
 0x1a1   : > { %v6562_v45 = vpop.f32.mrb[3].mxu1 }
 0x1a8   : > { %v6564_v46 = vpop.f32.mrb[4].mxu1 }
 0x1a9   : > { %v6566_v30 = vpop.f32.mrb[5].mxu1 }
 0x1aa   : > { %v6568_v47 = vpop.f32.mrb[6].mxu1 }
 0x1ab   : > { %v6570_v49 = vpop.f32.mrb[7].mxu1 }
 0x1b2   : > { %v6572_v48 = vpop.f32.mrb[8].mxu1 }
 0x1b3   : > { %v6574_v52 = vpop.f32.mrb[9].mxu1 }
 0x1b4   : > { %v6576_v39 = vpop.f32.mrb[10].mxu1 }
 0x1b5   : > { %v6578_v0 = vpop.f32.mrb[11].mxu1 }
 0x1bb   : > { %v6580_v10 = vpop.f32.mrb[12].mxu1 }
 0x1bc   : > { %v6582_v51 = vpop.f32.mrb[13].mxu1 }
 0x1bd   : > { %v6584_v42 = vpop.f32.mrb[14].mxu1 }
 0x1be   : > { %v6586_v54 = vpop.f32.mrb[15].mxu1 }
 0x1c3   : > { %v6588_v56 = vpop.f32.mrb[16].mxu1 }
 0x1c4   : > { %v6590_v57 = vpop.f32.mrb[17].mxu1 }
 0x1c5   : > { %v6592_v59 = vpop.f32.mrb[18].mxu1 }
 0x1c6   : > { %v6594_v60 = vpop.f32.mrb[19].mxu1 }
 0x1cb   : > { %v5542_v3 = vpop.f32.mrb[20].mxu1 }
 0x1cc   : > { %v1371_v7 = vpop.f32.mrb[21].mxu1 }
 0x1cd   : > { %v5543_v11 = vpop.f32.mrb[22].mxu1 }
 0x1ce   : > { %v1374_v4 = vpop.f32.mrb[23].mxu1 }
 0x1d7   : > { %v5580_v17 = vpop.f32.mrb[36].mxu0 }
 0x1d8   : > { %v1558_v18 = vpop.f32.mrb[37].mxu0 }
 0x1d9   : > { %v6636_v21 = vadd.f32 %v1558_v18, %v1371_v7  ;;  %v5581_v50 = vpop.f32.mrb[38].mxu0  ;;  %v5765_v7 = vld [vmem:[%s8090_s4 + $0xa8] sm:$0xff]  }
 0x1da   : > { %v1561_v23 = vpop.f32.mrb[39].mxu0  ;;  %2888 = vmatpush1.bf16.msra.mxu1 %v5765_v7 }
 0x1db   : > { %v6645_v24 = vadd.f32 %v1561_v23, %v1374_v4  ;;  %v5770_v4 = vld [vmem:[%s8090_s4 + $0x108] sm:$0xff]   ;;  %2889 = vmatprep.subr.bf16.mxu1 %v5902_v8 }
 0x1de   : > { %2890 = vmatpush1.bf16.msra.mxu1 %v5767_v61 }
 0x1df   : > { %v5586_v26 = vpop.f32.mrb[40].mxu0  ;;  %2891 = vmatprep.subr.bf16.mxu1 %v5902_v8 }
 0x1e0   : > { %v1765_v29 = vadd.f32 %v5586_v26, %v6552_v35  ;;  %v1620_v63 = vpop.f32.mrb[41].mxu0 }
 0x1e1   : > { %v5587_v43 = vpop.f32.mrb[42].mxu0 }
 0x1e2   : > { %v1808_v22 = vadd.f32 %v6661_v13, %v1765_v29  ;;  %v1766_v6 = vadd.f32 %v5587_v43, %v6554_v58  ;;  %v1623_v28 = vpop.f32.mrb[43].mxu0  ;;  %v5768_v58 = vld [vmem:[%s8090_s4 + $0x100] sm:$0xff]  }
 0x1e3   : > { %3383 = vmatpush1.bf16.msra.mxu0 %v5768_v58  ;;  %v5769_v58 = vld [vmem:[%s8090_s4 + $0xb8] sm:$0xff]  }
 0x1e4   : > { %v5351_v19 = vpack.c.bf16 %v1808_v22, %v1808_v22  ;;  %v1809_v32 = vadd.f32 %v6661_v13, %v1766_v6  ;;  %v2005_v35 = vmax.f32 %v1808_v22, 0.0  ;;  %3384 = vmatprep.subr.bf16.mxu0 %v5902_v8  ;;  %2892 = vmatpush1.bf16.msra.mxu1 %v5769_v58 }
 0x1e5   : > { %3105 = vmatprep.subr.bf16.mxu1 %v5902_v8 }
 0x1e6   : > { %1971 = vst.msk [vmem:[%s6680_s19] sm:$0xf] %vm1970_vm10, %v5351_v19  ;;  %v5352_v36 = vpack.c.bf16 %v1809_v32, %v1809_v32  ;;  %v2006_v37 = vmax.f32 %v1809_v32, 0.0 }
 0x1e7   : > { %v5590_v5 = vpop.f32.mrb[4].mxu0  ;;  %3385 = vmatpush1.bf16.msra.mxu0 %v5770_v4 }
 0x1e8   : > { %1972 = vst.msk [vmem:[%s6680_s19 + $0x4] sm:$0xf] %vm1970_vm10, %v5352_v36  ;;  %v2088_v1 = vpack.c.bf16 %v2006_v37, %v2005_v35  ;;  %v1812_v2 = vadd.f32 %v5590_v5, %v6661_v13  ;;  %v1636_v20 = vpop.f32.mrb[5].mxu0  ;;  %3386 = vmatprep.subr.bf16.mxu0 %v5902_v8 }
 0x1e9   : > { %v1810_v31 = vadd.f32 %v6661_v13, %v1636_v20  ;;  %v5591_v3 = vpop.f32.mrb[6].mxu0 }
 0x1ea   : > { %v2113_v9 = vshrl.u32 %v2088_v1, 16  ;;  %v5355_v11 = vpack.c.bf16 %v1812_v2, %v1812_v2  ;;  %v1639_v62 = vpop.f32.mrb[7].mxu0  ;;  %v1813_v14 = vadd.f32 %v5591_v3, %v6661_v13  ;;  %v2116_v17 = vshll.u32 %v2088_v1, 16  ;;  %v5772_v3 = vld [vmem:[%s8090_s4 + $0x110] sm:$0xff]  }
 0x1eb   : > { %v5353_v12 = vpack.c.bf16 %v1810_v31, %v1810_v31  ;;  %v1811_v15 = vadd.f32 %v6661_v13, %v1639_v62  ;;  %v2009_v18 = vmax.f32 %v1812_v2, 0.0  ;;  %v2007_v50 = vmax.f32 %v1810_v31, 0.0  ;;  %3387 = vmatpush1.bf16.msra.mxu0 %v5772_v3 }
 0x1ec   : > { %v2115_v16 = vrot.slane %v2113_v9, 7  ;;  %1975 = vst.msk [vmem:[%s6680_s19 + $0x10] sm:$0xf] %vm1970_vm10, %v5355_v11  ;;  %v5356_v53 = vpack.c.bf16 %v1813_v14, %v1813_v14  ;;  %v2010_v23 = vmax.f32 %v1813_v14, 0.0  ;;  %3388 = vmatprep.subr.bf16.mxu0 %v5902_v8 }
 0x1ed   : > { %1973 = vst.msk [vmem:[%s6680_s19 + $0x8] sm:$0xf] %vm1970_vm10, %v5353_v12  ;;  %v5354_v44 = vpack.c.bf16 %v1811_v15, %v1811_v15  ;;  %v2008_v27 = vmax.f32 %v1811_v15, 0.0 }
 0x1ee   : > { %v2118_v26 = vor.u32 %v2116_v17, %v2115_v16  ;;  %v2286_v29 = vsel %vm6046_vm4, %v2115_v16, 0  ;;  %1976 = vst.msk [vmem:[%s6680_s19 + $0x14] sm:$0xf] %vm1970_vm10, %v5356_v53  ;;  %v2090_v63 = vpack.c.bf16 %v2010_v23, %v2009_v18  ;;  %v5773_v16 = vld [vmem:[%s8090_s4 + $0x118] sm:$0xff]  }
 0x1ef   : > { %1974 = vst.msk [vmem:[%s6680_s19 + $0xc] sm:$0xf] %vm1970_vm10, %v5354_v44  ;;  %v2089_v43 = vpack.c.bf16 %v2008_v27, %v2007_v50  ;;  %v5594_v25 = vpop.f32.mrb[8].mxu0  ;;  %v2595_v33 = vrot.slane %v2286_v29, 1  ;;  %v2323_v19 = vshll.u32 %v2286_v29, 16  ;;  %3389 = vmatpush1.bf16.msra.mxu0 %v5773_v16 }
 0x1f0   : > { %v1816_v22 = vadd.f32 %v5594_v25, %v6661_v13  ;;  %v1652_v6 = vpop.f32.mrb[9].mxu0  ;;  %v6721_v28 = vsel %vm6046_vm4, 0, %v2118_v26  ;;  %v2127_v32 = vshrl.u32 %v2090_v63, 16  ;;  %v2130_v34 = vshll.u32 %v2090_v63, 16 }
 0x1f1   : > { %v2120_v35 = vshrl.u32 %v2089_v43, 16  ;;  %v2123_v36 = vshll.u32 %v2089_v43, 16  ;;  %v5595_v37 = vpop.f32.mrb[10].mxu0  ;;  %v1814_v2 = vadd.f32 %v6661_v13, %v1652_v6  ;;  %v2594_v62 = vrot.slane %v6721_v28, 1 }
 0x1f2   : > { %v5359_v5 = vpack.c.bf16 %v1816_v22, %v1816_v22  ;;  %v2013_v1 = vmax.f32 %v1816_v22, 0.0  ;;  %v1817_v20 = vadd.f32 %v5595_v37, %v6661_v13  ;;  %v1655_v31 = vpop.f32.mrb[11].mxu0  ;;  %v6732_v7 = vrot.slane %v2127_v32, 7 }
 0x1f3   : > { %v2122_v9 = vrot.slane %v2120_v35, 7  ;;  %v1815_v11 = vadd.f32 %v6661_v13, %v1655_v31  ;;  %v5357_v4 = vpack.c.bf16 %v1814_v2, %v1814_v2  ;;  %v2011_v12 = vmax.f32 %v1814_v2, 0.0 }
 0x1f4   : > { %1979 = vst.msk [vmem:[%s6680_s19 + $0x20] sm:$0xf] %vm1970_vm10, %v5359_v5  ;;  %v5360_v14 = vpack.c.bf16 %v1817_v20, %v1817_v20  ;;  %v2014_v15 = vmax.f32 %v1817_v20, 0.0  ;;  %v2132_v17 = vor.u32 %v2130_v34, %v6732_v7  ;;  %v6748_v44 = vsel %vm972_vm2, %v2594_v62, %v2595_v33 }
 0x1f5   : > { %v2125_v18 = vor.u32 %v2123_v36, %v2122_v9  ;;  %v5358_v50 = vpack.c.bf16 %v1815_v11, %v1815_v11  ;;  %v2012_v53 = vmax.f32 %v1815_v11, 0.0  ;;  %1977 = vst.msk [vmem:[%s6680_s19 + $0x18] sm:$0xf] %vm1970_vm10, %v5357_v4  ;;  %v2318_v27 = vshll.u32 %v6721_v28, 16  ;;  %5182 = vmatprep.mubr.msk.bf16.mxu1 %vm2645_vm11, %v6748_v44 }
 0x1f6   : > { %1980 = vst.msk [vmem:[%s6680_s19 + $0x24] sm:$0xf] %vm1970_vm10, %v5360_v14  ;;  %v2092_v23 = vpack.c.bf16 %v2014_v15, %v2013_v1  ;;  %v6754_v61 = vsel %vm6046_vm4, 0, %v2132_v17  ;;  %v2316_v43 = vshrl.u32 %v6721_v28, 16  ;;  %v2325_v33 = vrot.slane %v2323_v19, 1 }
 0x1f7   : > { %v6758_v26 = vsel %vm6046_vm4, 0, %v2125_v18  ;;  %1978 = vst.msk [vmem:[%s6680_s19 + $0x1c] sm:$0xf] %vm1970_vm10, %v5358_v50  ;;  %v2091_v29 = vpack.c.bf16 %v2012_v53, %v2011_v12  ;;  %v5598_v63 = vpop.f32.mrb[16].mxu0  ;;  %v2320_v6 = vrot.slane %v2318_v27, 1  ;;  %v2287_v11 = vsel %vm6046_vm4, %v2122_v9, 0 }
 0x1f8   : > { %v2141_v25 = vshrl.u32 %v2092_v23, 16  ;;  %v5622_v22 = vadd.f32 %v5598_v63, %v6556_v38  ;;  %v1668_v32 = vpop.f32.mrb[17].mxu0  ;;  %v2144_v34 = vshll.u32 %v2092_v23, 16  ;;  %v2597_v12 = vrot.slane %v6758_v26, 1 }
 0x1f9   : > { %v2134_v35 = vshrl.u32 %v2091_v29, 16  ;;  %v2137_v36 = vshll.u32 %v2091_v29, 16  ;;  %v5623_v37 = vadd.f32 %v1668_v32, %v6558_v55  ;;  %v5599_v58 = vpop.f32.mrb[18].mxu0  ;;  %v2321_v2 = vor.u32 %v2320_v6, %v2316_v43 }
 0x1fa   : > { %v6767_v5 = vrot.slane %v2141_v25, 7  ;;  %v1820_v1 = vadd.f32 %v5622_v22, %v6661_v13  ;;  %v5624_v20 = vadd.f32 %v5599_v58, %v6560_v41  ;;  %v1671_v31 = vpop.f32.mrb[19].mxu0  ;;  %v2598_v17 = vrot.slane %v2287_v11, 1 }
 0x1fb   : > { %v6771_v38 = vrot.slane %v2134_v35, 7  ;;  %v1818_v19 = vadd.f32 %v5623_v37, %v6661_v13  ;;  %v5625_v3 = vadd.f32 %v1671_v31, %v6562_v45  ;;  %v2326_v4 = vsel %vm651_vm3, %v2321_v2, %v2325_v33 }
 0x1fc   : > { %v2146_v55 = vor.u32 %v2144_v34, %v6767_v5  ;;  %v5363_v62 = vpack.c.bf16 %v1820_v1, %v1820_v1  ;;  %v2017_v14 = vmax.f32 %v1820_v1, 0.0  ;;  %2521 = vrot.lane.b32.xlu0 %v2326_v4, %s5903_s23  ;;  %v1821_v45 = vadd.f32 %v5624_v20, %v6661_v13 }
 0x1fd   : > { %v2139_v41 = vor.u32 %v2137_v36, %v6771_v38  ;;  %v5361_v15 = vpack.c.bf16 %v1818_v19, %v1818_v19  ;;  %v2015_v9 = vmax.f32 %v1818_v19, 0.0  ;;  %v1819_v16 = vadd.f32 %v5625_v3, %v6661_v13 }
 0x1fe   : > { %1983 = vst.msk [vmem:[%s6680_s19 + $0x30] sm:$0xf] %vm1970_vm10, %v5363_v62  ;;  %v6789_v18 = vsel %vm6046_vm4, %v6732_v7, 0  ;;  %v6793_v50 = vsel %vm6046_vm4, 0, %v2146_v55  ;;  %v5364_v23 = vpack.c.bf16 %v1821_v45, %v1821_v45  ;;  %v2018_v27 = vmax.f32 %v1821_v45, 0.0 }
 0x1ff   : > { %v6797_v53 = vsel %vm6046_vm4, 0, %v2139_v41  ;;  %1981 = vst.msk [vmem:[%s6680_s19 + $0x28] sm:$0xf] %vm1970_vm10, %v5361_v15  ;;  %v5602_v29 = vpop.f32.mrb[20].mxu0  ;;  %v5362_v63 = vpack.c.bf16 %v1819_v16, %v1819_v16  ;;  %v2016_v43 = vmax.f32 %v1819_v16, 0.0  ;;  %v6802_v25 = vsel %vm972_vm2, %v2597_v12, %v2598_v17 }
 0x200   : > { %v2342_v7 = vshll.u32 %v6754_v61, 16  ;;  %v1684_v22 = vpop.f32.mrb[21].mxu0  ;;  %1984 = vst.msk [vmem:[%s6680_s19 + $0x34] sm:$0xf] %vm1970_vm10, %v5364_v23  ;;  %v2094_v6 = vpack.c.bf16 %v2018_v27, %v2017_v14  ;;  %5262 = vmatprep.mubr.msk.bf16.mxu0 %vm2645_vm11, %v6802_v25  ;;  %v2340_v33 = vshrl.u32 %v6754_v61, 16  ;;  %v2347_v32 = vshll.u32 %v6789_v18, 16 }
 0x201   : > { %v2330_v34 = vshll.u32 %v6758_v26, 16  ;;  %v5603_v35 = vpop.f32.mrb[22].mxu0  ;;  %1982 = vst.msk [vmem:[%s6680_s19 + $0x2c] sm:$0xf] %vm1970_vm10, %v5362_v63  ;;  %v2093_v36 = vpack.c.bf16 %v2016_v43, %v2015_v9  ;;  %v2335_v58 = vshll.u32 %v2287_v11, 16  ;;  %v5626_v1 = vadd.f32 %v5602_v29, %v6564_v46 }
 0x202   : > { %v2344_v37 = vrot.slane %v2342_v7, 1  ;;  %v1687_v2 = vpop.f32.mrb[23].mxu0  ;;  %v2155_v20 = vshrl.u32 %v2094_v6, 16  ;;  %v2158_v31 = vshll.u32 %v2094_v6, 16  ;;  %v2328_v19 = vshrl.u32 %v6758_v26, 16 }
 0x203   : > { %v2332_v3 = vrot.slane %v2330_v34, 1  ;;  %v2148_v55 = vshrl.u32 %v2093_v36, 16  ;;  %v2349_v4 = vrot.slane %v2347_v32, 1  ;;  %v2337_v12 = vrot.slane %v2335_v58, 1 }
 0x204   : > { %v2345_v62 = vor.u32 %v2344_v37, %v2340_v33  ;;  %v6816_v41 = vrot.slane %v2155_v20, 7  ;;  %v1824_v15 = vadd.f32 %v5626_v1, %v6661_v13  ;;  %v5627_v45 = vadd.f32 %v1684_v22, %v6566_v30 }
 0x205   : > { %v2333_v14 = vor.u32 %v2332_v3, %v2328_v19  ;;  %v2151_v11 = vshll.u32 %v2093_v36, 16  ;;  %v5628_v9 = vadd.f32 %v5603_v35, %v6568_v47  ;;  %v5629_v16 = vadd.f32 %v1687_v2, %v6570_v49 }
 0x206   : > { %v2350_v46 = vsel %vm651_vm3, %v2345_v62, %v2349_v4  ;;  %v6824_v17 = vor.u32 %v2158_v31, %v6816_v41  ;;  %v6826_v23 = vrot.slane %v2148_v55, 7  ;;  %v5367_v29 = vpack.c.bf16 %v1824_v15, %v1824_v15 }
 0x207   : > { %2525 = vrot.lane.b32.xlu0 %v2350_v46, %s5903_s23  ;;  %v2338_v27 = vsel %vm651_vm3, %v2333_v14, %v2337_v12  ;;  %v5606_v63 = vpop.f32.mrb[24].mxu0  ;;  %v2021_v30 = vmax.f32 %v1824_v15, 0.0  ;;  %v1822_v43 = vadd.f32 %v5627_v45, %v6661_v13  ;;  %v1825_v47 = vadd.f32 %v5628_v9, %v6661_v13 }
 0x208   : > { %2523 = vrot.lane.b32.xlu1 %v2338_v27, %s5903_s23  ;;  %v1823_v49 = vadd.f32 %v5629_v16, %v6661_v13  ;;  %v1700_v7 = vpop.f32.mrb[25].mxu0  ;;  %1987 = vst.msk [vmem:[%s6680_s19 + $0x40] sm:$0xf] %vm1970_vm10, %v5367_v29  ;;  %v6839_v22 = vsel %vm6046_vm4, %v6767_v5, 0  ;;  %v2364_v6 = vshrl.u32 %v6793_v50, 16  ;;  %v2366_v33 = vshll.u32 %v6793_v50, 16 }
 0x209   : > { %v6846_v32 = vsel %vm6046_vm4, %v6771_v38, 0  ;;  %v5607_v34 = vpop.f32.mrb[26].mxu0  ;;  %v5365_v35 = vpack.c.bf16 %v1822_v43, %v1822_v43  ;;  %v2019_v36 = vmax.f32 %v1822_v43, 0.0  ;;  %v5368_v37 = vpack.c.bf16 %v1825_v47, %v1825_v47 }
 0x20a   : > { %v2022_v58 = vmax.f32 %v1825_v47, 0.0  ;;  %v1703_v1 = vpop.f32.mrb[27].mxu0  ;;  %v5366_v2 = vpack.c.bf16 %v1823_v49, %v1823_v49  ;;  %v2020_v5 = vmax.f32 %v1823_v49, 0.0  ;;  %v2368_v20 = vrot.slane %v2366_v33, 1 }
 0x20b   : > { %v2371_v31 = vshll.u32 %v6839_v22, 16  ;;  %v6850_v19 = vor.u32 %v2151_v11, %v6826_v23  ;;  %1985 = vst.msk [vmem:[%s6680_s19 + $0x38] sm:$0xf] %vm1970_vm10, %v5365_v35  ;;  %1988 = vst.msk [vmem:[%s6680_s19 + $0x44] sm:$0xf] %vm1970_vm10, %v5368_v37  ;;  %v2354_v3 = vshll.u32 %v6797_v53, 16  ;;  %v5630_v14 = vadd.f32 %v5606_v63, %v6572_v48 }
 0x20c   : > { %v2096_v38 = vpack.c.bf16 %v2022_v58, %v2021_v30  ;;  %v2359_v55 = vshll.u32 %v6846_v32, 16  ;;  %1986 = vst.msk [vmem:[%s6680_s19 + $0x3c] sm:$0xf] %vm1970_vm10, %v5366_v2  ;;  %v2095_v62 = vpack.c.bf16 %v2020_v5, %v2019_v36  ;;  %v2369_v4 = vor.u32 %v2368_v20, %v2364_v6 }
 0x20d   : > { %v2373_v12 = vrot.slane %v2371_v31, 1  ;;  %v2352_v11 = vshrl.u32 %v6797_v53, 16  ;;  %v2356_v46 = vrot.slane %v2354_v3, 1  ;;  %v1828_v29 = vadd.f32 %v5630_v14, %v6661_v13 }
 0x20e   : > { %v2169_v15 = vshrl.u32 %v2096_v38, 16  ;;  %v2172_v45 = vshll.u32 %v2096_v38, 16  ;;  %v2162_v9 = vshrl.u32 %v2095_v62, 16  ;;  %v2361_v27 = vrot.slane %v2359_v55, 1 }
 0x20f   : > { %v2374_v16 = vsel %vm651_vm3, %v2369_v4, %v2373_v12  ;;  %v5610_v30 = vpop.f32.mrb[28].mxu0  ;;  %v2357_v47 = vor.u32 %v2356_v46, %v2352_v11  ;;  %v5631_v48 = vadd.f32 %v1700_v7, %v6574_v52  ;;  %v5632_v63 = vadd.f32 %v5607_v34, %v6576_v39 }
 0x210   : > { %v6864_v43 = vrot.slane %v2169_v15, 7  ;;  %2529 = vrot.lane.b32.xlu0 %v2374_v16, %s5903_s23  ;;  %v1716_v49 = vpop.f32.mrb[29].mxu0  ;;  %v6869_v6 = vrot.slane %v2162_v9, 7  ;;  %v2165_v33 = vshll.u32 %v2095_v62, 16  ;;  %v5371_v35 = vpack.c.bf16 %v1828_v29, %v1828_v29 }
 0x211   : > { %v5633_v36 = vadd.f32 %v1703_v1, %v6578_v0  ;;  %v5611_v37 = vpop.f32.mrb[30].mxu0  ;;  %v2362_v58 = vsel %vm651_vm3, %v2357_v47, %v2361_v27  ;;  %v2025_v2 = vmax.f32 %v1828_v29, 0.0  ;;  %v1826_v5 = vadd.f32 %v5631_v48, %v6661_v13 }
 0x212   : > { %v1829_v20 = vadd.f32 %v5632_v63, %v6661_v13  ;;  %v1719_v31 = vpop.f32.mrb[31].mxu0  ;;  %v2174_v52 = vor.u32 %v2172_v45, %v6864_v43  ;;  %2527 = vrot.lane.b32.xlu1 %v2362_v58, %s5903_s23  ;;  %1991 = vst.msk [vmem:[%s6680_s19 + $0x50] sm:$0xf] %vm1970_vm10, %v5371_v35  ;;  %v5634_v0 = vadd.f32 %v5610_v30, %v6580_v10  ;;  %v6884_v7 = vsel %vm6046_vm4, 0, %v6824_v17 }
 0x213   : > { %v1827_v39 = vadd.f32 %v5633_v36, %v6661_v13  ;;  %v5369_v34 = vpack.c.bf16 %v1826_v5, %v1826_v5  ;;  %v2023_v1 = vmax.f32 %v1826_v5, 0.0  ;;  %v6892_v12 = vsel %vm6046_vm4, %v6816_v41, 0 }
 0x214   : > { %v5372_v38 = vpack.c.bf16 %v1829_v20, %v1829_v20  ;;  %v2026_v3 = vmax.f32 %v1829_v20, 0.0  ;;  %v6887_v4 = vadd.f32 %v5634_v0, %v6661_v13  ;;  %v6895_v10 = vor.u32 %v2165_v33, %v6869_v6 }
 0x215   : > { %v5370_v55 = vpack.c.bf16 %v1827_v39, %v1827_v39  ;;  %v2024_v62 = vmax.f32 %v1827_v39, 0.0  ;;  %1989 = vst.msk [vmem:[%s6680_s19 + $0x48] sm:$0xf] %vm1970_vm10, %v5369_v34  ;;  %v2390_v14 = vshll.u32 %v6884_v7, 16  ;;  %v2395_v15 = vshll.u32 %v6892_v12, 16 }
 0x216   : > { %1992 = vst.msk [vmem:[%s6680_s19 + $0x54] sm:$0xf] %vm1970_vm10, %v5372_v38  ;;  %v2098_v17 = vpack.c.bf16 %v2026_v3, %v2025_v2  ;;  %v5375_v41 = vpack.c.bf16 %v6887_v4, %v6887_v4  ;;  %v2388_v11 = vshrl.u32 %v6884_v7, 16  ;;  %v5635_v46 = vadd.f32 %v1716_v49, %v6582_v51 }
 0x217   : > { %1990 = vst.msk [vmem:[%s6680_s19 + $0x4c] sm:$0xf] %vm1970_vm10, %v5370_v55  ;;  %v2097_v45 = vpack.c.bf16 %v2024_v62, %v2023_v1  ;;  %v5614_v9 = vpop.f32.mrb[32].mxu0  ;;  %v2029_v29 = vmax.f32 %v6887_v4, 0.0  ;;  %v2392_v30 = vrot.slane %v2390_v14, 1  ;;  %v2397_v63 = vrot.slane %v2395_v15, 1 }
 0x218   : > { %v2183_v16 = vshrl.u32 %v2098_v17, 16  ;;  %v2186_v27 = vshll.u32 %v2098_v17, 16  ;;  %v1732_v47 = vpop.f32.mrb[33].mxu0  ;;  %1995 = vst.msk [vmem:[%s6680_s19 + $0x60] sm:$0xf] %vm1970_vm10, %v5375_v41  ;;  %v1830_v33 = vadd.f32 %v5635_v46, %v6661_v13  ;;  %v6916_v35 = vsel %vm6046_vm4, 0, %v6850_v19 }
 0x219   : > { %v2176_v48 = vshrl.u32 %v2097_v45, 16  ;;  %v6918_v36 = vpop.f32.mrb[34].mxu0  ;;  %v2179_v49 = vshll.u32 %v2097_v45, 16  ;;  %v2393_v58 = vor.u32 %v2392_v30, %v2388_v11  ;;  %v6925_v2 = vsel %vm6046_vm4, %v6826_v23, 0 }
 0x21a   : > { %v6920_v51 = vrot.slane %v2183_v16, 7  ;;  %v6927_v5 = vpop.f32.mrb[35].mxu0  ;;  %v5373_v39 = vpack.c.bf16 %v1830_v33, %v1830_v33  ;;  %v2376_v19 = vshrl.u32 %v6916_v35, 16  ;;  %v2378_v0 = vshll.u32 %v6916_v35, 16 }
 0x21b   : > { %v6929_v20 = vrot.slane %v2176_v48, 7  ;;  %v2398_v34 = vsel %vm651_vm3, %v2393_v58, %v2397_v63  ;;  %v2027_v1 = vmax.f32 %v1830_v33, 0.0  ;;  %v2383_v38 = vshll.u32 %v6925_v2, 16 }
 0x21c   : > { %v5636_v3 = vadd.f32 %v5611_v37, %v6584_v42  ;;  %v2188_v55 = vor.u32 %v2186_v27, %v6920_v51  ;;  %2533 = vrot.lane.b32.xlu0 %v2398_v34, %s5903_s23  ;;  %1993 = vst.msk [vmem:[%s6680_s19 + $0x58] sm:$0xf] %vm1970_vm10, %v5373_v39  ;;  %v2380_v23 = vrot.slane %v2378_v0, 1  ;;  %v5637_v62 = vadd.f32 %v1719_v31, %v6586_v54 }
 0x21d   : > { %v5638_v4 = vadd.f32 %v5614_v9, %v6588_v56  ;;  %v6943_v17 = vor.u32 %v2179_v49, %v6929_v20  ;;  %v6948_v15 = vsel %vm6046_vm4, 0, %v2174_v52  ;;  %v6953_v42 = vsel %vm6046_vm4, %v6864_v43, 0 }
 0x21e   : > { %v1833_v14 = vadd.f32 %v5636_v3, %v6661_v13  ;;  %v2381_v37 = vor.u32 %v2380_v23, %v2376_v19  ;;  %v2385_v45 = vrot.slane %v2383_v38, 1  ;;  %v1831_v54 = vadd.f32 %v5637_v62, %v6661_v13 }
 0x21f   : > { %v1836_v56 = vadd.f32 %v5638_v4, %v6661_v13  ;;  %v5618_v31 = vpop.f32.mrb[44].mxu0  ;;  %v2414_v46 = vshll.u32 %v6948_v15, 16  ;;  %v2419_v52 = vshll.u32 %v6953_v42, 16  ;;  %v2412_v49 = vshrl.u32 %v6948_v15, 16 }
 0x220   : > { %v5376_v41 = vpack.c.bf16 %v1833_v14, %v1833_v14  ;;  %v2030_v11 = vmax.f32 %v1833_v14, 0.0  ;;  %v1748_v9 = vpop.f32.mrb[45].mxu0  ;;  %v2386_v43 = vsel %vm651_vm3, %v2381_v37, %v2385_v45  ;;  %v5374_v16 = vpack.c.bf16 %v1831_v54, %v1831_v54 }
 0x221   : > { %v2028_v27 = vmax.f32 %v1831_v54, 0.0  ;;  %v5379_v30 = vpack.c.bf16 %v1836_v56, %v1836_v56  ;;  %v5619_v48 = vpop.f32.mrb[46].mxu0  ;;  %2531 = vrot.lane.b32.xlu1 %v2386_v43, %s5903_s23  ;;  %v2033_v33 = vmax.f32 %v1836_v56, 0.0  ;;  %v2416_v58 = vrot.slane %v2414_v46, 1 }
 0x222   : > { %1996 = vst.msk [vmem:[%s6680_s19 + $0x64] sm:$0xf] %vm1970_vm10, %v5376_v41  ;;  %v2100_v63 = vpack.c.bf16 %v2030_v11, %v2029_v29  ;;  %v6964_v39 = vpop.f32.mrb[47].mxu0  ;;  %1994 = vst.msk [vmem:[%s6680_s19 + $0x5c] sm:$0xf] %vm1970_vm10, %v5374_v16  ;;  %v5639_v0 = vadd.f32 %v1732_v47, %v6590_v57  ;;  %v6974_v34 = vsel %vm6046_vm4, 0, %v6895_v10 }
 0x223   : > { %v2099_v19 = vpack.c.bf16 %v2028_v27, %v2027_v1  ;;  %1999 = vst.msk [vmem:[%s6680_s19 + $0x70] sm:$0xf] %vm1970_vm10, %v5379_v30  ;;  %v6979_v29 = vsel %vm6046_vm4, %v6869_v6, 0  ;;  %v2417_v23 = vor.u32 %v2416_v58, %v2412_v49  ;;  %v2421_v62 = vrot.slane %v2419_v52, 1 }
 0x224   : > { %v2197_v38 = vshrl.u32 %v2100_v63, 16  ;;  %v2200_v3 = vshll.u32 %v2100_v63, 16  ;;  %v1834_v1 = vadd.f32 %v5639_v0, %v6661_v13  ;;  %v2400_v57 = vshrl.u32 %v6974_v34, 16 }
 0x225   : > { %v2190_v4 = vshrl.u32 %v2099_v19, 16  ;;  %v2402_v47 = vshll.u32 %v6974_v34, 16  ;;  %v2422_v10 = vsel %vm651_vm3, %v2417_v23, %v2421_v62  ;;  %v2407_v37 = vshll.u32 %v6979_v29, 16 }
 0x226   : > { %v2199_v14 = vrot.slane %v2197_v38, 7  ;;  %v5640_v6 = vadd.f32 %v6918_v36, %v6592_v59  ;;  %v2193_v54 = vshll.u32 %v2099_v19, 16  ;;  %2537 = vrot.lane.b32.xlu0 %v2422_v10, %s5903_s23  ;;  %v5377_v56 = vpack.c.bf16 %v1834_v1, %v1834_v1 }
 0x227   : > { %v2192_v45 = vrot.slane %v2190_v4, 7  ;;  %v2404_v31 = vrot.slane %v2402_v47, 1  ;;  %v2031_v11 = vmax.f32 %v1834_v1, 0.0  ;;  %v5641_v52 = vadd.f32 %v6927_v5, %v6594_v60 }
 0x228   : > { %v2202_v41 = vor.u32 %v2200_v3, %v2199_v14  ;;  %v1837_v46 = vadd.f32 %v5640_v6, %v6661_v13  ;;  %1997 = vst.msk [vmem:[%s6680_s19 + $0x68] sm:$0xf] %vm1970_vm10, %v5377_v56  ;;  %v2409_v16 = vrot.slane %v2407_v37, 1  ;;  %v6996_v59 = vsel %vm6046_vm4, 0, %v2188_v55 }
 0x229   : > { %v2405_v43 = vor.u32 %v2404_v31, %v2400_v57  ;;  %v7001_v36 = vsel %vm6046_vm4, %v6920_v51, 0  ;;  %v2195_v27 = vor.u32 %v2193_v54, %v2192_v45  ;;  %v1835_v63 = vadd.f32 %v5641_v52, %v6661_v13 }
 0x22a   : > { %v5380_v30 = vpack.c.bf16 %v1837_v46, %v1837_v46  ;;  %v2034_v48 = vmax.f32 %v1837_v46, 0.0  ;;  %v2438_v5 = vshll.u32 %v6996_v59, 16  ;;  %v2443_v49 = vshll.u32 %v7001_v36, 16 }
 0x22b   : > { %v2410_v60 = vsel %vm651_vm3, %v2405_v43, %v2409_v16  ;;  %v1795_v55 = vadd.f32 %v1748_v9, %v6636_v21  ;;  %v5378_v58 = vpack.c.bf16 %v1835_v63, %v1835_v63  ;;  %v2032_v19 = vmax.f32 %v1835_v63, 0.0 }
 0x22c   : > { %2535 = vrot.lane.b32.xlu1 %v2410_v60, %s5903_s23  ;;  %2000 = vst.msk [vmem:[%s6680_s19 + $0x74] sm:$0xf] %vm1970_vm10, %v5380_v30  ;;  %v2102_v51 = vpack.c.bf16 %v2034_v48, %v2033_v33  ;;  %v7014_v0 = vsel %vm6046_vm4, 0, %v6943_v17  ;;  %v2436_v38 = vshrl.u32 %v6996_v59, 16  ;;  %v2440_v3 = vrot.slane %v2438_v5, 1 }
 0x22d   : > { %v1838_v23 = vadd.f32 %v6661_v13, %v1795_v55  ;;  %v7021_v21 = vsel %vm6046_vm4, %v6929_v20, 0  ;;  %1998 = vst.msk [vmem:[%s6680_s19 + $0x6c] sm:$0xf] %vm1970_vm10, %v5378_v58  ;;  %v2101_v62 = vpack.c.bf16 %v2032_v19, %v2031_v11  ;;  %v2445_v4 = vrot.slane %v2443_v49, 1 }
 0x22e   : > { %v2211_v9 = vshrl.u32 %v2102_v51, 16  ;;  %v2214_v33 = vshll.u32 %v2102_v51, 16  ;;  %v2441_v1 = vor.u32 %v2440_v3, %v2436_v38  ;;  %v2424_v57 = vshrl.u32 %v7014_v0, 16 }
 0x22f   : > { %v5381_v17 = vpack.c.bf16 %v1838_v23, %v1838_v23  ;;  %v2426_v47 = vshll.u32 %v7014_v0, 16  ;;  %v2204_v37 = vshrl.u32 %v2101_v62, 16  ;;  %v2035_v6 = vmax.f32 %v1838_v23, 0.0 }
 0x230   : > { %v2213_v10 = vrot.slane %v2211_v9, 7  ;;  %v2431_v54 = vshll.u32 %v7021_v21, 16  ;;  %v2446_v20 = vsel %vm651_vm3, %v2441_v1, %v2445_v4  ;;  %v1796_v31 = vadd.f32 %v6964_v39, %v6645_v24 }
 0x231   : > { %2001 = vst.msk [vmem:[%s6680_s19 + $0x78] sm:$0xf] %vm1970_vm10, %v5381_v17  ;;  %v2428_v56 = vrot.slane %v2426_v47, 1  ;;  %v7035_v11 = vsel %vm6046_vm4, 0, %v2202_v41  ;;  %v2206_v52 = vrot.slane %v2204_v37, 7  ;;  %v2207_v43 = vshll.u32 %v2101_v62, 16  ;;  %2541 = vrot.lane.b32.xlu0 %v2446_v20, %s5903_s23 }
 0x232   : > { %v2216_v46 = vor.u32 %v2214_v33, %v2213_v10  ;;  %v7040_v16 = vsel %vm6046_vm4, %v2199_v14, 0  ;;  %v2433_v48 = vrot.slane %v2431_v54, 1  ;;  %v1839_v63 = vadd.f32 %v6661_v13, %v1796_v31 }
 0x233   : > { %v2429_v30 = vor.u32 %v2428_v56, %v2424_v57  ;;  %v2462_v24 = vshll.u32 %v7035_v11, 16  ;;  %v2460_v39 = vshrl.u32 %v7035_v11, 16  ;;  %v2467_v41 = vshll.u32 %v7040_v16, 16 }
 0x234   : > { %v7048_v60 = vsel %vm6046_vm4, 0, %v2195_v27  ;;  %v7052_v5 = vsel %vm6046_vm4, %v2192_v45, 0  ;;  %v5382_v49 = vpack.c.bf16 %v1839_v63, %v1839_v63  ;;  %v2036_v55 = vmax.f32 %v1839_v63, 0.0 }
 0x235   : > { %v2434_v14 = vsel %vm651_vm3, %v2429_v30, %v2433_v48  ;;  %v2464_v51 = vrot.slane %v2462_v24, 1  ;;  %v2209_v13 = vor.u32 %v2207_v43, %v2206_v52  ;;  %v2469_v58 = vrot.slane %v2467_v41, 1 }
 0x236   : > { %2539 = vrot.lane.b32.xlu1 %v2434_v14, %s5903_s23  ;;  %v2450_v19 = vshll.u32 %v7048_v60, 16  ;;  %v2455_v38 = vshll.u32 %v7052_v5, 16  ;;  %2002 = vst.msk [vmem:[%s6680_s19 + $0x7c] sm:$0xf] %vm1970_vm10, %v5382_v49  ;;  %v2103_v27 = vpack.c.bf16 %v2036_v55, %v2035_v6  ;;  %v7062_v45 = vsel %vm6046_vm4, 0, %v2216_v46 }
 0x237   : > { %v2465_v3 = vor.u32 %v2464_v51, %v2460_v39  ;;  %v7066_v23 = vsel %vm6046_vm4, %v2213_v10, 0  ;;  %v2448_v9 = vshrl.u32 %v7048_v60, 16  ;;  %v2486_v4 = vshll.u32 %v7062_v45, 16 }
 0x238   : > { %v2452_v33 = vrot.slane %v2450_v19, 1  ;;  %v2457_v62 = vrot.slane %v2455_v38, 1  ;;  %v2218_v1 = vshrl.u32 %v2103_v27, 16  ;;  %v2484_v57 = vshrl.u32 %v7062_v45, 16 }
 0x239   : > { %v2470_v17 = vsel %vm651_vm3, %v2465_v3, %v2469_v58  ;;  %v2491_v47 = vshll.u32 %v7066_v23, 16  ;;  %v2488_v6 = vrot.slane %v2486_v4, 1  ;;  %v7076_v10 = vsel %vm6046_vm4, 0, %v2209_v13 }
 0x23a   : > { %2545 = vrot.lane.b32.xlu0 %v2470_v17, %s5903_s23  ;;  %v2453_v37 = vor.u32 %v2452_v33, %v2448_v9  ;;  %v7080_v54 = vsel %vm6046_vm4, %v2206_v52, 0  ;;  %v2220_v20 = vrot.slane %v2218_v1, 7  ;;  %v2221_v56 = vshll.u32 %v2103_v27, 16 }
 0x23b   : > { %v2474_v31 = vshll.u32 %v7076_v10, 16  ;;  %v2489_v43 = vor.u32 %v2488_v6, %v2484_v57  ;;  %v2493_v30 = vrot.slane %v2491_v47, 1  ;;  %v2479_v48 = vshll.u32 %v7080_v54, 16 }
 0x23c   : > { %v2458_v46 = vsel %vm651_vm3, %v2453_v37, %v2457_v62  ;;  %v2223_v63 = vor.u32 %v2221_v56, %v2220_v20  ;;  %v2472_v24 = vshrl.u32 %v7076_v10, 16  ;;  %v7089_v52 = vsel %vm6046_vm4, %v2220_v20, 0  ;;  %v5771_v20 = vld [vmem:[%s8090_s4] sm:$0xff]  }
 0x23d   : > { %2543 = vrot.lane.b32.xlu1 %v2458_v46, %s5903_s23  ;;  %v2476_v39 = vrot.slane %v2474_v31, 1  ;;  %v2494_v41 = vsel %vm651_vm3, %v2489_v43, %v2493_v30  ;;  %v2108_v14 = vrot.slane %v5902_v8, 7  ;;  %v2481_v55 = vrot.slane %v2479_v48, 1  ;;  %v5774_v46 = vld [vmem:[%s8090_s4 + $0x8] sm:$0xff]   ;;  %v5775_v43 = vld [vmem:[%s8090_s4 + $0x10] sm:$0xff]  }
 0x23e   : > { %2549 = vrot.lane.b32.xlu0 %v2494_v41, %s5903_s23  ;;  %v7096_v51 = vsel %vm6046_vm4, 0, %v2223_v63  ;;  %v2503_v58 = vshll.u32 %v7089_v52, 16  ;;  %v2601_v48 = vrot.slane %v6789_v18, 1  ;;  %v5776_v63 = vld [vmem:[%s8090_s4 + $0x18] sm:$0xff]   ;;  %v2603_v41 = vrot.slane %v6797_v53, 1 }
 0x23f   : > { %v2477_v49 = vor.u32 %v2476_v39, %v2472_v24  ;;  %v2498_v13 = vshll.u32 %v7096_v51, 16  ;;  %v7102_v19 = vsel %vm6046_vm4, 0, %v2108_v14  ;;  %v7107_v27 = vsel %vm6046_vm4, %v2108_v14, 0 }
 0x240   : > { %v2304_v3 = vshrl.u32 %v7102_v19, 16  ;;  %v2306_v9 = vshll.u32 %v7102_v19, 16  ;;  %v2496_v33 = vshrl.u32 %v7096_v51, 16  ;;  %v2311_v4 = vshll.u32 %v7107_v27, 16 }
 0x241   : > { %v2482_v38 = vsel %vm651_vm3, %v2477_v49, %v2481_v55  ;;  %v2500_v62 = vrot.slane %v2498_v13, 1  ;;  %v2505_v57 = vrot.slane %v2503_v58, 1  ;;  %v2604_v14 = vrot.slane %v6846_v32, 1  ;;  %v5778_v49 = vld [vmem:[%s8090_s4 + $0x28] sm:$0xff]  }
 0x242   : > { %2547 = vrot.lane.b32.xlu1 %v2482_v38, %s5903_s23  ;;  %v2308_v1 = vrot.slane %v2306_v9, 1  ;;  %v2313_v47 = vrot.slane %v2311_v4, 1  ;;  %v2606_v58 = vrot.slane %v6793_v50, 1  ;;  %v2607_v38 = vrot.slane %v6839_v22, 1 }
 0x243   : > { %v2501_v17 = vor.u32 %v2500_v62, %v2496_v33  ;;  %v7173_v13 = vsel %vm972_vm2, %v2603_v41, %v2604_v14  ;;  %v2609_v62 = vrot.slane %v6916_v35, 1  ;;  %v2610_v4 = vrot.slane %v6925_v2, 1 }
 0x244   : > { %v2309_v37 = vor.u32 %v2308_v1, %v2304_v3  ;;  %v5780_v3 = vld [vmem:[%s8090_s4 + $0x38] sm:$0xff]   ;;  %v7196_v33 = vsel %vm972_vm2, %v2606_v58, %v2607_v38  ;;  %v5782_v1 = vld [vmem:[%s8090_s4 + $0x48] sm:$0xff]   ;;  %v2625_v41 = vrot.slane %v7001_v36, 1  ;;  %v2627_v36 = vrot.slane %v7048_v60, 1 }
 0x245   : > { %v2506_v40 = vsel %vm651_vm3, %v2501_v17, %v2505_v57  ;;  %v7219_v57 = vsel %vm972_vm2, %v2609_v62, %v2610_v4  ;;  %v2631_v38 = vrot.slane %v7040_v16, 1  ;;  %v2633_v16 = vrot.slane %v7076_v10, 1 }
 0x246   : > { %2551 = vrot.lane.b32.xlu1 %v2506_v40, %s5903_s23  ;;  %v2314_v6 = vsel %vm651_vm3, %v2309_v37, %v2313_v47  ;;  %v2612_v47 = vrot.slane %v6884_v7, 1  ;;  %v2613_v37 = vrot.slane %v6892_v12, 1  ;;  %v5784_v40 = vld [vmem:[%s8090_s4 + $0x58] sm:$0xff]   ;;  %vm4811_vm3 = vcmask 1047559  }
 0x247   : > { %2519 = vrot.lane.b32.xlu0 %v2314_v6, %s5903_s23 }
 0x24a   : > { %2553 = vrot.lane.b32.xlu1 %v2314_v6, %s5903_s23 }
 0x26e   : > { %v2522_v56 = vpop.permute.xlu0 %2521 }
 0x26f   : > { %v7124_v31 = vsel %vm2645_vm11, %v6721_v28, %v2522_v56  ;;  %v2600_v28 = vrot.slane %v6754_v61, 1  ;;  %v2616_v56 = vrot.slane %v6979_v29, 1  ;;  %v2618_v29 = vrot.slane %v6948_v15, 1 }
 0x270   : > { %2902 = vmatmul.mubr.bf16.vlgmr.msra.gmra.mrb[24].mxu1 %v7124_v31 }
 0x271   : > { %3106 = vmatpush1.bf16.msra.mxu1 %v5771_v20  ;;  %5183 = vmatprep.mubr.msk.bf16.mxu1 %vm2645_vm11, %v6802_v25  ;;  %v7150_v39 = vsel %vm972_vm2, %v2600_v28, %v2601_v48  ;;  %v7242_v20 = vsel %vm972_vm2, %v2612_v47, %v2613_v37  ;;  %v2619_v28 = vrot.slane %v6953_v42, 1  ;;  %v2621_v42 = vrot.slane %v7014_v0, 1 }
 0x272   : > { %3107 = vmatprep.subr.bf16.mxu1 %v5902_v8  ;;  %v2640_v47 = vrot.slane %v7089_v52, 1 }
 0x275   : > { %3108 = vmatpush1.bf16.msra.mxu1 %v5774_v46 }
 0x276   : > { %3109 = vmatprep.subr.bf16.mxu1 %v5902_v8 }
 0x279   : > { %3110 = vmatpush1.bf16.msra.mxu1 %v5775_v43  ;;  %v2526_v18 = vpop.permute.xlu0 %2525 }
 0x27a   : > { %v2524_v30 = vpop.permute.xlu1 %2523  ;;  %3111 = vmatprep.subr.bf16.mxu1 %v5902_v8  ;;  %v7167_v55 = vsel %vm2645_vm11, %v6754_v61, %v2526_v18  ;;  %v5779_v61 = vld [vmem:[%s8090_s4 + $0x30] sm:$0xff]  }
 0x27b   : > { %v7144_v24 = vsel %vm2645_vm11, %v6758_v26, %v2524_v30  ;;  %v5777_v26 = vld [vmem:[%s8090_s4 + $0x20] sm:$0xff]   ;;  %v7272_v30 = vsel %vm972_vm2, %v2618_v29, %v2619_v28 }
 0x27c   : > { %3399 = vmatmul.mubr.bf16.vlgmr.msra.gmra.mrb[48].mxu0 %v7144_v24  ;;  %2910 = vmatmul.mubr.bf16.gmra.mrb[28].mxu1 %v7144_v24 }
 0x27d   : > { %5263 = vmatprep.mubr.msk.bf16.mxu0 %vm2645_vm11, %v7150_v39  ;;  %5184 = vmatprep.mubr.msk.bf16.mxu1 %vm2645_vm11, %v7150_v39 }
 0x27e   : > { %3112 = vmatpush1.bf16.msra.mxu1 %v5776_v63  ;;  %v2622_v63 = vrot.slane %v7021_v21, 1  ;;  %v2624_v21 = vrot.slane %v6996_v59, 1 }
 0x27f   : > { %3113 = vmatprep.subr.bf16.mxu1 %v5902_v8 }
 0x280   : > { %v7302_v14 = vsel %vm972_vm2, %v2624_v21, %v2625_v41 }
 0x282   : > { %3114 = vmatpush1.bf16.msra.mxu1 %v5777_v26  ;;  %v2530_v22 = vpop.permute.xlu0 %2529  ;;  %v7287_v26 = vsel %vm972_vm2, %v2621_v42, %v2622_v63 }
 0x283   : > { %3115 = vmatprep.subr.bf16.mxu1 %v5902_v8  ;;  %v7213_v17 = vsel %vm2645_vm11, %v6793_v50, %v2530_v22  ;;  %v5783_v50 = vld [vmem:[%s8090_s4 + $0x50] sm:$0xff]   ;;  %v2634_v22 = vrot.slane %v7080_v54, 1  ;;  %v2636_v54 = vrot.slane %v7062_v45, 1 }
 0x284   : > { %3407 = vmatmul.mubr.bf16.gmra.mrb[52].mxu0 %v7167_v55  ;;  %2918 = vmatmul.mubr.bf16.gmra.mrb[32].mxu1 %v7167_v55  ;;  %v2528_v32 = vpop.permute.xlu1 %2527 }
 0x285   : > { %5264 = vmatprep.mubr.msk.bf16.mxu0 %vm2645_vm11, %v7173_v13  ;;  %5185 = vmatprep.mubr.msk.bf16.mxu1 %vm2645_vm11, %v7173_v13  ;;  %v7190_v9 = vsel %vm2645_vm11, %v6797_v53, %v2528_v32  ;;  %v5781_v53 = vld [vmem:[%s8090_s4 + $0x40] sm:$0xff]   ;;  %v7347_v62 = vsel %vm972_vm2, %v2633_v16, %v2634_v22 }
 0x286   : > { %3116 = vmatpush1.bf16.msra.mxu1 %v5778_v49 }
 0x287   : > { %3117 = vmatprep.subr.bf16.mxu1 %v5902_v8 }
 0x28a   : > { %3118 = vmatpush1.bf16.msra.mxu1 %v5779_v61  ;;  %v2628_v61 = vrot.slane %v7052_v5, 1  ;;  %v2630_v5 = vrot.slane %v7035_v11, 1 }
 0x28b   : > { %3119 = vmatprep.subr.bf16.mxu1 %v5902_v8 }
 0x28c   : > { %3415 = vmatmul.mubr.bf16.gmra.mrb[56].mxu0 %v7190_v9  ;;  %2926 = vmatmul.mubr.bf16.gmra.mrb[36].mxu1 %v7190_v9  ;;  %v7317_v32 = vsel %vm972_vm2, %v2627_v36, %v2628_v61 }
 0x28d   : > { %5265 = vmatprep.mubr.msk.bf16.mxu0 %vm2645_vm11, %v7196_v33  ;;  %5186 = vmatprep.mubr.msk.bf16.mxu1 %vm2645_vm11, %v7196_v33 }
 0x28e   : > { %3120 = vmatpush1.bf16.msra.mxu1 %v5780_v3  ;;  %v2534_v12 = vpop.permute.xlu0 %2533  ;;  %v7332_v3 = vsel %vm972_vm2, %v2630_v5, %v2631_v38 }
 0x28f   : > { %3121 = vmatprep.subr.bf16.mxu1 %v5902_v8 }
 0x292   : > { %3122 = vmatpush1.bf16.msra.mxu1 %v5781_v53 }
 0x293   : > { %3123 = vmatprep.subr.bf16.mxu1 %v5902_v8  ;;  %v2532_v2 = vpop.permute.xlu1 %2531 }
 0x294   : > { %3423 = vmatmul.mubr.bf16.gmra.mrb[60].mxu0 %v7213_v17  ;;  %2934 = vmatmul.mubr.bf16.gmra.mrb[40].mxu1 %v7213_v17  ;;  %v7236_v6 = vsel %vm2645_vm11, %v6916_v35, %v2532_v2  ;;  %v2615_v35 = vrot.slane %v6974_v34, 1 }
 0x295   : > { %5266 = vmatprep.mubr.msk.bf16.mxu0 %vm2645_vm11, %v7219_v57  ;;  %5187 = vmatprep.mubr.msk.bf16.mxu1 %vm2645_vm11, %v7219_v57 }
 0x296   : > { %3124 = vmatpush1.bf16.msra.mxu1 %v5782_v1  ;;  %v7257_v46 = vsel %vm972_vm2, %v2615_v35, %v2616_v56  ;;  %v2637_v1 = vrot.slane %v7066_v23, 1  ;;  %v2639_v23 = vrot.slane %v7096_v51, 1 }
 0x297   : > { %3125 = vmatprep.subr.bf16.mxu1 %v5902_v8 }
 0x298   : > { %v2538_v48 = vpop.permute.xlu0 %2537  ;;  %v2641_v37 = vsel %vm972_vm2, %v2639_v23, %v2640_v47 }
 0x29a   : > { %3126 = vmatpush1.bf16.msra.mxu1 %v5783_v50  ;;  %v7362_v50 = vsel %vm972_vm2, %v2636_v54, %v2637_v1 }
 0x29b   : > { %3127 = vmatprep.subr.bf16.mxu1 %v5902_v8  ;;  %v7252_v8 = vsel %vm2645_vm11, %v6884_v7, %v2534_v12  ;;  %v2592_v12 = vrot.slane %v7107_v27, 1 }
 0x29c   : > { %3431 = vmatmul.mubr.bf16.gmra.mrb[64].mxu0 %v7236_v6  ;;  %2942 = vmatmul.mubr.bf16.gmra.mrb[44].mxu1 %v7236_v6 }
 0x29d   : > { %5267 = vmatprep.mubr.msk.bf16.mxu0 %vm2645_vm11, %v7242_v20  ;;  %5188 = vmatprep.mubr.msk.bf16.mxu1 %vm2645_vm11, %v7242_v20 }
 0x29e   : > { %3128 = vmatpush1.bf16.msra.mxu1 %v5784_v40  ;;  %v2536_v43 = vpop.permute.xlu1 %2535  ;;  %v2591_v40 = vrot.slane %v7102_v19, 1 }
 0x29f   : > { %v7267_v7 = vsel %vm2645_vm11, %v6974_v34, %v2536_v43  ;;  %v7282_v34 = vsel %vm2645_vm11, %v6948_v15, %v2538_v48 }
 0x2a0   : > { %v2593_v52 = vsel %vm972_vm2, %v2591_v40, %v2592_v12  ;;  %vm4809_vm2 = vcmask 1046534  }
 0x2a3   : > { %v2542_v49 = vpop.permute.xlu0 %2541 }
 0x2a4   : > { %3439 = vmatmul.mubr.bf16.gmra.mrb[68].mxu0 %v7252_v8  ;;  %2950 = vmatmul.mubr.bf16.gmra.mrb[48].mxu1 %v7252_v8 }
 0x2a5   : > { %5268 = vmatprep.mubr.msk.bf16.mxu0 %vm2645_vm11, %v7257_v46  ;;  %5189 = vmatprep.mubr.msk.bf16.mxu1 %vm2645_vm11, %v7257_v46 }
 0x2a8   : > { %v2540_v18 = vpop.permute.xlu1 %2539 }
 0x2a9   : > { %v7297_v15 = vsel %vm2645_vm11, %v7014_v0, %v2540_v18  ;;  %v7312_v0 = vsel %vm2645_vm11, %v6996_v59, %v2542_v49 }
 0x2ac   : > { %3447 = vmatmul.mubr.bf16.gmra.mrb[72].mxu0 %v7267_v7  ;;  %2958 = vmatmul.mubr.bf16.gmra.mrb[52].mxu1 %v7267_v7  ;;  %v2546_v53 = vpop.permute.xlu0 %2545 }
 0x2ad   : > { %5269 = vmatprep.mubr.msk.bf16.mxu0 %vm2645_vm11, %v7272_v30  ;;  %5190 = vmatprep.mubr.msk.bf16.mxu1 %vm2645_vm11, %v7272_v30 }
 0x2af   : > { %v2544_v58 = vpop.permute.xlu1 %2543 }
 0x2b0   : > { %v7327_v59 = vsel %vm2645_vm11, %v7048_v60, %v2544_v58  ;;  %v7342_v60 = vsel %vm2645_vm11, %v7035_v11, %v2546_v53  ;;  %v2550_v2 = vpop.permute.xlu0 %2549 }
 0x2b4   : > { %3455 = vmatmul.mubr.bf16.gmra.mrb[76].mxu0 %v7282_v34  ;;  %2966 = vmatmul.mubr.bf16.gmra.mrb[56].mxu1 %v7282_v34  ;;  %v2548_v4 = vpop.permute.xlu1 %2547 }
 0x2b5   : > { %5270 = vmatprep.mubr.msk.bf16.mxu0 %vm2645_vm11, %v7287_v26  ;;  %5191 = vmatprep.mubr.msk.bf16.mxu1 %vm2645_vm11, %v7287_v26  ;;  %v7357_v11 = vsel %vm2645_vm11, %v7076_v10, %v2548_v4  ;;  %v7372_v10 = vsel %vm2645_vm11, %v7062_v45, %v2550_v2 }
 0x2b8   : > { %v2552_v35 = vpop.permute.xlu1 %2551 }
 0x2b9   : > { %v2695_v45 = vsel %vm2645_vm11, %v7096_v51, %v2552_v35  ;;  %v2520_v56 = vpop.permute.xlu0 %2519 }
 0x2ba   : > { %v2647_v29 = vsel %vm2645_vm11, %v7102_v19, %v2520_v56 }
 0x2bc   : > { %3463 = vmatmul.mubr.bf16.gmra.mrb[80].mxu0 %v7297_v15  ;;  %2974 = vmatmul.mubr.bf16.gmra.mrb[60].mxu1 %v7297_v15  ;;  %v2554_v43 = vpop.permute.xlu1 %2553 }
 0x2bd   : > { %5271 = vmatprep.mubr.msk.bf16.mxu0 %vm2645_vm11, %v7302_v14  ;;  %5192 = vmatprep.mubr.msk.bf16.mxu1 %vm2645_vm11, %v7302_v14  ;;  %v2698_v27 = vsel %vm2645_vm11, %v7102_v19, %v2554_v43 }
 0x2c4   : > { %3471 = vmatmul.mubr.bf16.gmra.mrb[84].mxu0 %v7312_v0  ;;  %2982 = vmatmul.mubr.bf16.gmra.mrb[64].mxu1 %v7312_v0 }
 0x2c5   : > { %5272 = vmatprep.mubr.msk.bf16.mxu0 %vm2645_vm11, %v7317_v32  ;;  %5193 = vmatprep.mubr.msk.bf16.mxu1 %vm2645_vm11, %v7317_v32 }
 0x2cc   : > { %3479 = vmatmul.mubr.bf16.gmra.mrb[88].mxu0 %v7327_v59  ;;  %2990 = vmatmul.mubr.bf16.gmra.mrb[68].mxu1 %v7327_v59 }
 0x2cd   : > { %5273 = vmatprep.mubr.msk.bf16.mxu0 %vm2645_vm11, %v7332_v3  ;;  %5194 = vmatprep.mubr.msk.bf16.mxu1 %vm2645_vm11, %v7332_v3 }
 0x2d4   : > { %3487 = vmatmul.mubr.bf16.gmra.mrb[92].mxu0 %v7342_v60  ;;  %2998 = vmatmul.mubr.bf16.gmra.mrb[72].mxu1 %v7342_v60 }
 0x2d5   : > { %5274 = vmatprep.mubr.msk.bf16.mxu0 %vm2645_vm11, %v7347_v62  ;;  %5195 = vmatprep.mubr.msk.bf16.mxu1 %vm2645_vm11, %v7347_v62 }
 0x2dc   : > { %3495 = vmatmul.mubr.bf16.gmra.mrb[96].mxu0 %v7357_v11  ;;  %3006 = vmatmul.mubr.bf16.gmra.mrb[76].mxu1 %v7357_v11 }
 0x2dd   : > { %5275 = vmatprep.mubr.msk.bf16.mxu0 %vm2645_vm11, %v7362_v50  ;;  %5196 = vmatprep.mubr.msk.bf16.mxu1 %vm2645_vm11, %v7362_v50 }
 0x2e4   : > { %3503 = vmatmul.mubr.bf16.gmra.mrb[100].mxu0 %v7372_v10  ;;  %3014 = vmatmul.mubr.bf16.gmra.mrb[80].mxu1 %v7372_v10 }
 0x2e5   : > { %5276 = vmatprep.mubr.msk.bf16.mxu0 %vm2645_vm11, %v2641_v37  ;;  %5197 = vmatprep.mubr.msk.bf16.mxu1 %vm2645_vm11, %v2641_v37 }
 0x2ec   : > { %3511 = vmatmul.mubr.bf16.gmra.mrb[104].mxu0 %v2695_v45  ;;  %3022 = vmatmul.mubr.bf16.gmra.mrb[84].mxu1 %v2695_v45 }
 0x2ed   : > { %5210 = vmatprep.mubr.msk.bf16.mxu1 %vm2645_vm11, %v2593_v52  ;;  %5277 = vmatprep.mubr.msk.bf16.mxu0 %vm2645_vm11, %v2593_v52 }
 0x2f4   : > { %3138 = vmatmul.mubr.bf16.vlgmr.msra.gmra.mrb[88].mxu1 %v2647_v29  ;;  %3519 = vmatmul.mubr.bf16.gmra.mrb[108].mxu0 %v2698_v27 }
 0x2f5   : > { %5211 = vmatprep.mubr.msk.bf16.mxu1 %vm2645_vm11, %v6748_v44 }
 0x2fc   : > { %3146 = vmatmul.mubr.bf16.gmra.mrb[92].mxu1 %v7124_v31 }
 0x2fd   : > { %5212 = vmatprep.mubr.msk.bf16.mxu1 %vm2645_vm11, %v6802_v25 }
 0x304   : > { %3154 = vmatmul.mubr.bf16.gmra.mrb[96].mxu1 %v7144_v24 }
 0x305   : > { %5213 = vmatprep.mubr.msk.bf16.mxu1 %vm2645_vm11, %v7150_v39 }
 0x30c   : > { %3162 = vmatmul.mubr.bf16.gmra.mrb[100].mxu1 %v7167_v55 }
 0x30d   : > { %5214 = vmatprep.mubr.msk.bf16.mxu1 %vm2645_vm11, %v7173_v13 }
 0x314   : > { %3170 = vmatmul.mubr.bf16.gmra.mrb[104].mxu1 %v7190_v9 }
 0x315   : > { %5215 = vmatprep.mubr.msk.bf16.mxu1 %vm2645_vm11, %v7196_v33 }
 0x31c   : > { %3178 = vmatmul.mubr.bf16.gmra.mrb[108].mxu1 %v7213_v17 }
 0x31d   : > { %5216 = vmatprep.mubr.msk.bf16.mxu1 %vm2645_vm11, %v7219_v57 }
 0x324   : > { %3186 = vmatmul.mubr.bf16.gmra.mrb[112].mxu1 %v7236_v6 }
 0x325   : > { %5217 = vmatprep.mubr.msk.bf16.mxu1 %vm2645_vm11, %v7242_v20 }
 0x32c   : > { %3194 = vmatmul.mubr.bf16.gmra.mrb[116].mxu1 %v7252_v8 }
 0x32d   : > { %5218 = vmatprep.mubr.msk.bf16.mxu1 %vm2645_vm11, %v7257_v46 }
 0x334   : > { %3202 = vmatmul.mubr.bf16.gmra.mrb[120].mxu1 %v7267_v7 }
 0x335   : > { %5219 = vmatprep.mubr.msk.bf16.mxu1 %vm2645_vm11, %v7272_v30 }
 0x33c   : > { %3210 = vmatmul.mubr.bf16.gmra.mrb[124].mxu1 %v7282_v34 }
 0x33d   : > { %5220 = vmatprep.mubr.msk.bf16.mxu1 %vm2645_vm11, %v7287_v26 }
 0x343   : > { %v7420_v44 = vpop.f32.mrb[24].mxu1 }
 0x344   : > { %3218 = vmatmul.mubr.bf16.gmra.mrb[128].mxu1 %v7297_v15  ;;  %v2905_v25 = vpop.f32.mrb[25].mxu1 }
 0x345   : > { %5221 = vmatprep.mubr.msk.bf16.mxu1 %vm2645_vm11, %v7302_v14  ;;  %v7424_v51 = vpop.f32.mrb[26].mxu1 }
 0x346   : > { %v2908_v19 = vpop.f32.mrb[27].mxu1 }
 0x34c   : > { %3226 = vmatmul.mubr.bf16.gmra.mrb[132].mxu1 %v7312_v0 }
 0x34d   : > { %5222 = vmatprep.mubr.msk.bf16.mxu1 %vm2645_vm11, %v7317_v32 }
 0x34f   : > { %v7429_v31 = vpop.f32.mrb[48].mxu0  ;;  %v7431_v24 = vpop.f32.mrb[28].mxu1 }
 0x350   : > { %v3402_v39 = vpop.f32.mrb[49].mxu0  ;;  %v2913_v55 = vpop.f32.mrb[29].mxu1 }
 0x351   : > { %v7433_v13 = vpop.f32.mrb[50].mxu0  ;;  %v7435_v9 = vpop.f32.mrb[30].mxu1 }
 0x352   : > { %v3405_v33 = vpop.f32.mrb[51].mxu0  ;;  %v2916_v17 = vpop.f32.mrb[31].mxu1 }
 0x354   : > { %3234 = vmatmul.mubr.bf16.gmra.mrb[136].mxu1 %v7327_v59 }
 0x355   : > { %5223 = vmatprep.mubr.msk.bf16.mxu1 %vm2645_vm11, %v7332_v3 }
 0x357   : > { %v7440_v57 = vpop.f32.mrb[52].mxu0  ;;  %v7442_v6 = vpop.f32.mrb[32].mxu1 }
 0x358   : > { %v3410_v20 = vpop.f32.mrb[53].mxu0  ;;  %v2921_v8 = vpop.f32.mrb[33].mxu1 }
 0x359   : > { %v7444_v46 = vpop.f32.mrb[54].mxu0  ;;  %v7446_v28 = vpop.f32.mrb[34].mxu1 }
 0x35a   : > { %v3413_v7 = vpop.f32.mrb[55].mxu0  ;;  %v2924_v30 = vpop.f32.mrb[35].mxu1 }
 0x35c   : > { %3242 = vmatmul.mubr.bf16.gmra.mrb[140].mxu1 %v7342_v60 }
 0x35d   : > { %5224 = vmatprep.mubr.msk.bf16.mxu1 %vm2645_vm11, %v7347_v62 }
 0x35f   : > { %v7451_v48 = vpop.f32.mrb[56].mxu0  ;;  %v7453_v42 = vpop.f32.mrb[36].mxu1 }
 0x360   : > { %v3418_v63 = vpop.f32.mrb[57].mxu0  ;;  %v2929_v34 = vpop.f32.mrb[37].mxu1 }
 0x361   : > { %v7455_v26 = vpop.f32.mrb[58].mxu0  ;;  %v7457_v18 = vpop.f32.mrb[38].mxu1 }
 0x362   : > { %v3421_v21 = vpop.f32.mrb[59].mxu0  ;;  %v2932_v41 = vpop.f32.mrb[39].mxu1 }
 0x364   : > { %3250 = vmatmul.mubr.bf16.gmra.mrb[144].mxu1 %v7357_v11 }
 0x365   : > { %5225 = vmatprep.mubr.msk.bf16.mxu1 %vm2645_vm11, %v7362_v50 }
 0x367   : > { %v7462_v15 = vpop.f32.mrb[60].mxu0  ;;  %v7464_v14 = vpop.f32.mrb[40].mxu1 }
 0x368   : > { %v3426_v49 = vpop.f32.mrb[61].mxu0  ;;  %v2937_v36 = vpop.f32.mrb[41].mxu1 }
 0x369   : > { %v7466_v61 = vpop.f32.mrb[62].mxu0  ;;  %v7468_v0 = vpop.f32.mrb[42].mxu1 }
 0x36a   : > { %v3429_v32 = vpop.f32.mrb[63].mxu0  ;;  %v2940_v58 = vpop.f32.mrb[43].mxu1 }
 0x36c   : > { %3258 = vmatmul.mubr.bf16.gmra.mrb[148].mxu1 %v7372_v10 }
 0x36f   : > { %v7471_v5 = vpop.f32.mrb[64].mxu0  ;;  %v7473_v38 = vpop.f32.mrb[44].mxu1 }
 0x370   : > { %v3434_v59 = vpop.f32.mrb[65].mxu0  ;;  %v2945_v3 = vpop.f32.mrb[45].mxu1 }
 0x371   : > { %v7475_v53 = vpop.f32.mrb[66].mxu0  ;;  %v7477_v16 = vpop.f32.mrb[46].mxu1 }
 0x372   : > { %v3437_v22 = vpop.f32.mrb[67].mxu0  ;;  %v2948_v60 = vpop.f32.mrb[47].mxu1 }
 0x377   : > { %v7479_v62 = vpop.f32.mrb[68].mxu0  ;;  %v7481_v4 = vpop.f32.mrb[48].mxu1 }
 0x378   : > { %v3442_v54 = vpop.f32.mrb[69].mxu0  ;;  %v2953_v1 = vpop.f32.mrb[49].mxu1 }
 0x379   : > { %v7483_v11 = vpop.f32.mrb[70].mxu0  ;;  %v7485_v50 = vpop.f32.mrb[50].mxu1 }
 0x37a   : > { %v3445_v2 = vpop.f32.mrb[71].mxu0  ;;  %v2956_v23 = vpop.f32.mrb[51].mxu1 }
 0x37f   : > { %v7487_v47 = vpop.f32.mrb[72].mxu0  ;;  %v7489_v10 = vpop.f32.mrb[52].mxu1 }
 0x380   : > { %v3450_v37 = vpop.f32.mrb[73].mxu0  ;;  %v2961_v40 = vpop.f32.mrb[53].mxu1 }
 0x381   : > { %v7491_v12 = vpop.f32.mrb[74].mxu0  ;;  %v7493_v35 = vpop.f32.mrb[54].mxu1 }
 0x382   : > { %v3453_v52 = vpop.f32.mrb[75].mxu0  ;;  %v2964_v45 = vpop.f32.mrb[55].mxu1 }
 0x387   : > { %v7495_v56 = vpop.f32.mrb[76].mxu0  ;;  %v7497_v43 = vpop.f32.mrb[56].mxu1 }
 0x388   : > { %v3458_v29 = vpop.f32.mrb[77].mxu0  ;;  %v2969_v27 = vpop.f32.mrb[57].mxu1 }
 0x389   : > { %v7499_v25 = vpop.f32.mrb[78].mxu0  ;;  %v7501_v19 = vpop.f32.mrb[58].mxu1 }
 0x38a   : > { %v3461_v39 = vpop.f32.mrb[79].mxu0  ;;  %v2972_v55 = vpop.f32.mrb[59].mxu1 }
 0x38f   : > { %v7503_v33 = vpop.f32.mrb[80].mxu0  ;;  %v7505_v17 = vpop.f32.mrb[60].mxu1 }
 0x390   : > { %v3466_v20 = vpop.f32.mrb[81].mxu0  ;;  %v2977_v8 = vpop.f32.mrb[61].mxu1 }
 0x391   : > { %v7507_v7 = vpop.f32.mrb[82].mxu0  ;;  %v7509_v30 = vpop.f32.mrb[62].mxu1 }
 0x392   : > { %v3469_v63 = vpop.f32.mrb[83].mxu0  ;;  %v2980_v34 = vpop.f32.mrb[63].mxu1 }
 0x397   : > { %v7511_v21 = vpop.f32.mrb[84].mxu0  ;;  %v7513_v41 = vpop.f32.mrb[64].mxu1 }
 0x398   : > { %8098 = vst [vmem:[#allocation8_spill] sm:$0xff] %v7513_v41  ;;  %v3474_v49 = vpop.f32.mrb[85].mxu0  ;;  %v2985_v36 = vpop.f32.mrb[65].mxu1 }
 0x399   : > { %v7515_v32 = vpop.f32.mrb[86].mxu0  ;;  %v7517_v58 = vpop.f32.mrb[66].mxu1 }
 0x39a   : > { %8099 = vst [vmem:[#allocation9_spill] sm:$0xff] %v7515_v32  ;;  %8100 = vst [vmem:[#allocation10_spill] sm:$0xff] %v7517_v58  ;;  %v3477_v59 = vpop.f32.mrb[87].mxu0  ;;  %v2988_v3 = vpop.f32.mrb[67].mxu1 }
 0x39f   : > { %v7519_v22 = vpop.f32.mrb[88].mxu0  ;;  %v7521_v60 = vpop.f32.mrb[68].mxu1 }
 0x3a0   : > { %8101 = vst [vmem:[#allocation11_spill] sm:$0xff] %v7519_v22  ;;  %8102 = vst [vmem:[#allocation12_spill] sm:$0xff] %v7521_v60  ;;  %v3482_v54 = vpop.f32.mrb[89].mxu0  ;;  %v2993_v1 = vpop.f32.mrb[69].mxu1 }
 0x3a1   : > { %v7523_v2 = vpop.f32.mrb[90].mxu0  ;;  %v7525_v23 = vpop.f32.mrb[70].mxu1 }
 0x3a2   : > { %8103 = vst [vmem:[#allocation13_spill] sm:$0xff] %v7523_v2  ;;  %8104 = vst [vmem:[#allocation14_spill] sm:$0xff] %v7525_v23  ;;  %v3485_v37 = vpop.f32.mrb[91].mxu0  ;;  %v2996_v40 = vpop.f32.mrb[71].mxu1 }
 0x3a7   : > { %v7527_v52 = vpop.f32.mrb[92].mxu0  ;;  %v7529_v45 = vpop.f32.mrb[72].mxu1 }
 0x3a8   : > { %8105 = vst [vmem:[#allocation15_spill] sm:$0xff] %v7527_v52  ;;  %8106 = vst [vmem:[#allocation16_spill] sm:$0xff] %v7529_v45  ;;  %v3490_v29 = vpop.f32.mrb[93].mxu0  ;;  %v3001_v27 = vpop.f32.mrb[73].mxu1 }
 0x3a9   : > { %v7531_v39 = vpop.f32.mrb[94].mxu0  ;;  %v7533_v55 = vpop.f32.mrb[74].mxu1 }
 0x3aa   : > { %8107 = vst [vmem:[#allocation17_spill] sm:$0xff] %v7531_v39  ;;  %8108 = vst [vmem:[#allocation18_spill] sm:$0xff] %v7533_v55  ;;  %v3493_v20 = vpop.f32.mrb[95].mxu0  ;;  %v3004_v8 = vpop.f32.mrb[75].mxu1 }
 0x3af   : > { %v7535_v63 = vpop.f32.mrb[96].mxu0  ;;  %v7537_v34 = vpop.f32.mrb[76].mxu1 }
 0x3b0   : > { %8109 = vst [vmem:[#allocation19_spill] sm:$0xff] %v7535_v63  ;;  %8110 = vst [vmem:[#allocation20_spill] sm:$0xff] %v7537_v34  ;;  %v3498_v49 = vpop.f32.mrb[97].mxu0  ;;  %v3009_v36 = vpop.f32.mrb[77].mxu1 }
 0x3b1   : > { %v7539_v59 = vpop.f32.mrb[98].mxu0  ;;  %v7541_v3 = vpop.f32.mrb[78].mxu1 }
 0x3b2   : > { %8111 = vst [vmem:[#allocation21_spill] sm:$0xff] %v7539_v59  ;;  %8112 = vst [vmem:[#allocation22_spill] sm:$0xff] %v7541_v3  ;;  %v3501_v54 = vpop.f32.mrb[99].mxu0  ;;  %v3012_v1 = vpop.f32.mrb[79].mxu1 }
 0x3b7   : > { %v7543_v37 = vpop.f32.mrb[100].mxu0  ;;  %v7545_v40 = vpop.f32.mrb[80].mxu1 }
 0x3b8   : > { %8113 = vst [vmem:[#allocation23_spill] sm:$0xff] %v7543_v37  ;;  %8114 = vst [vmem:[#allocation24_spill] sm:$0xff] %v7545_v40  ;;  %v3506_v29 = vpop.f32.mrb[101].mxu0  ;;  %v3017_v27 = vpop.f32.mrb[81].mxu1 }
 0x3b9   : > { %v7547_v20 = vpop.f32.mrb[102].mxu0  ;;  %v7549_v8 = vpop.f32.mrb[82].mxu1 }
 0x3ba   : > { %8115 = vst [vmem:[#allocation25_spill] sm:$0xff] %v7547_v20  ;;  %8116 = vst [vmem:[#allocation26_spill] sm:$0xff] %v7549_v8  ;;  %v3509_v63 = vpop.f32.mrb[103].mxu0  ;;  %v3020_v34 = vpop.f32.mrb[83].mxu1 }
 0x3bf   : > { %v7551_v49 = vpop.f32.mrb[104].mxu0  ;;  %v7553_v36 = vpop.f32.mrb[84].mxu1 }
 0x3c0   : > { %8117 = vst [vmem:[#allocation27_spill] sm:$0xff] %v7551_v49  ;;  %8118 = vst [vmem:[#allocation28_spill] sm:$0xff] %v7553_v36  ;;  %v3514_v59 = vpop.f32.mrb[105].mxu0  ;;  %v3025_v3 = vpop.f32.mrb[85].mxu1 }
 0x3c1   : > { %v7555_v54 = vpop.f32.mrb[106].mxu0  ;;  %v7557_v1 = vpop.f32.mrb[86].mxu1  ;;  %v7566_v59 = vld [vmem:[%s8091_s5] ss:$0 sm:$0xff] }
 0x3c2   : > { %8119 = vst [vmem:[#allocation29_spill] sm:$0xff] %v7555_v54  ;;  %8120 = vst [vmem:[#allocation30_spill] sm:$0xff] %v7557_v1  ;;  %v3517_v37 = vpop.f32.mrb[107].mxu0  ;;  %v3028_v40 = vpop.f32.mrb[87].mxu1  ;;  %v3698_v1 = vlaneseq }
 0x3c3   : > { %v5904_v37 = vmov 1983009808  }
 0x3c4   : > { %v3696_v40 = vunpack.c.l.s4 %v5904_v37 }
 0x3c7   : > { %v3139_v29 = vpop.f32.mrb[88].mxu1 }
 0x3c8   : > { %v3140_v27 = vadd.f32 %v3139_v29, %v7420_v44  ;;  %v3141_v20 = vpop.f32.mrb[89].mxu1 }
 0x3c9   : > { %v3142_v39 = vpop.f32.mrb[90].mxu1 }
 0x3ca   : > { %v3527_v63 = vadd.f32 %v7429_v31, %v3140_v27  ;;  %v3143_v34 = vadd.f32 %v3142_v39, %v7424_v51  ;;  %v3144_v8 = vpop.f32.mrb[91].mxu1  ;;  %v3697_v27 = vunpack.c.0.s8 %v3696_v40 }
 0x3cc   : > { %v3528_v36 = vadd.f32 %v7433_v13, %v3143_v34  ;;  %v3566_v44 = vadd.f32 %v7566_v59, %v3527_v63  ;;  %v3699_v34 = vshrl.u32 %v3698_v1, 7 }
 0x3ce   : > { %v3567_v51 = vadd.f32 %v7566_v59, %v3528_v36  ;;  %v3598_v54 = vmax.f32 %v3566_v44, 0.0 }
 0x3cf   : > { %v3147_v3 = vpop.f32.mrb[92].mxu1 }
 0x3d0   : > { %v3148_v20 = vadd.f32 %v3147_v3, %v7431_v24  ;;  %v3149_v29 = vpop.f32.mrb[93].mxu1  ;;  %v3599_v55 = vmax.f32 %v3567_v51, 0.0  ;;  %v7576_v3 = vsub.s32 %v3697_v27, %v3699_v34  ;;  %v3630_v36 = vsel %vm2645_vm11, %v3598_v54, -inf }
 0x3d1   : > { %v3150_v31 = vpop.f32.mrb[94].mxu1 }
 0x3d2   : > { %v3529_v39 = vadd.f32 %v7440_v57, %v3148_v20  ;;  %v3151_v13 = vadd.f32 %v3150_v31, %v7435_v9  ;;  %v3152_v8 = vpop.f32.mrb[95].mxu1 }
 0x3d4   : > { %v3568_v49 = vadd.f32 %v7566_v59, %v3529_v39  ;;  %v3530_v37 = vadd.f32 %v7444_v46, %v3151_v13  ;;  %v3633_v46 = vsel %vm2645_vm11, %v3599_v55, -inf }
 0x3d6   : > { %v3600_v63 = vmax.f32 %v3568_v49, 0.0  ;;  %v3569_v24 = vadd.f32 %v7566_v59, %v3530_v37 }
 0x3d7   : > { %v3155_v29 = vpop.f32.mrb[96].mxu1 }
 0x3d8   : > { %v3631_v57 = vsel %vm2645_vm11, %v3600_v63, -inf  ;;  %v3601_v9 = vmax.f32 %v3569_v24, 0.0  ;;  %v3156_v40 = vadd.f32 %v3155_v29, %v7442_v6  ;;  %v3157_v1 = vpop.f32.mrb[97].mxu1 }
 0x3d9   : > { %v3632_v44 = vmax.f32 %v3630_v36, %v3631_v57  ;;  %v3158_v20 = vpop.f32.mrb[98].mxu1 }
 0x3da   : > { %v3634_v49 = vsel %vm2645_vm11, %v3601_v9, -inf  ;;  %v3531_v31 = vadd.f32 %v7451_v48, %v3156_v40  ;;  %v3159_v51 = vadd.f32 %v3158_v20, %v7446_v28  ;;  %v3160_v39 = vpop.f32.mrb[99].mxu1 }
 0x3db   : > { %v3694_v13 = vcombine.high %v3632_v44, %v3632_v44  ;;  %v3701_v54 = vrot.slane %v3632_v44, %v7576_v3  ;;  %v3635_v8 = vmax.f32 %v3633_v46, %v3634_v49 }
 0x3dc   : > { %v7587_v27 = vadd.f32 %v7566_v59, %v3531_v31  ;;  %v7590_v6 = vadd.f32 %v7455_v26, %v3159_v51 }
 0x3dd   : > { %v3708_v34 = vrot.slane %v3694_v13, %v7576_v3  ;;  %v3709_v55 = vcombine.high %v3701_v54, %v3701_v54  ;;  %v4031_v37 = vsel %vm4030_vm12, %v3701_v54, -inf  ;;  %v3711_v63 = vcombine.high %v3635_v8, %v3635_v8 }
 0x3de   : > { %v4032_v48 = vrot.slane %v4031_v37, 4  ;;  %v3718_v28 = vrot.slane %v3635_v8, %v7576_v3 }
 0x3df   : > { %v3710_v29 = vcombine.high %v3708_v34, %v3708_v34  ;;  %v4038_v36 = vsel %vm4030_vm12, %v3709_v55, -inf  ;;  %v4045_v57 = vsel %vm4030_vm12, %v3708_v34, -inf  ;;  %v3725_v9 = vrot.slane %v3711_v63, %v7576_v3  ;;  %v7599_v26 = vpop.f32.mrb[100].mxu1 }
 0x3e0   : > { %v4033_v40 = vmax.f32 %v4031_v37, %v4032_v48  ;;  %v4039_v1 = vrot.slane %v4038_v36, 4  ;;  %v4046_v44 = vrot.slane %v4045_v57, 4  ;;  %v3726_v20 = vcombine.high %v3718_v28, %v3718_v28  ;;  %v3165_v46 = vpop.f32.mrb[101].mxu1 }
 0x3e1   : > { %v4052_v49 = vsel %vm4030_vm12, %v3710_v29, -inf  ;;  %v3727_v31 = vcombine.high %v3725_v9, %v3725_v9  ;;  %v4059_v51 = vsel %vm4030_vm12, %v3718_v28, -inf  ;;  %v4073_v39 = vsel %vm4030_vm12, %v3725_v9, -inf  ;;  %v7604_v13 = vpop.f32.mrb[102].mxu1 }
 0x3e2   : > { %v4034_v54 = vrot.slane %v4033_v40, 2  ;;  %v4040_v8 = vmax.f32 %v4038_v36, %v4039_v1  ;;  %v4047_v34 = vmax.f32 %v4045_v57, %v4046_v44  ;;  %v4053_v55 = vrot.slane %v4052_v49, 4  ;;  %v3168_v63 = vpop.f32.mrb[103].mxu1 }
 0x3e3   : > { %v4060_v24 = vrot.slane %v4059_v51, 4  ;;  %v4066_v37 = vsel %vm4030_vm12, %v3726_v20, -inf  ;;  %v4074_v48 = vrot.slane %v4073_v39, 4  ;;  %v4080_v46 = vsel %vm4030_vm12, %v3727_v31, -inf }
 0x3e4   : > { %v4035_v45 = vmax.f32 %v4033_v40, %v4034_v54  ;;  %v4041_v29 = vrot.slane %v4040_v8, 2  ;;  %v4048_v23 = vrot.slane %v4047_v34, 2  ;;  %v4054_v52 = vmax.f32 %v4052_v49, %v4053_v55 }
 0x3e5   : > { %v4061_v28 = vmax.f32 %v4059_v51, %v4060_v24  ;;  %v4067_v9 = vrot.slane %v4066_v37, 4  ;;  %v4075_v2 = vmax.f32 %v4073_v39, %v4074_v48  ;;  %v4081_v60 = vrot.slane %v4080_v46, 4 }
 0x3e6   : > { %v4036_v58 = vrot.slane %v4035_v45, 1  ;;  %v4042_v36 = vmax.f32 %v4040_v8, %v4041_v29  ;;  %v4049_v57 = vmax.f32 %v4047_v34, %v4048_v23  ;;  %v4055_v1 = vrot.slane %v4054_v52, 2 }
 0x3e7   : > { %v4062_v44 = vrot.slane %v4061_v28, 2  ;;  %v4068_v63 = vmax.f32 %v4066_v37, %v4067_v9  ;;  %v4076_v20 = vrot.slane %v4075_v2, 2  ;;  %v4082_v22 = vmax.f32 %v4080_v46, %v4081_v60  ;;  %v3171_v31 = vpop.f32.mrb[104].mxu1 }
 0x3e8   : > { %v4037_v40 = vmax.f32 %v4035_v45, %v4036_v58  ;;  %v4043_v54 = vrot.slane %v4042_v36, 1  ;;  %v4050_v41 = vrot.slane %v4049_v57, 1  ;;  %v4056_v49 = vmax.f32 %v4054_v52, %v4055_v1  ;;  %v3173_v24 = vpop.f32.mrb[105].mxu1 }
 0x3e9   : > { %v4063_v51 = vmax.f32 %v4061_v28, %v4062_v44  ;;  %v4069_v39 = vrot.slane %v4068_v63, 2  ;;  %v4077_v55 = vmax.f32 %v4075_v2, %v4076_v20  ;;  %v4083_v48 = vrot.slane %v4082_v22, 2  ;;  %v3174_v8 = vpop.f32.mrb[106].mxu1 }
 0x3ea   : > { %v4044_v23 = vmax.f32 %v4042_v36, %v4043_v54  ;;  %v4051_v34 = vmax.f32 %v4049_v57, %v4050_v41  ;;  %v4057_v29 = vrot.slane %v4056_v49, 1  ;;  %v5383_v32 = vpack.c.bf16 %v4037_v40, %v4037_v40  ;;  %v3176_v37 = vpop.f32.mrb[107].mxu1 }
 0x3eb   : > { %v4064_v60 = vrot.slane %v4063_v51, 1  ;;  %v4070_v46 = vmax.f32 %v4068_v63, %v4069_v39  ;;  %v4078_v9 = vrot.slane %v4077_v55, 1  ;;  %v4084_v58 = vmax.f32 %v4082_v22, %v4083_v48 }
 0x3ec   : > { %v4058_v45 = vmax.f32 %v4056_v49, %v4057_v29  ;;  %v5384_v52 = vpack.c.bf16 %v4044_v23, %v4044_v23  ;;  %v5385_v1 = vpack.c.bf16 %v4051_v34, %v4051_v34  ;;  %v3571_v2 = vadd.f32 %v7566_v59, %v7590_v6 }
 0x3ed   : > { %v4065_v28 = vmax.f32 %v4063_v51, %v4064_v60  ;;  %v4071_v44 = vrot.slane %v4070_v46, 1  ;;  %v4079_v36 = vmax.f32 %v4077_v55, %v4078_v9  ;;  %v4085_v41 = vrot.slane %v4084_v58, 1 }
 0x3ee   : > { %v5386_v57 = vpack.c.bf16 %v4058_v45, %v4058_v45  ;;  %v4735_v20 = vunpack.c.l.b16 %v5383_v32  ;;  %v4736_v40 = vunpack.c.l.b16 %v5384_v52  ;;  %v4737_v54 = vunpack.c.l.b16 %v5385_v1 }
 0x3ef   : > { %v4072_v24 = vmax.f32 %v4070_v46, %v4071_v44  ;;  %v4086_v63 = vmax.f32 %v4084_v58, %v4085_v41  ;;  %v5387_v39 = vpack.c.bf16 %v4065_v28, %v4065_v28  ;;  %v5389_v22 = vpack.c.bf16 %v4079_v36, %v4079_v36  ;;  %v3179_v48 = vpop.f32.mrb[108].mxu1 }
 0x3f0   : > { %v4738_v49 = vunpack.c.l.b16 %v5386_v57  ;;  %v4800_v23 = vsel %vm4799_vm13, %v4736_v40, %v4735_v20  ;;  %v3603_v34 = vmax.f32 %v3571_v2, 0.0  ;;  %v3164_v6 = vadd.f32 %v7599_v26, %v7453_v42  ;;  %v3181_v51 = vpop.f32.mrb[109].mxu1 }
 0x3f1   : > { %v4802_v55 = vsel %vm4801_vm14, %v4737_v54, %v4800_v23  ;;  %v5388_v29 = vpack.c.bf16 %v4072_v24, %v4072_v24  ;;  %v5390_v32 = vpack.c.bf16 %v4086_v63, %v4086_v63  ;;  %v4739_v37 = vunpack.c.l.b16 %v5387_v39  ;;  %v3182_v60 = vpop.f32.mrb[110].mxu1 }
 0x3f2   : > { %v4741_v46 = vunpack.c.l.b16 %v5389_v22  ;;  %v4804_v9 = vsel %vm4803_vm15, %v4738_v49, %v4802_v55  ;;  %v8121_v58 = vmax.f32 %v7587_v27, 0.0  ;;  %v3533_v52 = vadd.f32 %v7462_v15, %v3164_v6  ;;  %v3184_v1 = vpop.f32.mrb[111].mxu1 }
 0x3f3   : > { %v4740_v2 = vunpack.c.l.b16 %v5388_v29  ;;  %v4806_v42 = vsel %vm4805_vm0, %v4739_v37, %v4804_v9  ;;  %v3639_v26 = vsel %vm2645_vm11, %v3603_v34, -inf  ;;  %v3167_v28 = vadd.f32 %v7604_v13, %v7457_v18 }
 0x3f4   : > { %v3636_v45 = vsel %vm2645_vm11, %v8121_v58, -inf  ;;  %v3572_v44 = vadd.f32 %v7566_v59, %v3533_v52  ;;  %v3172_v36 = vadd.f32 %v3171_v31, %v7464_v14  ;;  %v3175_v27 = vadd.f32 %v3174_v8, %v7468_v0 }
 0x3f5   : > { %v3180_v41 = vadd.f32 %v3179_v48, %v7473_v38  ;;  %v4742_v57 = vunpack.c.l.b16 %v5390_v32  ;;  %v4808_v15 = vsel %vm4807_vm1, %v4740_v2, %v4806_v42  ;;  %v3534_v20 = vadd.f32 %v7466_v61, %v3167_v28 }
 0x3f6   : > { %v3183_v40 = vadd.f32 %v3182_v60, %v7477_v16  ;;  %v4810_v54 = vsel %vm4809_vm2, %v4741_v46, %v4808_v15  ;;  %v3604_v24 = vmax.f32 %v3572_v44, 0.0  ;;  %v3535_v18 = vadd.f32 %v7471_v5, %v3172_v36 }
 0x3f7   : > { %v3536_v13 = vadd.f32 %v7475_v53, %v3175_v27  ;;  %v4812_v14 = vsel %vm4811_vm3, %v4742_v57, %v4810_v54  ;;  %v3573_v0 = vadd.f32 %v7566_v59, %v3534_v20  ;;  %v3537_v38 = vadd.f32 %v7479_v62, %v3180_v41  ;;  %v3187_v8 = vpop.f32.mrb[112].mxu1 }
 0x3f8   : > { %v3538_v31 = vadd.f32 %v7483_v11, %v3183_v40  ;;  %v4862_v63 = vpack.c.b16 %v4812_v14, %v4812_v14  ;;  %v3637_v61 = vsel %vm2645_vm11, %v3604_v24, -inf  ;;  %v3574_v16 = vadd.f32 %v7566_v59, %v3535_v18  ;;  %v3189_v22 = vpop.f32.mrb[113].mxu1 }
 0x3f9   : > { %v3575_v39 = vadd.f32 %v7566_v59, %v3536_v13  ;;  %v3638_v5 = vmax.f32 %v3636_v45, %v3637_v61  ;;  %v3605_v48 = vmax.f32 %v3573_v0, 0.0  ;;  %v3576_v53 = vadd.f32 %v7566_v59, %v3537_v38  ;;  %v3190_v23 = vpop.f32.mrb[114].mxu1 }
 0x3fa   : > { %v3577_v49 = vadd.f32 %v7566_v59, %v3538_v31  ;;  %4878 = vst.msk [vmem:[%s7643_s20] sm:$0xf] %vm1970_vm10, %v4862_v63  ;;  %v3606_v62 = vmax.f32 %v3574_v16, 0.0  ;;  %v7648_v34 = vadd.f32 %v3187_v8, %v7481_v4  ;;  %v7651_v6 = vadd.f32 %v3190_v23, %v7485_v50  ;;  %v3192_v51 = vpop.f32.mrb[115].mxu1 }
 0x3fb   : > { %v3607_v11 = vmax.f32 %v3575_v39, 0.0  ;;  %v3728_v55 = vcombine.high %v3638_v5, %v3638_v5  ;;  %v3735_v29 = vrot.slane %v3638_v5, %v7576_v3  ;;  %v3640_v32 = vsel %vm2645_vm11, %v3605_v48, -inf }
 0x3fc   : > { %v3608_v37 = vmax.f32 %v3576_v53, 0.0  ;;  %v3641_v60 = vmax.f32 %v3639_v26, %v3640_v32  ;;  %v3642_v46 = vsel %vm2645_vm11, %v3606_v62, -inf  ;;  %v3609_v58 = vmax.f32 %v3577_v49, 0.0 }
 0x3fd   : > { %v7657_v9 = vsel %vm2645_vm11, %v3607_v11, -inf  ;;  %v3742_v4 = vrot.slane %v3728_v55, %v7576_v3  ;;  %v3743_v45 = vcombine.high %v3735_v29, %v3735_v29  ;;  %v4087_v50 = vsel %vm4030_vm12, %v3735_v29, -inf }
 0x3fe   : > { %v3643_v52 = vsel %vm2645_vm11, %v3608_v37, -inf  ;;  %v4088_v1 = vrot.slane %v4087_v50, 4  ;;  %v3745_v2 = vcombine.high %v3641_v60, %v3641_v60  ;;  %v3752_v42 = vrot.slane %v3641_v60, %v7576_v3 }
 0x3ff   : > { %v7663_v28 = vmax.f32 %v3642_v46, %v3643_v52  ;;  %v3744_v26 = vcombine.high %v3742_v4, %v3742_v4  ;;  %v4094_v44 = vsel %vm4030_vm12, %v3743_v45, -inf  ;;  %v4101_v36 = vsel %vm4030_vm12, %v3742_v4, -inf  ;;  %v7670_v41 = vpop.f32.mrb[116].mxu1 }
 0x400   : > { %v7668_v27 = vsel %vm2645_vm11, %v3609_v58, -inf  ;;  %v4089_v57 = vmax.f32 %v4087_v50, %v4088_v1  ;;  %v4095_v15 = vrot.slane %v4094_v44, 4  ;;  %v4102_v20 = vrot.slane %v4101_v36, 4  ;;  %v3197_v54 = vpop.f32.mrb[117].mxu1 }
 0x401   : > { %v3759_v40 = vrot.slane %v3745_v2, %v7576_v3  ;;  %v4108_v24 = vsel %vm4030_vm12, %v3744_v26, -inf  ;;  %v3760_v18 = vcombine.high %v3752_v42, %v3752_v42  ;;  %v4115_v13 = vsel %vm4030_vm12, %v3752_v42, -inf  ;;  %v7677_v0 = vpop.f32.mrb[118].mxu1 }
 0x402   : > { %v3762_v14 = vcombine.high %v7663_v28, %v7663_v28  ;;  %v4090_v38 = vrot.slane %v4089_v57, 2  ;;  %v4096_v31 = vmax.f32 %v4094_v44, %v4095_v15  ;;  %v4103_v8 = vmax.f32 %v4101_v36, %v4102_v20  ;;  %v3200_v61 = vpop.f32.mrb[119].mxu1 }
 0x403   : > { %v4109_v63 = vrot.slane %v4108_v24, 4  ;;  %v3761_v16 = vcombine.high %v3759_v40, %v3759_v40  ;;  %v4116_v39 = vrot.slane %v4115_v13, 4  ;;  %v4122_v22 = vsel %vm4030_vm12, %v3760_v18, -inf }
 0x404   : > { %v4129_v5 = vsel %vm4030_vm12, %v3759_v40, -inf  ;;  %v4091_v48 = vmax.f32 %v4089_v57, %v4090_v38  ;;  %v4097_v53 = vrot.slane %v4096_v31, 2  ;;  %v4104_v49 = vrot.slane %v4103_v8, 2 }
 0x405   : > { %v4110_v23 = vmax.f32 %v4108_v24, %v4109_v63  ;;  %v4117_v62 = vmax.f32 %v4115_v13, %v4116_v39  ;;  %v4123_v11 = vrot.slane %v4122_v22, 4  ;;  %v4130_v51 = vrot.slane %v4129_v5, 4 }
 0x406   : > { %v4136_v55 = vsel %vm4030_vm12, %v3761_v16, -inf  ;;  %v4092_v29 = vrot.slane %v4091_v48, 1  ;;  %v4098_v32 = vmax.f32 %v4096_v31, %v4097_v53  ;;  %v4105_v37 = vmax.f32 %v4103_v8, %v4104_v49 }
 0x407   : > { %v4111_v60 = vrot.slane %v4110_v23, 2  ;;  %v4118_v46 = vrot.slane %v4117_v62, 2  ;;  %v4124_v58 = vmax.f32 %v4122_v22, %v4123_v11  ;;  %v4131_v4 = vmax.f32 %v4129_v5, %v4130_v51  ;;  %v7682_v50 = vpop.f32.mrb[120].mxu1 }
 0x408   : > { %v4137_v45 = vrot.slane %v4136_v55, 4  ;;  %v4093_v52 = vmax.f32 %v4091_v48, %v4092_v29  ;;  %v4099_v1 = vrot.slane %v4098_v32, 1  ;;  %v4106_v2 = vrot.slane %v4105_v37, 1  ;;  %v3205_v26 = vpop.f32.mrb[121].mxu1 }
 0x409   : > { %v4112_v42 = vmax.f32 %v4110_v23, %v4111_v60  ;;  %v4119_v44 = vmax.f32 %v4117_v62, %v4118_v46  ;;  %v4125_v36 = vrot.slane %v4124_v58, 2  ;;  %v4132_v57 = vrot.slane %v4131_v4, 2  ;;  %v7684_v20 = vpop.f32.mrb[122].mxu1 }
 0x40a   : > { %v4138_v15 = vmax.f32 %v4136_v55, %v4137_v45  ;;  %v4100_v40 = vmax.f32 %v4098_v32, %v4099_v1  ;;  %v4107_v54 = vmax.f32 %v4105_v37, %v4106_v2  ;;  %v5391_v18 = vpack.c.bf16 %v4093_v52, %v4093_v52  ;;  %v3208_v13 = vpop.f32.mrb[123].mxu1 }
 0x40b   : > { %v4113_v24 = vrot.slane %v4112_v42, 1  ;;  %v4120_v38 = vrot.slane %v4119_v44, 1  ;;  %v4126_v31 = vmax.f32 %v4124_v58, %v4125_v36  ;;  %v4133_v8 = vmax.f32 %v4131_v4, %v4132_v57 }
 0x40c   : > { %v4139_v63 = vrot.slane %v4138_v15, 2  ;;  %v5392_v16 = vpack.c.bf16 %v4100_v40, %v4100_v40  ;;  %v5393_v39 = vpack.c.bf16 %v4107_v54, %v4107_v54  ;;  %v4743_v22 = vunpack.c.l.b16 %v5391_v18 }
 0x40d   : > { %v4114_v61 = vmax.f32 %v4112_v42, %v4113_v24  ;;  %v4121_v5 = vmax.f32 %v4119_v44, %v4120_v38  ;;  %v4127_v48 = vrot.slane %v4126_v31, 1  ;;  %v4134_v53 = vrot.slane %v4133_v8, 1  ;;  %v7700_v24 = vpop.f32.mrb[108].mxu0 }
 0x40e   : > { %v4140_v49 = vmax.f32 %v4138_v15, %v4139_v63  ;;  %v4744_v62 = vunpack.c.l.b16 %v5392_v16  ;;  %v4745_v11 = vunpack.c.l.b16 %v5393_v39  ;;  %v3769_v51 = vrot.slane %v7663_v28, %v7576_v3  ;;  %v3522_v38 = vpop.f32.mrb[109].mxu0 }
 0x40f   : > { %v5394_v23 = vpack.c.bf16 %v4114_v61, %v4114_v61  ;;  %v4128_v55 = vmax.f32 %v4126_v31, %v4127_v48  ;;  %v4135_v29 = vmax.f32 %v4133_v8, %v4134_v53  ;;  %v5395_v37 = vpack.c.bf16 %v4121_v5, %v4121_v5  ;;  %v7688_v60 = vpop.f32.mrb[124].mxu1  ;;  %v7706_v16 = vpop.f32.mrb[110].mxu0 }
 0x410   : > { %v4141_v32 = vrot.slane %v4140_v49, 1  ;;  %v4813_v58 = vsel %vm4799_vm13, %v4744_v62, %v4743_v22  ;;  %v3776_v4 = vrot.slane %v3762_v14, %v7576_v3  ;;  %v3777_v45 = vcombine.high %v3769_v51, %v3769_v51  ;;  %v3213_v52 = vpop.f32.mrb[125].mxu1  ;;  %v3525_v53 = vpop.f32.mrb[111].mxu0 }
 0x411   : > { %v4746_v46 = vunpack.c.l.b16 %v5394_v23  ;;  %v4814_v1 = vsel %vm4801_vm14, %v4745_v11, %v4813_v58  ;;  %v5396_v42 = vpack.c.bf16 %v4128_v55, %v4128_v55  ;;  %v5397_v26 = vpack.c.bf16 %v4135_v29, %v4135_v29  ;;  %v7696_v44 = vpop.f32.mrb[126].mxu1 }
 0x412   : > { %v4142_v2 = vmax.f32 %v4140_v49, %v4141_v32  ;;  %v4747_v36 = vunpack.c.l.b16 %v5395_v37  ;;  %v3778_v15 = vcombine.high %v3776_v4, %v3776_v4  ;;  %v4143_v40 = vsel %vm4030_vm12, %v3769_v51, -inf  ;;  %v3216_v54 = vpop.f32.mrb[127].mxu1 }
 0x413   : > { %v4815_v57 = vsel %vm4803_vm15, %v4746_v46, %v4814_v1  ;;  %v4748_v14 = vunpack.c.l.b16 %v5396_v42  ;;  %v4749_v18 = vunpack.c.l.b16 %v5397_v26  ;;  %v4144_v13 = vrot.slane %v4143_v40, 4 }
 0x414   : > { %v5398_v28 = vpack.c.bf16 %v4142_v2, %v4142_v2  ;;  %v4816_v31 = vsel %vm4805_vm0, %v4747_v36, %v4815_v57  ;;  %v4150_v8 = vsel %vm4030_vm12, %v3777_v45, -inf  ;;  %v4157_v63 = vsel %vm4030_vm12, %v3776_v4, -inf }
 0x415   : > { %v4164_v61 = vsel %vm4030_vm12, %v3778_v15, -inf  ;;  %v4817_v22 = vsel %vm4807_vm1, %v4748_v14, %v4816_v31  ;;  %v4145_v5 = vmax.f32 %v4143_v40, %v4144_v13  ;;  %v4151_v48 = vrot.slane %v4150_v8, 4 }
 0x416   : > { %v4750_v39 = vunpack.c.l.b16 %v5398_v28  ;;  %v4818_v49 = vsel %vm4809_vm2, %v4749_v18, %v4817_v22  ;;  %v4158_v23 = vrot.slane %v4157_v63, 4  ;;  %v4165_v62 = vrot.slane %v4164_v61, 4 }
 0x417   : > { %v3647_v11 = vmax.f32 %v7657_v9, %v7668_v27  ;;  %v4146_v55 = vrot.slane %v4145_v5, 2  ;;  %v4152_v29 = vmax.f32 %v4150_v8, %v4151_v48  ;;  %v3539_v32 = vadd.f32 %v7487_v47, %v7648_v34  ;;  %v7715_v37 = vpop.f32.mrb[128].mxu1 }
 0x418   : > { %v4819_v51 = vsel %vm4811_vm3, %v4750_v39, %v4818_v49  ;;  %v4159_v58 = vmax.f32 %v4157_v63, %v4158_v23  ;;  %v4166_v4 = vmax.f32 %v4164_v61, %v4165_v62  ;;  %v3221_v52 = vpop.f32.mrb[129].mxu1  ;;  %v3540_v34 = vadd.f32 %v7491_v12, %v7651_v6 }
 0x419   : > { %v4863_v46 = vpack.c.b16 %v4819_v51, %v4819_v51  ;;  %v3779_v45 = vcombine.high %v3647_v11, %v3647_v11  ;;  %v4147_v1 = vmax.f32 %v4145_v5, %v4146_v55  ;;  %v4153_v2 = vrot.slane %v4152_v29, 2  ;;  %v7719_v27 = vpop.f32.mrb[130].mxu1 }
 0x41a   : > { %v3786_v42 = vrot.slane %v3647_v11, %v7576_v3  ;;  %v3578_v9 = vadd.f32 %v7566_v59, %v3539_v32  ;;  %v4160_v26 = vrot.slane %v4159_v58, 2  ;;  %v4167_v36 = vrot.slane %v4166_v4, 2  ;;  %v3224_v57 = vpop.f32.mrb[131].mxu1 }
 0x41b   : > { %4879 = vst.msk [vmem:[%s7643_s20 + $0x4] sm:$0xf] %vm1970_vm10, %v4863_v46  ;;  %v3793_v47 = vrot.slane %v3779_v45, %v7576_v3  ;;  %v4148_v15 = vrot.slane %v4147_v1, 1  ;;  %v4154_v40 = vmax.f32 %v4152_v29, %v4153_v2 }
 0x41c   : > { %v3794_v54 = vcombine.high %v3786_v42, %v3786_v42  ;;  %v4171_v28 = vsel %vm4030_vm12, %v3786_v42, -inf  ;;  %v4161_v14 = vmax.f32 %v4159_v58, %v4160_v26  ;;  %v4168_v18 = vmax.f32 %v4166_v4, %v4167_v36 }
 0x41d   : > { %v3795_v13 = vcombine.high %v3793_v47, %v3793_v47  ;;  %v4172_v38 = vrot.slane %v4171_v28, 4  ;;  %v4149_v31 = vmax.f32 %v4147_v1, %v4148_v15  ;;  %v4155_v8 = vrot.slane %v4154_v40, 1 }
 0x41e   : > { %v4178_v63 = vsel %vm4030_vm12, %v3794_v54, -inf  ;;  %v4185_v61 = vsel %vm4030_vm12, %v3793_v47, -inf  ;;  %v4162_v39 = vrot.slane %v4161_v14, 1  ;;  %v4169_v22 = vrot.slane %v4168_v18, 1 }
 0x41f   : > { %v4173_v5 = vmax.f32 %v4171_v28, %v4172_v38  ;;  %v4179_v12 = vrot.slane %v4178_v63, 4  ;;  %v4156_v6 = vmax.f32 %v4154_v40, %v4155_v8  ;;  %v5399_v48 = vpack.c.bf16 %v4149_v31, %v4149_v31  ;;  %v7730_v23 = vpop.f32.mrb[132].mxu1 }
 0x420   : > { %v4186_v53 = vrot.slane %v4185_v61, 4  ;;  %v4192_v49 = vsel %vm4030_vm12, %v3795_v13, -inf  ;;  %v4163_v62 = vmax.f32 %v4161_v14, %v4162_v39  ;;  %v4170_v11 = vmax.f32 %v4168_v18, %v4169_v22  ;;  %v3229_v29 = vpop.f32.mrb[133].mxu1 }
 0x421   : > { %v4174_v51 = vrot.slane %v4173_v5, 2  ;;  %v4180_v55 = vmax.f32 %v4178_v63, %v4179_v12  ;;  %v5400_v32 = vpack.c.bf16 %v4156_v6, %v4156_v6  ;;  %v4751_v46 = vunpack.c.l.b16 %v5399_v48  ;;  %v7732_v45 = vpop.f32.mrb[134].mxu1 }
 0x422   : > { %v4187_v58 = vmax.f32 %v4185_v61, %v4186_v53  ;;  %v4193_v4 = vrot.slane %v4192_v49, 4  ;;  %v5401_v52 = vpack.c.bf16 %v4163_v62, %v4163_v62  ;;  %v5402_v1 = vpack.c.bf16 %v4170_v11, %v4170_v11  ;;  %v3232_v26 = vpop.f32.mrb[135].mxu1 }
 0x423   : > { %v4175_v2 = vmax.f32 %v4173_v5, %v4174_v51  ;;  %v4181_v42 = vrot.slane %v4180_v55, 2  ;;  %v4752_v36 = vunpack.c.l.b16 %v5400_v32  ;;  %v3610_v15 = vmax.f32 %v3578_v9, 0.0 }
 0x424   : > { %v4188_v47 = vrot.slane %v4187_v58, 2  ;;  %v4194_v57 = vmax.f32 %v4192_v49, %v4193_v4  ;;  %v4753_v40 = vunpack.c.l.b16 %v5401_v52  ;;  %v4754_v54 = vunpack.c.l.b16 %v5402_v1 }
 0x425   : > { %v4176_v28 = vrot.slane %v4175_v2, 1  ;;  %v4182_v14 = vmax.f32 %v4180_v55, %v4181_v42  ;;  %v4820_v18 = vsel %vm4799_vm13, %v4752_v36, %v4751_v46  ;;  %v3648_v31 = vsel %vm2645_vm11, %v3610_v15, -inf }
 0x426   : > { %v4189_v13 = vmax.f32 %v4187_v58, %v4188_v47  ;;  %v4195_v38 = vrot.slane %v4194_v57, 2  ;;  %v4821_v8 = vsel %vm4801_vm14, %v4753_v40, %v4820_v18  ;;  %v3579_v39 = vadd.f32 %v7566_v59, %v3540_v34 }
 0x427   : > { %v4177_v63 = vmax.f32 %v4175_v2, %v4176_v28  ;;  %v4183_v61 = vrot.slane %v4182_v14, 1  ;;  %v4822_v9 = vsel %vm4803_vm15, %v4754_v54, %v4821_v8  ;;  %v3196_v12 = vadd.f32 %v7670_v41, %v7489_v10  ;;  %v7741_v6 = vpop.f32.mrb[136].mxu1 }
 0x428   : > { %v4190_v22 = vrot.slane %v4189_v13, 1  ;;  %v4196_v5 = vmax.f32 %v4194_v57, %v4195_v38  ;;  %v3611_v49 = vmax.f32 %v3579_v39, 0.0  ;;  %v3199_v62 = vadd.f32 %v7677_v0, %v7493_v35  ;;  %v3237_v11 = vpop.f32.mrb[137].mxu1 }
 0x429   : > { %v4184_v48 = vmax.f32 %v4182_v14, %v4183_v61  ;;  %v5403_v53 = vpack.c.bf16 %v4177_v63, %v4177_v63  ;;  %v3541_v34 = vadd.f32 %v7495_v56, %v3196_v12  ;;  %v3204_v29 = vadd.f32 %v7682_v50, %v7497_v43  ;;  %v7748_v32 = vpop.f32.mrb[138].mxu1 }
 0x42a   : > { %v4191_v51 = vmax.f32 %v4189_v13, %v4190_v22  ;;  %v4197_v55 = vrot.slane %v4196_v5, 1  ;;  %v3651_v41 = vsel %vm2645_vm11, %v3611_v49, -inf  ;;  %v3542_v58 = vadd.f32 %v7499_v25, %v3199_v62  ;;  %v3240_v4 = vpop.f32.mrb[139].mxu1 }
 0x42b   : > { %v5404_v46 = vpack.c.bf16 %v4184_v48, %v4184_v48  ;;  %v4755_v10 = vunpack.c.l.b16 %v5403_v53  ;;  %v3580_v35 = vadd.f32 %v7566_v59, %v3541_v34  ;;  %v3543_v0 = vadd.f32 %v7503_v33, %v3204_v29  ;;  %v8122_v53 = vld [vmem:[#allocation9_spill] sm:$0xff] }
 0x42c   : > { %v4198_v52 = vmax.f32 %v4196_v5, %v4197_v55  ;;  %v5405_v1 = vpack.c.bf16 %v4191_v51, %v4191_v51  ;;  %v3581_v43 = vadd.f32 %v7566_v59, %v3542_v58  ;;  %v3207_v50 = vadd.f32 %v7684_v20, %v7501_v19 }
 0x42d   : > { %v4756_v2 = vunpack.c.l.b16 %v5404_v46  ;;  %v4823_v56 = vsel %vm4805_vm0, %v4755_v10, %v4822_v9  ;;  %v3612_v36 = vmax.f32 %v3580_v35, 0.0  ;;  %v3582_v25 = vadd.f32 %v7566_v59, %v3543_v0 }
 0x42e   : > { %v5406_v42 = vpack.c.bf16 %v4198_v52, %v4198_v52  ;;  %v4757_v26 = vunpack.c.l.b16 %v5405_v1  ;;  %v3613_v57 = vmax.f32 %v3581_v43, 0.0  ;;  %v3544_v15 = vadd.f32 %v7507_v7, %v3207_v50 }
 0x42f   : > { %v4824_v47 = vsel %vm4807_vm1, %v4756_v2, %v4823_v56  ;;  %v3212_v33 = vadd.f32 %v7688_v60, %v7505_v17  ;;  %v3649_v28 = vsel %vm2645_vm11, %v3612_v36, -inf  ;;  %v3614_v14 = vmax.f32 %v3582_v25, 0.0  ;;  %v7765_v19 = vpop.f32.mrb[140].mxu1 }
 0x430   : > { %v4758_v40 = vunpack.c.l.b16 %v5406_v42  ;;  %v4825_v54 = vsel %vm4809_vm2, %v4757_v26, %v4824_v47  ;;  %v3650_v20 = vmax.f32 %v3648_v31, %v3649_v28  ;;  %v3652_v18 = vsel %vm2645_vm11, %v3613_v57, -inf  ;;  %v3245_v7 = vpop.f32.mrb[141].mxu1 }
 0x431   : > { %v3583_v13 = vadd.f32 %v7566_v59, %v3544_v15  ;;  %v3545_v38 = vadd.f32 %v7511_v21, %v3212_v33  ;;  %v3653_v17 = vmax.f32 %v3651_v41, %v3652_v18  ;;  %v7772_v60 = vsel %vm2645_vm11, %v3614_v14, -inf  ;;  %v7776_v61 = vpop.f32.mrb[142].mxu1 }
 0x432   : > { %v4826_v8 = vsel %vm4811_vm3, %v4758_v40, %v4825_v54  ;;  %v3215_v63 = vadd.f32 %v7696_v44, %v7509_v30  ;;  %v3796_v39 = vcombine.high %v3650_v20, %v3650_v20  ;;  %v3803_v22 = vrot.slane %v3650_v20, %v7576_v3  ;;  %v3248_v9 = vpop.f32.mrb[143].mxu1 }
 0x433   : > { %v4864_v31 = vpack.c.b16 %v4826_v8, %v4826_v8  ;;  %v3615_v5 = vmax.f32 %v3583_v13, 0.0  ;;  %v3813_v21 = vcombine.high %v3653_v17, %v3653_v17  ;;  %v3820_v12 = vrot.slane %v3653_v17, %v7576_v3 }
 0x434   : > { %v7781_v48 = vadd.f32 %v7566_v59, %v3545_v38  ;;  %v7784_v49 = vadd.f32 %v8122_v53, %v3215_v63  ;;  %v3810_v30 = vrot.slane %v3796_v39, %v7576_v3  ;;  %v3811_v44 = vcombine.high %v3803_v22, %v3803_v22 }
 0x435   : > { %4880 = vst.msk [vmem:[%s7643_s20 + $0x8] sm:$0xf] %vm1970_vm10, %v4864_v31  ;;  %v4199_v62 = vsel %vm4030_vm12, %v3803_v22, -inf  ;;  %v7791_v11 = vsel %vm2645_vm11, %v3615_v5, -inf  ;;  %v3827_v55 = vrot.slane %v3813_v21, %v7576_v3  ;;  %v3828_v34 = vcombine.high %v3820_v12, %v3820_v12 }
 0x436   : > { %v4200_v51 = vrot.slane %v4199_v62, 4  ;;  %v4227_v59 = vsel %vm4030_vm12, %v3820_v12, -inf  ;;  %v3812_v29 = vcombine.high %v3810_v30, %v3810_v30  ;;  %v4206_v46 = vsel %vm4030_vm12, %v3811_v44, -inf }
 0x437   : > { %v4213_v10 = vsel %vm4030_vm12, %v3810_v30, -inf  ;;  %v4228_v41 = vrot.slane %v4227_v59, 4  ;;  %v4207_v4 = vrot.slane %v4206_v46, 4  ;;  %v3829_v1 = vcombine.high %v3827_v55, %v3827_v55  ;;  %v7797_v35 = vpop.f32.mrb[144].mxu1 }
 0x438   : > { %v4201_v58 = vmax.f32 %v4199_v62, %v4200_v51  ;;  %v4214_v52 = vrot.slane %v4213_v10, 4  ;;  %v4220_v0 = vsel %vm4030_vm12, %v3812_v29, -inf  ;;  %v4234_v56 = vsel %vm4030_vm12, %v3828_v34, -inf  ;;  %v3253_v50 = vpop.f32.mrb[145].mxu1 }
 0x439   : > { %v4229_v2 = vmax.f32 %v4227_v59, %v4228_v41  ;;  %v4241_v43 = vsel %vm4030_vm12, %v3827_v55, -inf  ;;  %v4208_v26 = vmax.f32 %v4206_v46, %v4207_v4  ;;  %v4221_v25 = vrot.slane %v4220_v0, 4  ;;  %v7802_v47 = vpop.f32.mrb[146].mxu1 }
 0x43a   : > { %v4202_v42 = vrot.slane %v4201_v58, 2  ;;  %v4215_v36 = vmax.f32 %v4213_v10, %v4214_v52  ;;  %v4235_v15 = vrot.slane %v4234_v56, 4  ;;  %v4242_v33 = vrot.slane %v4241_v43, 4  ;;  %v3256_v54 = vpop.f32.mrb[147].mxu1 }
 0x43b   : > { %v4230_v57 = vrot.slane %v4229_v2, 2  ;;  %v4248_v40 = vsel %vm4030_vm12, %v3829_v1, -inf  ;;  %v4209_v14 = vrot.slane %v4208_v26, 2  ;;  %v4222_v18 = vmax.f32 %v4220_v0, %v4221_v25 }
 0x43c   : > { %v4203_v28 = vmax.f32 %v4201_v58, %v4202_v42  ;;  %v4216_v20 = vrot.slane %v4215_v36, 2  ;;  %v4236_v38 = vmax.f32 %v4234_v56, %v4235_v15  ;;  %v4243_v7 = vmax.f32 %v4241_v43, %v4242_v33 }
 0x43d   : > { %v4231_v13 = vmax.f32 %v4229_v2, %v4230_v57  ;;  %v4249_v8 = vrot.slane %v4248_v40, 4  ;;  %v4210_v63 = vmax.f32 %v4208_v26, %v4209_v14  ;;  %v4223_v39 = vrot.slane %v4222_v18, 2 }
 0x43e   : > { %v4204_v17 = vrot.slane %v4203_v28, 1  ;;  %v4217_v31 = vmax.f32 %v4215_v36, %v4216_v20  ;;  %v4237_v5 = vrot.slane %v4236_v38, 2  ;;  %v4244_v9 = vrot.slane %v4243_v7, 2 }
 0x43f   : > { %v4232_v22 = vrot.slane %v4231_v13, 1  ;;  %v4250_v21 = vmax.f32 %v4248_v40, %v4249_v8  ;;  %v4211_v53 = vrot.slane %v4210_v63, 1  ;;  %v4224_v44 = vmax.f32 %v4222_v18, %v4223_v39  ;;  %v7805_v62 = vpop.f32.mrb[148].mxu1 }
 0x440   : > { %v4205_v12 = vmax.f32 %v4203_v28, %v4204_v17  ;;  %v4218_v30 = vrot.slane %v4217_v31, 1  ;;  %v4238_v55 = vmax.f32 %v4236_v38, %v4237_v5  ;;  %v4245_v34 = vmax.f32 %v4243_v7, %v4244_v9  ;;  %v3261_v29 = vpop.f32.mrb[149].mxu1 }
 0x441   : > { %v4233_v51 = vmax.f32 %v4231_v13, %v4232_v22  ;;  %v4251_v59 = vrot.slane %v4250_v21, 2  ;;  %v4212_v46 = vmax.f32 %v4210_v63, %v4211_v53  ;;  %v4225_v41 = vrot.slane %v4224_v44, 1  ;;  %v7816_v4 = vpop.f32.mrb[150].mxu1 }
 0x442   : > { %v4219_v10 = vmax.f32 %v4217_v31, %v4218_v30  ;;  %v5407_v58 = vpack.c.bf16 %v4205_v12, %v4205_v12  ;;  %v4239_v52 = vrot.slane %v4238_v55, 1  ;;  %v4246_v1 = vrot.slane %v4245_v34, 1  ;;  %v3264_v56 = vpop.f32.mrb[151].mxu1 }
 0x443   : > { %v4252_v0 = vmax.f32 %v4250_v21, %v4251_v59  ;;  %v5411_v2 = vpack.c.bf16 %v4233_v51, %v4233_v51 }
 0x444   : > { %5800 = shalt.err (!%p5797_p5)
}
 0x445   : > { %s5801_s21 = scalar_lea.hbm %s7812_s10, 2048  ;;  %s5805_s15 = scalar_lea.hbm %s8092_s6, 4096 }
 0x446   : > { %p5802_p6 = scmp.ne.s32.totalorder %s7812_s10, %s5801_s21  ;;  %p5806_p10 = scmp.lt.u32.totalorder %s7812_s10, %s8092_s6 }
 0x447   : > { %p5807_p11 = scmp.lt.u32.totalorder %s5805_s15, %s5801_s21  ;;  %p5809_p13 = scmp.lt.u32.totalorder %s5801_s21, %s7812_s10 }
 0x448   : > { %p5803_p7 = pnand %p5802_p6, %p5988_p4 }
 0x449   : > { %p5808_p12 = por %p5807_p11, %p5806_p10 }
 0x44a   : > { %p5804_p9 = pneg %p5803_p7 }
 0x44b   : > { %p5810_p0 = por %p5809_p13, %p5808_p12 }
 0x44d   : > { %p5811_p1 = pnand %p5810_p0, %p5804_p9 }
 0x44f   : > { %5814 = shalt.err (!%p5811_p1)
}
 0x450   : > { %s5906_s12 = smov 4   ;;  %s8123_s18 = scalar_lea.sflag [#allocation3], %s6649_s17  ;;  %v4226_v43 = vmax.f32 %v4224_v44, %v4225_v41  ;;  %v5408_v50 = vpack.c.bf16 %v4212_v46, %v4212_v46  ;;  %v5409_v42 = vpack.c.bf16 %v4219_v10, %v4219_v10  ;;  %v4759_v26 = vunpack.c.l.b16 %v5407_v58  ;;  %v7849_v13 = vld [vmem:[%s8091_s5] ss:$0 sm:$0xff]  ;;  %v8125_v53 = vld [vmem:[#allocation11_spill] sm:$0xff]  ;;  %v8126_v51 = vld [vmem:[#allocation10_spill] sm:$0xff] }
 0x451   : > { %5679 = dma.vmem_to_hbm [thread:$0]  (%p5988_p4), %s7814_s22, 2048, %s7812_s10, %s8123_s18, %s5903_s23, %s5903_s23, %s5906_s12   ;;  %v4240_v36 = vmax.f32 %v4238_v55, %v4239_v52  ;;  %v4247_v25 = vmax.f32 %v4245_v34, %v4246_v1  ;;  %v4253_v57 = vrot.slane %v4252_v0, 1  ;;  %v4763_v15 = vunpack.c.l.b16 %v5411_v2  ;;  %v8124_v63 = vld [vmem:[#allocation8_spill] sm:$0xff]  ;;  %v8128_v52 = vld [vmem:[#allocation13_spill] sm:$0xff] }
 0x452   : > { %v5410_v33 = vpack.c.bf16 %v4226_v43, %v4226_v43  ;;  %v4760_v40 = vunpack.c.l.b16 %v5408_v50  ;;  %v4761_v54 = vunpack.c.l.b16 %v5409_v42  ;;  %v3616_v28 = vmax.f32 %v7781_v48, 0.0  ;;  %v8127_v34 = vld [vmem:[#allocation12_spill] sm:$0xff]  ;;  %s5448_s22 = sshll.u32 %s5889_s27, 9  ;;  %s4926_s10 = sshll.u32 %s7643_s20, 4  ;;  %s8033_s10 = int_to_ptr.vmem [resolvable:$true] %s4926_s10 }
 0x453   : > { %v4254_v14 = vmax.f32 %v4252_v0, %v4253_v57  ;;  %v5412_v20 = vpack.c.bf16 %v4240_v36, %v4240_v36  ;;  %v5413_v18 = vpack.c.bf16 %v4247_v25, %v4247_v25  ;;  %v3585_v38 = vadd.f32 %v7849_v13, %v7784_v49  ;;  %s8031_s15 = scalar_lea.hbm %s8093_s7, %s5448_s22  ;;  %s4892_s16 = scalar_lea.sflag [#allocation5], %s6649_s17 }
 0x454   : > { %v4762_v7 = vunpack.c.l.b16 %v5410_v33  ;;  %v4827_v8 = vsel %vm4799_vm13, %v4760_v40, %v4759_v26  ;;  %v3655_v17 = vsel %vm2645_vm11, %v3616_v28, -inf  ;;  %v3220_v31 = vadd.f32 %v7715_v37, %v8124_v63  ;;  %s5815_s27 = scalar_lea.vmem %s8033_s10, 512  ;;  %s5907_s18 = smov [#allocation4]  }
 0x455   : > { %v4828_v48 = vsel %vm4801_vm14, %v4761_v54, %v4827_v8  ;;  %v5414_v39 = vpack.c.bf16 %v4254_v14, %v4254_v14  ;;  %v4764_v22 = vunpack.c.l.b16 %v5412_v20  ;;  %v4765_v5 = vunpack.c.l.b16 %v5413_v18  ;;  %p5816_p2 = scmp.ne.s32.totalorder %s8033_s10, %s5815_s27  ;;  %s5819_s19 = sshll.u32 %s5907_s18, 4  ;;  %s5820_s19 = int_to_ptr.vmem [resolvable:$false] %s5819_s19 }
 0x456   : > { %v4829_v9 = vsel %vm4803_vm15, %v4762_v7, %v4828_v48  ;;  %v3656_v21 = vmax.f32 %v7772_v60, %v3655_v17  ;;  %v3617_v12 = vmax.f32 %v3585_v38, 0.0  ;;  %v3547_v49 = vadd.f32 %v8125_v53, %v3220_v31  ;;  %s5821_s21 = scalar_lea.vmem %s5820_s19, 1024  ;;  %p5822_p6 = scmp.lt.s32.totalorder %s8033_s10, %s5820_s19 }
 0x457   : > { %v4766_v30 = vunpack.c.l.b16 %v5414_v39  ;;  %v4830_v44 = vsel %vm4805_vm0, %v4763_v15, %v4829_v9  ;;  %v3223_v55 = vadd.f32 %v7719_v27, %v8126_v51  ;;  %v7866_v37 = vadd.f32 %v7730_v23, %v8127_v34  ;;  %p5817_p3 = pnand %p5816_p2, %p5988_p4  ;;  %p5823_p7 = scmp.lt.s32.totalorder %s5821_s21, %s5815_s27 }
 0x458   : > { %v4831_v59 = vsel %vm4807_vm1, %v4764_v22, %v4830_v44  ;;  %v3830_v29 = vcombine.high %v3656_v21, %v3656_v21  ;;  %v3837_v46 = vrot.slane %v3656_v21, %v7576_v3  ;;  %v3658_v60 = vsel %vm2645_vm11, %v3617_v12, -inf }
 0x459   : > { %v4832_v10 = vsel %vm4809_vm2, %v4765_v5, %v4831_v59  ;;  %v3659_v41 = vmax.f32 %v7791_v11, %v3658_v60  ;;  %v3586_v58 = vadd.f32 %v7849_v13, %v3547_v49  ;;  %v7875_v27 = vadd.f32 %v8128_v52, %v3223_v55  ;;  %p5818_p5 = pneg %p5817_p3  ;;  %p5824_p9 = por %p5823_p7, %p5822_p6 }
 0x45a   : > { %v4833_v23 = vsel %vm4811_vm3, %v4766_v30, %v4832_v10  ;;  %v3844_v1 = vrot.slane %v3830_v29, %v7576_v3  ;;  %v3845_v0 = vcombine.high %v3837_v46, %v3837_v46  ;;  %v4255_v2 = vsel %vm4030_vm12, %v3837_v46, -inf }
 0x45b   : > { %v4865_v56 = vpack.c.b16 %v4833_v23, %v4833_v23  ;;  %v4256_v43 = vrot.slane %v4255_v2, 4  ;;  %v3847_v50 = vcombine.high %v3659_v41, %v3659_v41  ;;  %v3854_v42 = vrot.slane %v3659_v41, %v7576_v3  ;;  %p5825_p10 = pnand %p5824_p9, %p5818_p5 }
 0x45c   : > { %v3846_v26 = vcombine.high %v3844_v1, %v3844_v1  ;;  %v4262_v11 = vsel %vm4030_vm12, %v3845_v0, -inf  ;;  %v4269_v36 = vsel %vm4030_vm12, %v3844_v1, -inf  ;;  %v3618_v25 = vmax.f32 %v3586_v58, 0.0 }
 0x45d   : > { %4881 = vst.msk [vmem:[%s7643_s20 + $0xc] sm:$0xf] %vm1970_vm10, %v4865_v56  ;;  %v4257_v57 = vmax.f32 %v4255_v2, %v4256_v43  ;;  %v4263_v15 = vrot.slane %v4262_v11, 4  ;;  %v4270_v33 = vrot.slane %v4269_v36, 4  ;;  %v3861_v40 = vrot.slane %v3847_v50, %v7576_v3 }
 0x45e   : > { %v4276_v54 = vsel %vm4030_vm12, %v3846_v26, -inf  ;;  %v3862_v28 = vcombine.high %v3854_v42, %v3854_v42  ;;  %v4283_v14 = vsel %vm4030_vm12, %v3854_v42, -inf  ;;  %v7889_v20 = vsel %vm2645_vm11, %v3618_v25, -inf }
 0x45f   : > { %v4258_v18 = vrot.slane %v4257_v57, 2  ;;  %v4264_v38 = vmax.f32 %v4262_v11, %v4263_v15  ;;  %v4271_v7 = vmax.f32 %v4269_v36, %v4270_v33  ;;  %v4277_v8 = vrot.slane %v4276_v54, 4 }
 0x460   : > { %v3863_v17 = vcombine.high %v3861_v40, %v3861_v40  ;;  %v4284_v63 = vrot.slane %v4283_v14, 4  ;;  %v4290_v31 = vsel %vm4030_vm12, %v3862_v28, -inf  ;;  %v4297_v48 = vsel %vm4030_vm12, %v3861_v40, -inf }
 0x461   : > { %v4259_v39 = vmax.f32 %v4257_v57, %v4258_v18  ;;  %v4265_v22 = vrot.slane %v4264_v38, 2  ;;  %v4272_v5 = vrot.slane %v4271_v7, 2  ;;  %v4278_v9 = vmax.f32 %v4276_v54, %v4277_v8 }
 0x462   : > { %v4285_v21 = vmax.f32 %v4283_v14, %v4284_v63  ;;  %v4291_v12 = vrot.slane %v4290_v31, 4  ;;  %v4298_v53 = vrot.slane %v4297_v48, 4  ;;  %v4304_v49 = vsel %vm4030_vm12, %v3863_v17, -inf }
 0x463   : > { %v4260_v30 = vrot.slane %v4259_v39, 1  ;;  %v4266_v44 = vmax.f32 %v4264_v38, %v4265_v22  ;;  %v4273_v51 = vmax.f32 %v4271_v7, %v4272_v5  ;;  %v4279_v55 = vrot.slane %v4278_v9, 2 }
 0x464   : > { %v4286_v34 = vrot.slane %v4285_v21, 2  ;;  %v4292_v59 = vmax.f32 %v4290_v31, %v4291_v12  ;;  %v4299_v29 = vmax.f32 %v4297_v48, %v4298_v53  ;;  %v4305_v46 = vrot.slane %v4304_v49, 4 }
 0x465   : > { %v4261_v60 = vmax.f32 %v4259_v39, %v4260_v30  ;;  %v4267_v10 = vrot.slane %v4266_v44, 1  ;;  %v4274_v41 = vrot.slane %v4273_v51, 1  ;;  %v4280_v58 = vmax.f32 %v4278_v9, %v4279_v55  ;;  %v8129_v9 = vld [vmem:[#allocation15_spill] sm:$0xff] }
 0x466   : > { %v4287_v52 = vmax.f32 %v4285_v21, %v4286_v34  ;;  %v4293_v23 = vrot.slane %v4292_v59, 2  ;;  %v4300_v1 = vrot.slane %v4299_v29, 2  ;;  %v4306_v0 = vmax.f32 %v4304_v49, %v4305_v46  ;;  %v8130_v46 = vld [vmem:[#allocation14_spill] sm:$0xff] }
 0x467   : > { %v4268_v2 = vmax.f32 %v4266_v44, %v4267_v10  ;;  %v4275_v56 = vmax.f32 %v4273_v51, %v4274_v41  ;;  %v4281_v43 = vrot.slane %v4280_v58, 1  ;;  %v5415_v50 = vpack.c.bf16 %v4261_v60, %v4261_v60  ;;  %v8131_v41 = vld [vmem:[#allocation16_spill] sm:$0xff] }
 0x468   : > { %v4288_v42 = vrot.slane %v4287_v52, 1  ;;  %v4294_v26 = vmax.f32 %v4292_v59, %v4293_v23  ;;  %v4301_v11 = vmax.f32 %v4299_v29, %v4300_v1  ;;  %v4307_v36 = vrot.slane %v4306_v0, 2 }
 0x469   : > { %v4282_v25 = vmax.f32 %v4280_v58, %v4281_v43  ;;  %v5416_v57 = vpack.c.bf16 %v4268_v2, %v4268_v2  ;;  %v5417_v15 = vpack.c.bf16 %v4275_v56, %v4275_v56  ;;  %v4767_v33 = vunpack.c.l.b16 %v5415_v50  ;;  %v8133_v2 = vld [vmem:[#allocation17_spill] sm:$0xff]  ;;  %v8134_v43 = vld [vmem:[#allocation20_spill] sm:$0xff] }
 0x46a   : > { %v4289_v40 = vmax.f32 %v4287_v52, %v4288_v42  ;;  %v4295_v54 = vrot.slane %v4294_v26, 1  ;;  %v4302_v28 = vrot.slane %v4301_v11, 1  ;;  %v4308_v14 = vmax.f32 %v4306_v0, %v4307_v36  ;;  %v8132_v52 = vld [vmem:[#allocation18_spill] sm:$0xff]  ;;  %v8136_v36 = vld [vmem:[#allocation21_spill] sm:$0xff] }
 0x46b   : > { %v5418_v18 = vpack.c.bf16 %v4282_v25, %v4282_v25  ;;  %v4768_v38 = vunpack.c.l.b16 %v5416_v57  ;;  %v4769_v7 = vunpack.c.l.b16 %v5417_v15  ;;  %v3587_v8 = vadd.f32 %v7849_v13, %v7875_v27  ;;  %v8137_v15 = vld [vmem:[#allocation23_spill] sm:$0xff] }
 0x46c   : > { %v4296_v17 = vmax.f32 %v4294_v26, %v4295_v54  ;;  %v4303_v63 = vmax.f32 %v4301_v11, %v4302_v28  ;;  %v4309_v31 = vrot.slane %v4308_v14, 1  ;;  %v5419_v48 = vpack.c.bf16 %v4289_v40, %v4289_v40  ;;  %v8135_v26 = vld [vmem:[#allocation19_spill] sm:$0xff]  ;;  %v8138_v28 = vld [vmem:[#allocation22_spill] sm:$0xff] }
 0x46d   : > { %v4770_v39 = vunpack.c.l.b16 %v5418_v18  ;;  %v4834_v22 = vsel %vm4799_vm13, %v4768_v38, %v4767_v33  ;;  %v3619_v5 = vmax.f32 %v3587_v8, 0.0  ;;  %v3549_v21 = vadd.f32 %v8129_v9, %v7866_v37 }
 0x46e   : > { %v4835_v12 = vsel %vm4801_vm14, %v4769_v7, %v4834_v22  ;;  %v4310_v53 = vmax.f32 %v4308_v14, %v4309_v31  ;;  %v5420_v49 = vpack.c.bf16 %v4296_v17, %v4296_v17  ;;  %v5421_v30 = vpack.c.bf16 %v4303_v63, %v4303_v63  ;;  %v8139_v63 = vld [vmem:[#allocation25_spill] sm:$0xff] }
 0x46f   : > { %v4771_v44 = vunpack.c.l.b16 %v5419_v48  ;;  %v4836_v51 = vsel %vm4803_vm15, %v4770_v39, %v4835_v12  ;;  %v3663_v27 = vsel %vm2645_vm11, %v3619_v5, -inf  ;;  %v3588_v55 = vadd.f32 %v7849_v13, %v3549_v21  ;;  %v8140_v48 = vld [vmem:[#allocation24_spill] sm:$0xff] }
 0x470   : > { %v5422_v34 = vpack.c.bf16 %v4310_v53, %v4310_v53  ;;  %v4772_v59 = vunpack.c.l.b16 %v5420_v49  ;;  %v4773_v29 = vunpack.c.l.b16 %v5421_v30  ;;  %v3231_v60 = vadd.f32 %v7732_v45, %v8130_v46 }
 0x471   : > { %v4837_v37 = vsel %vm4805_vm0, %v4771_v44, %v4836_v51  ;;  %v3620_v10 = vmax.f32 %v3588_v55, 0.0  ;;  %v3236_v58 = vadd.f32 %v7741_v6, %v8131_v41  ;;  %v3239_v23 = vadd.f32 %v7748_v32, %v8132_v52 }
 0x472   : > { %v4774_v1 = vunpack.c.l.b16 %v5422_v34  ;;  %v4838_v0 = vsel %vm4807_vm1, %v4772_v59, %v4837_v37  ;;  %v3550_v56 = vadd.f32 %v8133_v2, %v3231_v60  ;;  %v3244_v50 = vadd.f32 %v7765_v19, %v8134_v43 }
 0x473   : > { %v4839_v42 = vsel %vm4809_vm2, %v4773_v29, %v4838_v0  ;;  %v3661_v45 = vsel %vm2645_vm11, %v3620_v10, -inf  ;;  %v3551_v11 = vadd.f32 %v8135_v26, %v3236_v58  ;;  %v3552_v6 = vadd.f32 %v8136_v36, %v3239_v23 }
 0x474   : > { %v4840_v25 = vsel %vm4811_vm3, %v4774_v1, %v4839_v42  ;;  %v3662_v32 = vmax.f32 %v7889_v20, %v3661_v45  ;;  %v3589_v57 = vadd.f32 %v7849_v13, %v3550_v56  ;;  %v3553_v33 = vadd.f32 %v8137_v15, %v3244_v50 }
 0x475   : > { %v4866_v40 = vpack.c.b16 %v4840_v25, %v4840_v25  ;;  %v3590_v19 = vadd.f32 %v7849_v13, %v3551_v11  ;;  %v3591_v54 = vadd.f32 %v7849_v13, %v3552_v6  ;;  %v3247_v14 = vadd.f32 %v7776_v61, %v8138_v28 }
 0x476   : > { %v3864_v18 = vcombine.high %v3662_v32, %v3662_v32  ;;  %v3871_v38 = vrot.slane %v3662_v32, %v7576_v3  ;;  %v3621_v7 = vmax.f32 %v3589_v57, 0.0  ;;  %v3592_v8 = vadd.f32 %v7849_v13, %v3553_v33 }
 0x477   : > { %4882 = vst.msk [vmem:[%s7643_s20 + $0x10] sm:$0xf] %vm1970_vm10, %v4866_v40  ;;  %v3622_v20 = vmax.f32 %v3590_v19, 0.0  ;;  %v3623_v17 = vmax.f32 %v3591_v54, 0.0  ;;  %v3554_v31 = vadd.f32 %v8139_v63, %v3247_v14  ;;  %v7933_v39 = vadd.f32 %v7797_v35, %v8140_v48 }
 0x478   : > { %v3878_v22 = vrot.slane %v3864_v18, %v7576_v3  ;;  %v3879_v5 = vcombine.high %v3871_v38, %v3871_v38  ;;  %v4311_v61 = vsel %vm4030_vm12, %v3871_v38, -inf  ;;  %v3664_v9 = vsel %vm2645_vm11, %v3621_v7, -inf }
 0x479   : > { %v4312_v21 = vrot.slane %v4311_v61, 4  ;;  %v3665_v12 = vmax.f32 %v3663_v27, %v3664_v9  ;;  %v3666_v53 = vsel %vm2645_vm11, %v3622_v20, -inf  ;;  %v7940_v49 = vsel %vm2645_vm11, %v3623_v17, -inf }
 0x47a   : > { %v3880_v30 = vcombine.high %v3878_v22, %v3878_v22  ;;  %v4318_v44 = vsel %vm4030_vm12, %v3879_v5, -inf  ;;  %v4325_v35 = vsel %vm4030_vm12, %v3878_v22, -inf  ;;  %v3624_v51 = vmax.f32 %v3592_v8, 0.0 }
 0x47b   : > { %v4313_v55 = vmax.f32 %v4311_v61, %v4312_v21  ;;  %v4319_v34 = vrot.slane %v4318_v44, 4  ;;  %v4326_v59 = vrot.slane %v4325_v35, 4  ;;  %v3881_v29 = vcombine.high %v3665_v12, %v3665_v12 }
 0x47c   : > { %v4332_v46 = vsel %vm4030_vm12, %v3880_v30, -inf  ;;  %v3888_v60 = vrot.slane %v3665_v12, %v7576_v3  ;;  %v3667_v27 = vsel %vm2645_vm11, %v3624_v51, -inf  ;;  %v7948_v37 = vadd.f32 %v7849_v13, %v3554_v31 }
 0x47d   : > { %v4314_v10 = vrot.slane %v4313_v55, 2  ;;  %v4320_v41 = vmax.f32 %v4318_v44, %v4319_v34  ;;  %v4327_v58 = vmax.f32 %v4325_v35, %v4326_v59  ;;  %v4333_v52 = vrot.slane %v4332_v46, 4 }
 0x47e   : > { %v3895_v23 = vrot.slane %v3881_v29, %v7576_v3  ;;  %v3896_v1 = vcombine.high %v3888_v60, %v3888_v60  ;;  %v4339_v0 = vsel %vm4030_vm12, %v3888_v60, -inf  ;;  %v3668_v2 = vmax.f32 %v3666_v53, %v3667_v27 }
 0x47f   : > { %v4315_v56 = vmax.f32 %v4313_v55, %v4314_v10  ;;  %v4321_v43 = vrot.slane %v4320_v41, 2  ;;  %v4328_v50 = vrot.slane %v4327_v58, 2  ;;  %v4334_v42 = vmax.f32 %v4332_v46, %v4333_v52 }
 0x480   : > { %v3897_v45 = vcombine.high %v3895_v23, %v3895_v23  ;;  %v4340_v26 = vrot.slane %v4339_v0, 4  ;;  %v4346_v11 = vsel %vm4030_vm12, %v3896_v1, -inf  ;;  %v4353_v36 = vsel %vm4030_vm12, %v3895_v23, -inf }
 0x481   : > { %v4316_v6 = vrot.slane %v4315_v56, 1  ;;  %v4322_v25 = vmax.f32 %v4320_v41, %v4321_v43  ;;  %v4329_v32 = vmax.f32 %v4327_v58, %v4328_v50  ;;  %v4335_v57 = vrot.slane %v4334_v42, 2 }
 0x482   : > { %v4341_v15 = vmax.f32 %v4339_v0, %v4340_v26  ;;  %v4347_v33 = vrot.slane %v4346_v11, 4  ;;  %v4354_v40 = vrot.slane %v4353_v36, 4  ;;  %v4360_v19 = vsel %vm4030_vm12, %v3897_v45, -inf }
 0x483   : > { %v4317_v54 = vmax.f32 %v4315_v56, %v4316_v6  ;;  %v4323_v28 = vrot.slane %v4322_v25, 1  ;;  %v4330_v14 = vrot.slane %v4329_v32, 1  ;;  %v4336_v18 = vmax.f32 %v4334_v42, %v4335_v57 }
 0x484   : > { %v4342_v38 = vrot.slane %v4341_v15, 2  ;;  %v4348_v7 = vmax.f32 %v4346_v11, %v4347_v33  ;;  %v4355_v8 = vmax.f32 %v4353_v36, %v4354_v40  ;;  %v4361_v20 = vrot.slane %v4360_v19, 4 }
 0x485   : > { %v4324_v17 = vmax.f32 %v4322_v25, %v4323_v28  ;;  %v4331_v63 = vmax.f32 %v4329_v32, %v4330_v14  ;;  %v4337_v31 = vrot.slane %v4336_v18, 1  ;;  %v5423_v48 = vpack.c.bf16 %v4317_v54, %v4317_v54 }
 0x486   : > { %v4343_v22 = vmax.f32 %v4341_v15, %v4342_v38  ;;  %v4349_v5 = vrot.slane %v4348_v7, 2  ;;  %v4356_v61 = vrot.slane %v4355_v8, 2  ;;  %v4362_v9 = vmax.f32 %v4360_v19, %v4361_v20 }
 0x487   : > { %v4338_v21 = vmax.f32 %v4336_v18, %v4337_v31  ;;  %v5424_v12 = vpack.c.bf16 %v4324_v17, %v4324_v17  ;;  %v5425_v53 = vpack.c.bf16 %v4331_v63, %v4331_v63  ;;  %v4775_v30 = vunpack.c.l.b16 %v5423_v48 }
 0x488   : > { %v4344_v44 = vrot.slane %v4343_v22, 1  ;;  %v4350_v35 = vmax.f32 %v4348_v7, %v4349_v5  ;;  %v4357_v51 = vmax.f32 %v4355_v8, %v4356_v61  ;;  %v4363_v55 = vrot.slane %v4362_v9, 2 }
 0x489   : > { %v5426_v34 = vpack.c.bf16 %v4338_v21, %v4338_v21  ;;  %v4776_v59 = vunpack.c.l.b16 %v5424_v12  ;;  %v4777_v29 = vunpack.c.l.b16 %v5425_v53  ;;  %v3898_v46 = vcombine.high %v3668_v2, %v3668_v2  ;;  %v8141_v12 = vld [vmem:[#allocation27_spill] sm:$0xff] }
 0x48a   : > { %v4345_v60 = vmax.f32 %v4343_v22, %v4344_v44  ;;  %v4351_v27 = vrot.slane %v4350_v35, 1  ;;  %v4358_v10 = vrot.slane %v4357_v51, 1  ;;  %v4364_v41 = vmax.f32 %v4362_v9, %v4363_v55 }
 0x48b   : > { %v4778_v58 = vunpack.c.l.b16 %v5426_v34  ;;  %v4841_v52 = vsel %vm4799_vm13, %v4776_v59, %v4775_v30  ;;  %v3905_v23 = vrot.slane %v3668_v2, %v7576_v3  ;;  %v3912_v1 = vrot.slane %v3898_v46, %v7576_v3  ;;  %v8142_v46 = vld [vmem:[#allocation26_spill] sm:$0xff] }
 0x48c   : > { %v4842_v0 = vsel %vm4801_vm14, %v4777_v29, %v4841_v52  ;;  %v4352_v56 = vmax.f32 %v4350_v35, %v4351_v27  ;;  %v4359_v43 = vmax.f32 %v4357_v51, %v4358_v10  ;;  %v4365_v50 = vrot.slane %v4364_v41, 1  ;;  %v8143_v27 = vld [vmem:[#allocation28_spill] sm:$0xff] }
 0x48d   : > { %v5427_v42 = vpack.c.bf16 %v4345_v60, %v4345_v60  ;;  %v4843_v45 = vsel %vm4803_vm15, %v4778_v58, %v4842_v0  ;;  %v3913_v26 = vcombine.high %v3905_v23, %v3905_v23  ;;  %v3914_v11 = vcombine.high %v3912_v1, %v3912_v1  ;;  %v8144_v0 = vld [vmem:[#allocation29_spill] sm:$0xff] }
 0x48e   : > { %v4366_v36 = vmax.f32 %v4364_v41, %v4365_v50  ;;  %v5428_v6 = vpack.c.bf16 %v4352_v56, %v4352_v56  ;;  %v5429_v25 = vpack.c.bf16 %v4359_v43, %v4359_v43  ;;  %v4367_v32 = vsel %vm4030_vm12, %v3905_v23, -inf }
 0x48f   : > { %v4779_v57 = vunpack.c.l.b16 %v5427_v42  ;;  %v4368_v15 = vrot.slane %v4367_v32, 4  ;;  %v4374_v2 = vsel %vm4030_vm12, %v3913_v26, -inf  ;;  %v4381_v33 = vsel %vm4030_vm12, %v3912_v1, -inf }
 0x490   : > { %v5430_v40 = vpack.c.bf16 %v4366_v36, %v4366_v36  ;;  %v4780_v19 = vunpack.c.l.b16 %v5428_v6  ;;  %v4781_v54 = vunpack.c.l.b16 %v5429_v25  ;;  %v4375_v28 = vrot.slane %v4374_v2, 4 }
 0x491   : > { %v4844_v14 = vsel %vm4805_vm0, %v4779_v57, %v4843_v45  ;;  %v4369_v18 = vmax.f32 %v4367_v32, %v4368_v15  ;;  %v4382_v38 = vrot.slane %v4381_v33, 4  ;;  %v4388_v7 = vsel %vm4030_vm12, %v3914_v11, -inf }
 0x492   : > { %v4782_v8 = vunpack.c.l.b16 %v5430_v40  ;;  %v4845_v20 = vsel %vm4807_vm1, %v4780_v19, %v4844_v14  ;;  %v4376_v17 = vmax.f32 %v4374_v2, %v4375_v28  ;;  %v4389_v63 = vrot.slane %v4388_v7, 4 }
 0x493   : > { %v4846_v31 = vsel %vm4809_vm2, %v4781_v54, %v4845_v20  ;;  %v4370_v48 = vrot.slane %v4369_v18, 2  ;;  %v4383_v22 = vmax.f32 %v4381_v33, %v4382_v38  ;;  %v3625_v5 = vmax.f32 %v7948_v37, 0.0 }
 0x494   : > { %v4847_v61 = vsel %vm4811_vm3, %v4782_v8, %v4846_v31  ;;  %v4377_v9 = vrot.slane %v4376_v17, 2  ;;  %v4390_v21 = vmax.f32 %v4388_v7, %v4389_v63  ;;  %v3555_v53 = vadd.f32 %v8141_v12, %v7933_v39 }
 0x495   : > { %v4867_v30 = vpack.c.b16 %v4847_v61, %v4847_v61  ;;  %v4371_v44 = vmax.f32 %v4369_v18, %v4370_v48  ;;  %v4384_v35 = vrot.slane %v4383_v22, 2  ;;  %v3670_v51 = vsel %vm2645_vm11, %v3625_v5, -inf }
 0x496   : > { %v4378_v55 = vmax.f32 %v4376_v17, %v4377_v9  ;;  %v4391_v34 = vrot.slane %v4390_v21, 2  ;;  %v3671_v59 = vmax.f32 %v7940_v49, %v3670_v51  ;;  %v3255_v60 = vadd.f32 %v7802_v47, %v8142_v46 }
 0x497   : > { %4883 = vst.msk [vmem:[%s7643_s20 + $0x14] sm:$0xf] %vm1970_vm10, %v4867_v30  ;;  %v4372_v29 = vrot.slane %v4371_v44, 1  ;;  %v4385_v37 = vmax.f32 %v4383_v22, %v4384_v35  ;;  %v3260_v10 = vadd.f32 %v7805_v62, %v8143_v27  ;;  %v3594_v15 = vadd.f32 %v7849_v13, %v3555_v53 }
 0x498   : > { %v4379_v39 = vrot.slane %v4378_v55, 1  ;;  %v4392_v41 = vmax.f32 %v4390_v21, %v4391_v34  ;;  %v3915_v58 = vcombine.high %v3671_v59, %v3671_v59  ;;  %v3922_v52 = vrot.slane %v3671_v59, %v7576_v3  ;;  %v8145_v21 = vld [vmem:[#allocation30_spill] sm:$0xff] }
 0x499   : > { %v4373_v23 = vmax.f32 %v4371_v44, %v4372_v29  ;;  %v4386_v1 = vrot.slane %v4385_v37, 1  ;;  %v3556_v56 = vadd.f32 %v8144_v0, %v3255_v60  ;;  %v3626_v17 = vmax.f32 %v3594_v15, 0.0 }
 0x49a   : > { %v4380_v49 = vmax.f32 %v4378_v55, %v4379_v39  ;;  %v4393_v43 = vrot.slane %v4392_v41, 1  ;;  %v3929_v50 = vrot.slane %v3915_v58, %v7576_v3  ;;  %v3930_v42 = vcombine.high %v3922_v52, %v3922_v52 }
 0x49b   : > { %v4387_v45 = vmax.f32 %v4385_v37, %v4386_v1  ;;  %v5431_v26 = vpack.c.bf16 %v4373_v23, %v4373_v23  ;;  %v4395_v47 = vsel %vm4030_vm12, %v3922_v52, -inf  ;;  %v3557_v22 = vadd.f32 %v7700_v24, %v3260_v10 }
 0x49c   : > { %v4394_v11 = vmax.f32 %v4392_v41, %v4393_v43  ;;  %v5432_v62 = vpack.c.bf16 %v4380_v49, %v4380_v49  ;;  %v3931_v36 = vcombine.high %v3929_v50, %v3929_v50  ;;  %v4396_v6 = vrot.slane %v4395_v47, 4 }
 0x49d   : > { %v5433_v25 = vpack.c.bf16 %v4387_v45, %v4387_v45  ;;  %v4402_v32 = vsel %vm4030_vm12, %v3930_v42, -inf  ;;  %v4409_v57 = vsel %vm4030_vm12, %v3929_v50, -inf  ;;  %v4783_v14 = vunpack.c.l.b16 %v5431_v26 }
 0x49e   : > { %v4784_v2 = vunpack.c.l.b16 %v5432_v62  ;;  %v4397_v33 = vmax.f32 %v4395_v47, %v4396_v6  ;;  %v4403_v40 = vrot.slane %v4402_v32, 4  ;;  %v4410_v19 = vrot.slane %v4409_v57, 4 }
 0x49f   : > { %v4416_v54 = vsel %vm4030_vm12, %v3931_v36, -inf  ;;  %v5434_v28 = vpack.c.bf16 %v4394_v11, %v4394_v11  ;;  %v4785_v7 = vunpack.c.l.b16 %v5433_v25  ;;  %v3595_v9 = vadd.f32 %v7849_v13, %v3556_v56 }
 0x4a0   : > { %v4398_v18 = vrot.slane %v4397_v33, 2  ;;  %v4404_v38 = vmax.f32 %v4402_v32, %v4403_v40  ;;  %v4411_v8 = vmax.f32 %v4409_v57, %v4410_v19  ;;  %v4417_v20 = vrot.slane %v4416_v54, 4 }
 0x4a1   : > { %v4848_v63 = vsel %vm4799_vm13, %v4784_v2, %v4783_v14  ;;  %v3263_v12 = vadd.f32 %v7816_v4, %v8145_v21  ;;  %v4786_v53 = vunpack.c.l.b16 %v5434_v28  ;;  %v3596_v35 = vadd.f32 %v7849_v13, %v3557_v22 }
 0x4a2   : > { %v4399_v31 = vmax.f32 %v4397_v33, %v4398_v18  ;;  %v4405_v48 = vrot.slane %v4404_v38, 2  ;;  %v4412_v5 = vrot.slane %v4411_v8, 2  ;;  %v4418_v61 = vmax.f32 %v4416_v54, %v4417_v20 }
 0x4a3   : > { %v4849_v51 = vsel %vm4801_vm14, %v4785_v7, %v4848_v63  ;;  %v3558_v59 = vadd.f32 %v7706_v16, %v3263_v12  ;;  %v3672_v37 = vsel %vm2645_vm11, %v3626_v17, -inf  ;;  %v3628_v46 = vmax.f32 %v3596_v35, 0.0 }
 0x4a4   : > { %v4400_v30 = vrot.slane %v4399_v31, 1  ;;  %v4406_v44 = vmax.f32 %v4404_v38, %v4405_v48  ;;  %v4413_v55 = vmax.f32 %v4411_v8, %v4412_v5  ;;  %v4419_v34 = vrot.slane %v4418_v61, 2 }
 0x4a5   : > { %v3627_v10 = vmax.f32 %v3595_v9, 0.0  ;;  %v3597_v4 = vadd.f32 %v7849_v13, %v3558_v59  ;;  %v4850_v58 = vsel %vm4803_vm15, %v4786_v53, %v4849_v51  ;;  %v3673_v52 = vsel %vm2645_vm11, %v3628_v46, -inf }
 0x4a6   : > { %v4401_v29 = vmax.f32 %v4399_v31, %v4400_v30  ;;  %v4407_v24 = vrot.slane %v4406_v44, 1  ;;  %v4414_v60 = vrot.slane %v4413_v55, 1  ;;  %v4420_v27 = vmax.f32 %v4418_v61, %v4419_v34 }
 0x4a7   : > { %v3674_v0 = vmax.f32 %v3672_v37, %v3673_v52  ;;  %v3629_v16 = vmax.f32 %v3597_v4, 0.0  ;;  %v3675_v47 = vsel %vm2645_vm11, %v3627_v10, -inf }
 0x4a8   : > { %v4408_v39 = vmax.f32 %v4406_v44, %v4407_v24  ;;  %v5435_v41 = vpack.c.bf16 %v4401_v29, %v4401_v29  ;;  %v4415_v23 = vmax.f32 %v4413_v55, %v4414_v60  ;;  %v4421_v1 = vrot.slane %v4420_v27, 1 }
 0x4a9   : > { %v3932_v42 = vcombine.high %v3674_v0, %v3674_v0  ;;  %v3939_v45 = vrot.slane %v3674_v0, %v7576_v3  ;;  %v3676_v11 = vsel %vm2645_vm11, %v3629_v16, -inf }
 0x4aa   : > { %v5436_v56 = vpack.c.bf16 %v4408_v39, %v4408_v39  ;;  %v4787_v49 = vunpack.c.l.b16 %v5435_v41  ;;  %v4422_v43 = vmax.f32 %v4420_v27, %v4421_v1  ;;  %v5437_v50 = vpack.c.bf16 %v4415_v23, %v4415_v23 }
 0x4ab   : > { %v3946_v6 = vrot.slane %v3932_v42, %v7576_v3  ;;  %v3947_v25 = vcombine.high %v3939_v45, %v3939_v45  ;;  %v4423_v57 = vsel %vm4030_vm12, %v3939_v45, -inf  ;;  %v3677_v15 = vmax.f32 %v3675_v47, %v3676_v11 }
 0x4ac   : > { %v4788_v26 = vunpack.c.l.b16 %v5436_v56  ;;  %v4851_v13 = vsel %vm4805_vm0, %v4787_v49, %v4850_v58  ;;  %v5438_v62 = vpack.c.bf16 %v4422_v43, %v4422_v43  ;;  %v4789_v36 = vunpack.c.l.b16 %v5437_v50 }
 0x4ad   : > { %v3948_v40 = vcombine.high %v3946_v6, %v3946_v6  ;;  %v4424_v19 = vrot.slane %v4423_v57, 4  ;;  %v4430_v54 = vsel %vm4030_vm12, %v3947_v25, -inf  ;;  %v4437_v28 = vsel %vm4030_vm12, %v3946_v6, -inf }
 0x4ae   : > { %v4852_v32 = vsel %vm4807_vm1, %v4788_v26, %v4851_v13  ;;  %v4790_v2 = vunpack.c.l.b16 %v5438_v62  ;;  %v3949_v14 = vcombine.high %v3677_v15, %v3677_v15  ;;  %v3956_v18 = vrot.slane %v3677_v15, %v7576_v3 }
 0x4af   : > { %v4853_v33 = vsel %vm4809_vm2, %v4789_v36, %v4852_v32  ;;  %v4425_v7 = vmax.f32 %v4423_v57, %v4424_v19  ;;  %v4431_v8 = vrot.slane %v4430_v54, 4  ;;  %v4438_v20 = vrot.slane %v4437_v28, 4 }
 0x4b0   : > { %v4854_v38 = vsel %vm4811_vm3, %v4790_v2, %v4853_v33  ;;  %v4444_v63 = vsel %vm4030_vm12, %v3948_v40, -inf  ;;  %v3963_v31 = vrot.slane %v3949_v14, %v7576_v3  ;;  %v3964_v48 = vcombine.high %v3956_v18, %v3956_v18 }
 0x4b1   : > { %v4868_v17 = vpack.c.b16 %v4854_v38, %v4854_v38  ;;  %v4426_v22 = vrot.slane %v4425_v7, 2  ;;  %v4432_v5 = vmax.f32 %v4430_v54, %v4431_v8  ;;  %v4439_v61 = vmax.f32 %v4437_v28, %v4438_v20 }
 0x4b2   : > { %v4445_v9 = vrot.slane %v4444_v63, 4  ;;  %v3965_v21 = vcombine.high %v3963_v31, %v3963_v31  ;;  %v4451_v12 = vsel %vm4030_vm12, %v3956_v18, -inf  ;;  %v4458_v53 = vsel %vm4030_vm12, %v3964_v48, -inf }
 0x4b3   : > { %4884 = vst.msk [vmem:[%s7643_s20 + $0x18] sm:$0xf] %vm1970_vm10, %v4868_v17  ;;  %v4465_v30 = vsel %vm4030_vm12, %v3963_v31, -inf  ;;  %v4427_v44 = vmax.f32 %v4425_v7, %v4426_v22  ;;  %v4433_v35 = vrot.slane %v4432_v5, 2  ;;  %v4440_v51 = vrot.slane %v4439_v61, 2 }
 0x4b4   : > { %v4446_v55 = vmax.f32 %v4444_v63, %v4445_v9  ;;  %v4452_v34 = vrot.slane %v4451_v12, 4  ;;  %v4459_v3 = vrot.slane %v4458_v53, 4  ;;  %v4466_v59 = vrot.slane %v4465_v30, 4 }
 0x4b5   : > { %v4472_v29 = vsel %vm4030_vm12, %v3965_v21, -inf  ;;  %v4428_v24 = vrot.slane %v4427_v44, 1  ;;  %v4434_v37 = vmax.f32 %v4432_v5, %v4433_v35  ;;  %v4441_v46 = vmax.f32 %v4439_v61, %v4440_v51 }
 0x4b6   : > { %v4447_v60 = vrot.slane %v4446_v55, 2  ;;  %v4453_v27 = vmax.f32 %v4451_v12, %v4452_v34  ;;  %v4460_v10 = vmax.f32 %v4458_v53, %v4459_v3  ;;  %v4467_v4 = vmax.f32 %v4465_v30, %v4466_v59 }
 0x4b7   : > { %v4473_v39 = vrot.slane %v4472_v29, 4  ;;  %v4429_v41 = vmax.f32 %v4427_v44, %v4428_v24  ;;  %v4435_v58 = vrot.slane %v4434_v37, 1  ;;  %v4442_v52 = vrot.slane %v4441_v46, 1 }
 0x4b8   : > { %v4448_v23 = vmax.f32 %v4446_v55, %v4447_v60  ;;  %v4454_v1 = vrot.slane %v4453_v27, 2  ;;  %v4461_v0 = vrot.slane %v4460_v10, 2  ;;  %v4468_v16 = vrot.slane %v4467_v4, 2 }
 0x4b9   : > { %v4474_v56 = vmax.f32 %v4472_v29, %v4473_v39  ;;  %v4436_v49 = vmax.f32 %v4434_v37, %v4435_v58  ;;  %v4443_v43 = vmax.f32 %v4441_v46, %v4442_v52  ;;  %v5439_v42 = vpack.c.bf16 %v4429_v41, %v4429_v41 }
 0x4ba   : > { %v4449_v50 = vrot.slane %v4448_v23, 1  ;;  %v4455_v45 = vmax.f32 %v4453_v27, %v4454_v1  ;;  %v4462_v26 = vmax.f32 %v4460_v10, %v4461_v0  ;;  %v4469_v13 = vmax.f32 %v4467_v4, %v4468_v16 }
 0x4bb   : > { %v4475_v47 = vrot.slane %v4474_v56, 2  ;;  %v5440_v62 = vpack.c.bf16 %v4436_v49, %v4436_v49  ;;  %v5441_v36 = vpack.c.bf16 %v4443_v43, %v4443_v43  ;;  %v4791_v2 = vunpack.c.l.b16 %v5439_v42 }
 0x4bc   : > { %v4450_v11 = vmax.f32 %v4448_v23, %v4449_v50  ;;  %v4456_v6 = vrot.slane %v4455_v45, 1  ;;  %v4463_v25 = vrot.slane %v4462_v26, 1  ;;  %v4470_v32 = vrot.slane %v4469_v13, 1 }
 0x4bd   : > { %v4476_v57 = vmax.f32 %v4474_v56, %v4475_v47  ;;  %v4792_v33 = vunpack.c.l.b16 %v5440_v62  ;;  %v4793_v40 = vunpack.c.l.b16 %v5441_v36 }
 0x4be   : > { %v5442_v15 = vpack.c.bf16 %v4450_v11, %v4450_v11  ;;  %v4457_v19 = vmax.f32 %v4455_v45, %v4456_v6  ;;  %v4464_v54 = vmax.f32 %v4462_v26, %v4463_v25  ;;  %v4471_v28 = vmax.f32 %v4469_v13, %v4470_v32 }
 0x4bf   : > { %v4477_v14 = vrot.slane %v4476_v57, 1  ;;  %v4855_v38 = vsel %vm4799_vm13, %v4792_v33, %v4791_v2 }
 0x4c0   : > { %v4794_v18 = vunpack.c.l.b16 %v5442_v15  ;;  %v4856_v7 = vsel %vm4801_vm14, %v4793_v40, %v4855_v38  ;;  %v5443_v20 = vpack.c.bf16 %v4457_v19, %v4457_v19  ;;  %v5444_v17 = vpack.c.bf16 %v4464_v54, %v4464_v54 }
 0x4c1   : > { %v4478_v8 = vmax.f32 %v4476_v57, %v4477_v14  ;;  %v5445_v63 = vpack.c.bf16 %v4471_v28, %v4471_v28 }
 0x4c2   : > { %v4857_v31 = vsel %vm4803_vm15, %v4794_v18, %v4856_v7  ;;  %v4795_v22 = vunpack.c.l.b16 %v5443_v20  ;;  %v4796_v5 = vunpack.c.l.b16 %v5444_v17 }
 0x4c3   : > { %v5446_v48 = vpack.c.bf16 %v4478_v8, %v4478_v8  ;;  %v4797_v61 = vunpack.c.l.b16 %v5445_v63 }
 0x4c4   : > { %v4858_v9 = vsel %vm4805_vm0, %v4795_v22, %v4857_v31 }
 0x4c5   : > { %v4798_v21 = vunpack.c.l.b16 %v5446_v48  ;;  %v4859_v12 = vsel %vm4807_vm1, %v4796_v5, %v4858_v9 }
 0x4c6   : > { %v4860_v53 = vsel %vm4809_vm2, %v4797_v61, %v4859_v12 }
 0x4c7   : > { %v4861_v30 = vsel %vm4811_vm3, %v4798_v21, %v4860_v53 }
 0x4c8   : > { %v4869_v44 = vpack.c.b16 %v4861_v30, %v4861_v30 }
 0x4ca   : > { %4885 = vst.msk [vmem:[%s7643_s20 + $0x1c] sm:$0xf] %vm1970_vm10, %v4869_v44 }
 0x4cb   : > { %5828 = shalt.err (!%p5825_p10)
}
 0x4cc   : > { %s5829_s20 = scalar_lea.hbm %s8031_s15, 512  ;;  %s5833_s8 = scalar_lea.hbm %s8093_s7, 1024 }
 0x4cd   : > { %p5830_p11 = scmp.ne.s32.totalorder %s8031_s15, %s5829_s20  ;;  %p5834_p0 = scmp.lt.u32.totalorder %s8031_s15, %s8093_s7 }
 0x4ce   : > { %p5835_p1 = scmp.lt.u32.totalorder %s5833_s8, %s5829_s20  ;;  %p5837_p3 = scmp.lt.u32.totalorder %s5829_s20, %s8031_s15 }
 0x4cf   : > { %p5831_p12 = pnand %p5830_p11, %p5988_p4 }
 0x4d0   : > { %p5836_p2 = por %p5835_p1, %p5834_p0 }
 0x4d1   : > { %p5832_p13 = pneg %p5831_p12 }
 0x4d2   : > { %p5838_p5 = por %p5837_p3, %p5836_p2 }
 0x4d4   : > { %p5839_p6 = pnand %p5838_p5, %p5832_p13 }
 0x4d6   : > { %5842 = shalt.err (!%p5839_p6)
}
 0x4d7   : > { %5680 = dma.vmem_to_hbm [thread:$0]  (%p5988_p4), %s8033_s10, 512, %s8031_s15, %s4892_s16, %s5903_s23, %s5903_s23, %s5906_s12  }
 0x4d8 PF: > { %p5690_p7 = scmp.ge.s32.totalorder %s5897_s29, 2  ;;  %s4941_s27 = sand.u32 1, %s5877_s24  }
 0x4d9   : > { %s4942_s21 = scalar_lea.sflag [#allocation3], %s4941_s27 }
 0x4da   : > { %p5684_p9 = pnand %p5690_p7, %p5995_p8 }
 0x4dc   : > { %5868 = dma.done.wait (!%p5684_p9), %s4942_s21, 2048  }
 0x4dd   : > { %5870 = vsyncadd (!%p5684_p9), %s4942_s21, 4294965248  ;;  %s4951_s11 = scalar_lea.sflag [#allocation5], %s4941_s27 }
 0x4de   : > { %5872 = dma.done.wait (!%p5684_p9), %s4951_s11, 512  }
 0x4df   : > { %5874 = vsyncadd (!%p5684_p9), %s4951_s11, 4294966784  ;;  %s24_s29 = sadd.s32 1, %s5897_s29   ;;  %s8146_s24 = smov %s5881_s25 }
 0x4e0   : > { %p21_p10 = scmp.ge.s32.totalorder %s24_s29, 4   ;;  %s8147_s25 = smov %s5885_s26 }
 0x4e1   : > { %s8148_s26 = smov %s6001_s14  ;;  %s8149_s27 = smov %s5893_s28 }
 0x4e2   : > { %s8150_s28 = smov %s8152_s9  ;;  %23 = sbr.rel (!%p21_p10) target bundleno = 6 (0x6), region = 100 }
 0x4e9   :  { %4956 = vsyncpa [#allocation3], 1 }
 0x4ea   :  { %4958 = vsyncpa [#allocation3 + $0x1], 1 }
 0x4eb   :  { %4959 = vsyncpa [#allocation5], 1 }
 0x4ec   :  { %4961 = vsyncpa [#allocation5 + $0x1], 1 }

</bundles_post_ra>
